<compile_context>
chip_gen: v7x
topology: tpu7x:2x2x1
jax: 0.10.0
libtpu: 0.0.40
codegen_flags: <defaults>
</compile_context>

<pallas_src>
import jax
import jax.numpy as jnp
from jax.experimental import pallas as pl
from jax.experimental.pallas import tpu as pltpu


_PAD = 128                       # lane padding each side of the flat H*W plane
_GELU_C = 0.7978845608028654     # sqrt(2/pi)


# ----------------------------------------------------------------------------
# Pallas kernel
# ----------------------------------------------------------------------------

def _inorm_gelu(y):
    """InstanceNorm2d(affine=False, eps=1e-5) + GELU on a (C, H*W) f32 plane.

    Spatial axis is the lane axis, so mean/var are lane reductions; rsqrt/tanh
    run on the EUP slot, essentially free under the MXU.
    """
    mean = jnp.mean(y, axis=-1, keepdims=True)
    var = jnp.mean(jnp.square(y - mean), axis=-1, keepdims=True)
    yn = (y - mean) * jax.lax.rsqrt(var + 1e-5)
    # TODO(synk): PyTorch nn.GELU() defaults to the exact erf GELU; the tanh
    # approximation is used here for Mosaic-friendly (EUP) lowering.
    return 0.5 * yn * (1.0 + jnp.tanh(_GELU_C * (yn + 0.044715 * yn * yn * yn)))


def _make_bottleneck_kernel(H, W, C):
    """Fused conv3x3 -> IN -> GELU -> conv3x3 -> IN -> GELU -> FiLM per image."""
    HW = H * W
    assert W + 1 <= _PAD, "image width must fit inside the lane padding"

    def kernel(x_ref, w1_ref, b1_ref, w2_ref, b2_ref, cond_ref, wi_ref, bi_ref,
               o_ref, pad_ref):
        # Lane masks for the column wrap of the flat-shifted 3x3 taps.
        col = jax.lax.broadcasted_iota(jnp.int32, (1, HW), 1) % W
        mask_l = col != 0          # kx = -1 taps invalid where x == 0
        mask_r = col != (W - 1)    # kx = +1 taps invalid where x == W-1

        def conv3x3(w_ref, b_ref):
            # out[:, y*W+x] = sum_{ky,kx} W_{ky,kx} @ x[:, (y+ky)*W + (x+kx)]
            # The zero-padded flat bf16 plane lives in VMEM, so every tap is a
            # contiguous lane slice; 9 bf16 MXU matmuls accumulate in f32.
            # The matmul contracts only over channels (sublanes), so the column
            # wrap mask can be applied once per kx-group AFTER accumulation.
            def col_taps(kx):
                acc = None
                for ky in (-1, 0, 1):
                    s = ky * W + kx
                    xs = pad_ref[:, _PAD + s:_PAD + s + HW]        # (C, HW) bf16
                    t = jnp.dot(w_ref[(ky + 1) * 3 + (kx + 1)],    # (C, C) bf16
                                xs, preferred_element_type=jnp.float32)
                    acc = t if acc is None else acc + t
                return acc

            acc = col_taps(0)                       # vertical wrap handled by zero pads
            acc = acc + jnp.where(mask_l, col_taps(-1), 0.0)
            acc = acc + jnp.where(mask_r, col_taps(1), 0.0)
            return acc + b_ref[...]                 # (C, 1) bias

        # Re-zero only the pad strips (kept zero within the step since only the
        # center is written).  Done every step so it is correct when the batch
        # axis is sharded across TensorCores (per-core scratch).
        zeros_pad = jnp.zeros((C, _PAD), jnp.bfloat16)
        pad_ref[:, 0:_PAD] = zeros_pad
        pad_ref[:, _PAD + HW:_PAD + HW + _PAD] = zeros_pad

        # ---- ConvFusionModule (assumed: conv3x3 -> IN -> GELU, twice) ------
        # TODO(synk): ConvFusionModule source unavailable; assumed structure.
        pad_ref[:, _PAD:_PAD + HW] = x_ref[0]                       # bf16 copy
        h = _inorm_gelu(conv3x3(w1_ref, b1_ref))

        pad_ref[:, _PAD:_PAD + HW] = h.astype(jnp.bfloat16)
        h = _inorm_gelu(conv3x3(w2_ref, b2_ref))

        # ---- ConditionInjector (assumed FiLM: x * (1 + gamma) + beta) ------
        # TODO(synk): ConditionInjector source unavailable; assumed FiLM.
        # Linear(256 -> 2C) as broadcast-multiply + lane reduction (no MXU
        # shape constraints, f32 accumulation of bf16-rounded inputs).
        cond_row = cond_ref[0].astype(jnp.float32)                  # (1, 256)
        gb = (jnp.sum(wi_ref[...].astype(jnp.float32) * cond_row,
                      axis=-1, keepdims=True)
              + bi_ref[...])                                        # (2C, 1)
        gamma = gb[:C, :]
        beta = gb[C:, :]
        o_ref[0] = (h * (1.0 + gamma) + beta).astype(o_ref.dtype)

    return kernel


# ----------------------------------------------------------------------------
# Forward wrapper
# ----------------------------------------------------------------------------

def ginka_bottleneck_fwd(params, x_nchw, cond):
    N, C, H, W = x_nchw.shape
    HW = H * W
    cond_dim = cond.shape[-1]

    # (N, C, H*W) channels-in-sublanes / spatial-in-lanes layout; bf16 storage.
    x = x_nchw.reshape(N, C, HW).astype(jnp.bfloat16)
    cond_b = cond.astype(jnp.bfloat16).reshape(N, 1, cond_dim)

    out = pl.pallas_call(
        _make_bottleneck_kernel(H, W, C),
        out_shape=jax.ShapeDtypeStruct((N, C, HW), jnp.float32),
        grid=(N,),
        in_specs=[
            pl.BlockSpec((1, C, HW), lambda n: (n, 0, 0)),          # x (bf16)
            pl.BlockSpec((9, C, C), lambda n: (0, 0, 0)),           # conv1 w (resident)
            pl.BlockSpec((C, 1), lambda n: (0, 0)),                 # conv1 b
            pl.BlockSpec((9, C, C), lambda n: (0, 0, 0)),           # conv2 w (resident)
            pl.BlockSpec((C, 1), lambda n: (0, 0)),                 # conv2 b
            pl.BlockSpec((1, 1, cond_dim), lambda n: (n, 0, 0)),    # cond row (bf16)
            pl.BlockSpec((2 * C, cond_dim), lambda n: (0, 0)),      # inj w (resident)
            pl.BlockSpec((2 * C, 1), lambda n: (0, 0)),             # inj b
        ],
        out_specs=pl.BlockSpec((1, C, HW), lambda n: (n, 0, 0)),
        scratch_shapes=[
            pltpu.VMEM((C, HW + 2 * _PAD), jnp.bfloat16),           # padded conv plane
        ],
        compiler_params=pltpu.CompilerParams(
            dimension_semantics=("parallel",)),  # N>=2 steps -> both v7x TCs
    )(x, params["conv1"]["w"], params["conv1"]["b"],
      params["conv2"]["w"], params["conv2"]["b"],
      cond_b, params["inj"]["w"], params["inj"]["b"])

    return out.reshape(N, C, H, W)


# ----------------------------------------------------------------------------
# Pure-JAX reference (matching bf16 rounding of the MXU inputs)
# ----------------------------------------------------------------------------

def _reference_fwd(params, x_nchw, cond):
    N, C, H, W = x_nchw.shape
    bf = lambda t: t.astype(jnp.bfloat16).astype(jnp.float32)

    def conv3x3(h, w9, b):
        # w9 is (9, Cout, Cin) = torch_w.permute(2, 3, 0, 1).reshape(9, Co, Ci)
        wpt = jnp.transpose(w9.astype(jnp.float32).reshape(3, 3, C, C),
                            (2, 3, 0, 1))
        y = jax.lax.conv_general_dilated(
            h, wpt, window_strides=(1, 1), padding=((1, 1), (1, 1)),
            dimension_numbers=("NCHW", "OIHW", "NCHW"),
            precision=jax.lax.Precision.HIGHEST)
        return y + b.reshape(1, C, 1, 1)

    def inorm_gelu(y):
        mean = jnp.mean(y, axis=(2, 3), keepdims=True)
        var = jnp.mean(jnp.square(y - mean), axis=(2, 3), keepdims=True)
        yn = (y - mean) * jax.lax.rsqrt(var + 1e-5)
        return 0.5 * yn * (1.0 + jnp.tanh(_GELU_C * (yn + 0.044715 * yn ** 3)))

    h = inorm_gelu(conv3x3(bf(x_nchw), params["conv1"]["w"], params["conv1"]["b"]))
    h = inorm_gelu(conv3x3(bf(h), params["conv2"]["w"], params["conv2"]["b"]))
    gb = jnp.dot(bf(cond), params["inj"]["w"].astype(jnp.float32).T,
                 precision=jax.lax.Precision.HIGHEST) \
        + params["inj"]["b"].reshape(1, 2 * C)
    gamma = gb[:, :C].reshape(N, C, 1, 1)
    beta = gb[:, C:].reshape(N, C, 1, 1)
    return h * (1.0 + gamma) + beta


# ----------------------------------------------------------------------------
# Deterministic parameter initialization
# ----------------------------------------------------------------------------

def init_params(key, module_ch, cond_dim=256):
    C = module_ch
    ks = jax.random.split(key, 6)

    def t(k, shape, scale):
        return scale * jax.random.normal(k, shape, jnp.float32)

    return {
        # Conv2d weights pre-arranged as (9, Cout, Cin)
        #   == torch_w.permute(2, 3, 0, 1).reshape(9, Cout, Cin); stored bf16.
        "conv1": {"w": t(ks[0], (9, C, C), (9 * C) ** -0.5).astype(jnp.bfloat16),
                  "b": t(ks[1], (C, 1), 0.01)},
        "conv2": {"w": t(ks[2], (9, C, C), (9 * C) ** -0.5).astype(jnp.bfloat16),
                  "b": t(ks[3], (C, 1), 0.01)},
        # Linear(256 -> 2C): stored in torch layout (2C, 256) bf16; bias (2C, 1).
        "inj": {"w": t(ks[4], (2 * C, cond_dim), cond_dim ** -0.5).astype(jnp.bfloat16),
                "b": t(ks[5], (2 * C, 1), 0.01)},
    }


# ----------------------------------------------------------------------------
# main
# ----------------------------------------------------------------------------

if __name__ == "__main__":
    key = jax.random.PRNGKey(0)
    k_param, k_x, k_cond = jax.random.split(key, 3)

    # Small shapes consistent with the module: a UNet bottleneck plane
    # (module_ch channels, w = h = 16) and a 256-d condition vector.
    MODULE_CH, N, H, W, COND_DIM = 64, 2, 16, 16, 256

    params = init_params(k_param, MODULE_CH, COND_DIM)
    x = jax.random.normal(k_x, (N, MODULE_CH, H, W), jnp.float32)   # NCHW
    cond = jax.random.normal(k_cond, (N, COND_DIM), jnp.float32)

    out = jax.jit(ginka_bottleneck_fwd)(params, x, cond)
    out = jax.block_until_ready(out)

    assert out.shape == (N, MODULE_CH, H, W), out.shape
    assert bool(jnp.all(jnp.isfinite(out)))

    ref = _reference_fwd(params, x, cond)
    err = float(jnp.max(jnp.abs(out - ref)))
    assert err < 5e-2, f"max abs error vs reference: {err}"

    print("KERNEL_OK")
</pallas_src>

<mosaic_0001>
module attributes {stable_mosaic.version = 11 : i64} {
  func.func @kernel(%arg0: i32, %arg1: memref<1x64x256xbf16, #tpu.memory_space<vmem>>, %arg2: memref<9x64x64xbf16, #tpu.memory_space<vmem>>, %arg3: memref<64x1xf32, #tpu.memory_space<vmem>>, %arg4: memref<9x64x64xbf16, #tpu.memory_space<vmem>>, %arg5: memref<64x1xf32, #tpu.memory_space<vmem>>, %arg6: memref<1x1x256xbf16, #tpu.memory_space<vmem>>, %arg7: memref<128x256xbf16, #tpu.memory_space<vmem>>, %arg8: memref<128x1xf32, #tpu.memory_space<vmem>>, %arg9: memref<1x64x256xf32, #tpu.memory_space<vmem>>, %arg10: memref<64x512xbf16, #tpu.memory_space<vmem>>) attributes {dimension_semantics = [#tpu.dimension_semantics<parallel>], iteration_bounds = array<i64: 2>, scalar_prefetch = 0 : i64, scratch_operands = 1 : i64, tpu.core_type = #tpu.core_type<tc>, window_params = [{transform_indices = @transform_0, window_bounds = array<i64: 1, 64, 256>}, {pipeline_mode = #tpu.pipeline_mode<synchronous>, transform_indices = @transform_1, window_bounds = array<i64: 9, 64, 64>}, {pipeline_mode = #tpu.pipeline_mode<synchronous>, transform_indices = @transform_2, window_bounds = array<i64: 64, 1>}, {pipeline_mode = #tpu.pipeline_mode<synchronous>, transform_indices = @transform_3, window_bounds = array<i64: 9, 64, 64>}, {pipeline_mode = #tpu.pipeline_mode<synchronous>, transform_indices = @transform_4, window_bounds = array<i64: 64, 1>}, {transform_indices = @transform_5, window_bounds = array<i64: 1, 1, 256>}, {pipeline_mode = #tpu.pipeline_mode<synchronous>, transform_indices = @transform_6, window_bounds = array<i64: 128, 256>}, {pipeline_mode = #tpu.pipeline_mode<synchronous>, transform_indices = @transform_7, window_bounds = array<i64: 128, 1>}, {transform_indices = @transform_8, window_bounds = array<i64: 1, 64, 256>}]} {
    %0 = tpu.iota {dimensions = array<i32: 1>} : vector<1x256xi32>
    %c16_i32 = arith.constant 16 : i32
    %c0_i32 = arith.constant 0 : i32
    %1 = arith.cmpi eq, %c16_i32, %c0_i32 : i32
    %c1_i32 = arith.constant 1 : i32
    %2 = arith.select %1, %c1_i32, %c16_i32 : i32
    %3 = vector.broadcast %2 : i32 to vector<1x256xi32>
    %4 = arith.remsi %0, %3 : vector<1x256xi32>
    %c0_i32_0 = arith.constant 0 : i32
    %5 = vector.broadcast %c0_i32_0 : i32 to vector<1x256xi32>
    %6 = arith.cmpi ne, %4, %5 : vector<1x256xi32>
    %c0_i32_1 = arith.constant 0 : i32
    %7 = vector.broadcast %c0_i32_1 : i32 to vector<1x256xi32>
    %8 = arith.cmpi slt, %4, %7 : vector<1x256xi32>
    %c0_i32_2 = arith.constant 0 : i32
    %9 = arith.cmpi slt, %2, %c0_i32_2 : i32
    %10 = vector.broadcast %9 : i1 to vector<1x256xi1>
    %11 = vector.broadcast %10 : vector<1x256xi1> to vector<1x256xi1>
    %12 = arith.xori %8, %11 : vector<1x256xi1>
    %13 = arith.andi %12, %6 : vector<1x256xi1>
    %14 = vector.broadcast %2 : i32 to vector<1x256xi32>
    %15 = arith.addi %4, %14 : vector<1x256xi32>
    %16 = arith.select %13, %15, %4 : vector<1x256xi1>, vector<1x256xi32>
    %c0_i32_3 = arith.constant 0 : i32
    %17 = vector.broadcast %c0_i32_3 : i32 to vector<1x256xi32>
    %18 = arith.cmpi ne, %16, %17 : vector<1x256xi32>
    %c15_i32 = arith.constant 15 : i32
    %19 = vector.broadcast %c15_i32 : i32 to vector<1x256xi32>
    %20 = arith.cmpi ne, %16, %19 : vector<1x256xi32>
    %cst = arith.constant 0.000000e+00 : bf16
    %21 = vector.broadcast %cst : bf16 to vector<64x128xbf16>
    %c0 = arith.constant 0 : index
    %c0_4 = arith.constant 0 : index
    %22 = vector.load %arg10[%c0, %c0_4] : memref<64x512xbf16, #tpu.memory_space<vmem>>, vector<64x128xbf16>
    tpu.vector_store %arg10[%c0, %c0_4], %21 {strides = array<i32>} : memref<64x512xbf16, #tpu.memory_space<vmem>>, vector<64x128xbf16>,
    %c0_5 = arith.constant 0 : index
    %c384 = arith.constant 384 : index
    %23 = vector.load %arg10[%c0_5, %c384] : memref<64x512xbf16, #tpu.memory_space<vmem>>, vector<64x128xbf16>
    tpu.vector_store %arg10[%c0_5, %c384], %21 {strides = array<i32>} : memref<64x512xbf16, #tpu.memory_space<vmem>>, vector<64x128xbf16>,
    %c0_6 = arith.constant 0 : index
    %c0_7 = arith.constant 0 : index
    %c0_8 = arith.constant 0 : index
    %24 = vector.load %arg1[%c0_6, %c0_7, %c0_8] : memref<1x64x256xbf16, #tpu.memory_space<vmem>>, vector<1x64x256xbf16>
    %25 = vector.shape_cast %24 : vector<1x64x256xbf16> to vector<64x256xbf16>
    %c0_9 = arith.constant 0 : index
    %c128 = arith.constant 128 : index
    %26 = vector.load %arg10[%c0_9, %c128] : memref<64x512xbf16, #tpu.memory_space<vmem>>, vector<64x256xbf16>
    tpu.vector_store %arg10[%c0_9, %c128], %25 {strides = array<i32>} : memref<64x512xbf16, #tpu.memory_space<vmem>>, vector<64x256xbf16>,
    %c0_10 = arith.constant 0 : index
    %c112 = arith.constant 112 : index
    %27 = vector.load %arg10[%c0_10, %c112] : memref<64x512xbf16, #tpu.memory_space<vmem>>, vector<64x256xbf16>
    %c1 = arith.constant 1 : index
    %c0_11 = arith.constant 0 : index
    %c0_12 = arith.constant 0 : index
    %28 = vector.load %arg2[%c1, %c0_11, %c0_12] : memref<9x64x64xbf16, #tpu.memory_space<vmem>>, vector<1x64x64xbf16>
    %29 = vector.shape_cast %28 : vector<1x64x64xbf16> to vector<64x64xbf16>
    %cst_13 = arith.constant dense<0.000000e+00> : vector<64x256xf32>
    %30 = tpu.matmul %29, %27, %cst_13 {dimension_numbers = #tpu.dot_dimension_numbers<[1], [0], [0], [1], [0, 0, 1, 1], [], []>} : vector<64x64xbf16>, vector<64x256xbf16>, vector<64x256xf32> -> vector<64x256xf32>
    %c0_14 = arith.constant 0 : index
    %c128_15 = arith.constant 128 : index
    %31 = vector.load %arg10[%c0_14, %c128_15] : memref<64x512xbf16, #tpu.memory_space<vmem>>, vector<64x256xbf16>
    %c4 = arith.constant 4 : index
    %c0_16 = arith.constant 0 : index
    %c0_17 = arith.constant 0 : index
    %32 = vector.load %arg2[%c4, %c0_16, %c0_17] : memref<9x64x64xbf16, #tpu.memory_space<vmem>>, vector<1x64x64xbf16>
    %33 = vector.shape_cast %32 : vector<1x64x64xbf16> to vector<64x64xbf16>
    %cst_18 = arith.constant dense<0.000000e+00> : vector<64x256xf32>
    %34 = tpu.matmul %33, %31, %cst_18 {dimension_numbers = #tpu.dot_dimension_numbers<[1], [0], [0], [1], [0, 0, 1, 1], [], []>} : vector<64x64xbf16>, vector<64x256xbf16>, vector<64x256xf32> -> vector<64x256xf32>
    %35 = arith.addf %30, %34 : vector<64x256xf32>
    %c0_19 = arith.constant 0 : index
    %c144 = arith.constant 144 : index
    %36 = vector.load %arg10[%c0_19, %c144] : memref<64x512xbf16, #tpu.memory_space<vmem>>, vector<64x256xbf16>
    %c7 = arith.constant 7 : index
    %c0_20 = arith.constant 0 : index
    %c0_21 = arith.constant 0 : index
    %37 = vector.load %arg2[%c7, %c0_20, %c0_21] : memref<9x64x64xbf16, #tpu.memory_space<vmem>>, vector<1x64x64xbf16>
    %38 = vector.shape_cast %37 : vector<1x64x64xbf16> to vector<64x64xbf16>
    %cst_22 = arith.constant dense<0.000000e+00> : vector<64x256xf32>
    %39 = tpu.matmul %38, %36, %cst_22 {dimension_numbers = #tpu.dot_dimension_numbers<[1], [0], [0], [1], [0, 0, 1, 1], [], []>} : vector<64x64xbf16>, vector<64x256xbf16>, vector<64x256xf32> -> vector<64x256xf32>
    %40 = arith.addf %35, %39 : vector<64x256xf32>
    %c0_23 = arith.constant 0 : index
    %c111 = arith.constant 111 : index
    %41 = vector.load %arg10[%c0_23, %c111] : memref<64x512xbf16, #tpu.memory_space<vmem>>, vector<64x256xbf16>
    %c0_24 = arith.constant 0 : index
    %c0_25 = arith.constant 0 : index
    %c0_26 = arith.constant 0 : index
    %42 = vector.load %arg2[%c0_24, %c0_25, %c0_26] : memref<9x64x64xbf16, #tpu.memory_space<vmem>>, vector<1x64x64xbf16>
    %43 = vector.shape_cast %42 : vector<1x64x64xbf16> to vector<64x64xbf16>
    %cst_27 = arith.constant dense<0.000000e+00> : vector<64x256xf32>
    %44 = tpu.matmul %43, %41, %cst_27 {dimension_numbers = #tpu.dot_dimension_numbers<[1], [0], [0], [1], [0, 0, 1, 1], [], []>} : vector<64x64xbf16>, vector<64x256xbf16>, vector<64x256xf32> -> vector<64x256xf32>
    %c0_28 = arith.constant 0 : index
    %c127 = arith.constant 127 : index
    %45 = vector.load %arg10[%c0_28, %c127] : memref<64x512xbf16, #tpu.memory_space<vmem>>, vector<64x256xbf16>
    %c3 = arith.constant 3 : index
    %c0_29 = arith.constant 0 : index
    %c0_30 = arith.constant 0 : index
    %46 = vector.load %arg2[%c3, %c0_29, %c0_30] : memref<9x64x64xbf16, #tpu.memory_space<vmem>>, vector<1x64x64xbf16>
    %47 = vector.shape_cast %46 : vector<1x64x64xbf16> to vector<64x64xbf16>
    %cst_31 = arith.constant dense<0.000000e+00> : vector<64x256xf32>
    %48 = tpu.matmul %47, %45, %cst_31 {dimension_numbers = #tpu.dot_dimension_numbers<[1], [0], [0], [1], [0, 0, 1, 1], [], []>} : vector<64x64xbf16>, vector<64x256xbf16>, vector<64x256xf32> -> vector<64x256xf32>
    %49 = arith.addf %44, %48 : vector<64x256xf32>
    %c0_32 = arith.constant 0 : index
    %c143 = arith.constant 143 : index
    %50 = vector.load %arg10[%c0_32, %c143] : memref<64x512xbf16, #tpu.memory_space<vmem>>, vector<64x256xbf16>
    %c6 = arith.constant 6 : index
    %c0_33 = arith.constant 0 : index
    %c0_34 = arith.constant 0 : index
    %51 = vector.load %arg2[%c6, %c0_33, %c0_34] : memref<9x64x64xbf16, #tpu.memory_space<vmem>>, vector<1x64x64xbf16>
    %52 = vector.shape_cast %51 : vector<1x64x64xbf16> to vector<64x64xbf16>
    %cst_35 = arith.constant dense<0.000000e+00> : vector<64x256xf32>
    %53 = tpu.matmul %52, %50, %cst_35 {dimension_numbers = #tpu.dot_dimension_numbers<[1], [0], [0], [1], [0, 0, 1, 1], [], []>} : vector<64x64xbf16>, vector<64x256xbf16>, vector<64x256xf32> -> vector<64x256xf32>
    %54 = arith.addf %49, %53 : vector<64x256xf32>
    %cst_36 = arith.constant 0.000000e+00 : f32
    %55 = vector.shape_cast %18 : vector<1x256xi1> to vector<1x256xi1>
    %56 = vector.broadcast %55 : vector<1x256xi1> to vector<64x256xi1>
    %57 = vector.broadcast %cst_36 : f32 to vector<64x256xf32>
    %58 = arith.select %56, %54, %57 : vector<64x256xi1>, vector<64x256xf32>
    %59 = arith.addf %40, %58 : vector<64x256xf32>
    %c0_37 = arith.constant 0 : index
    %c113 = arith.constant 113 : index
    %60 = vector.load %arg10[%c0_37, %c113] : memref<64x512xbf16, #tpu.memory_space<vmem>>, vector<64x256xbf16>
    %c2 = arith.constant 2 : index
    %c0_38 = arith.constant 0 : index
    %c0_39 = arith.constant 0 : index
    %61 = vector.load %arg2[%c2, %c0_38, %c0_39] : memref<9x64x64xbf16, #tpu.memory_space<vmem>>, vector<1x64x64xbf16>
    %62 = vector.shape_cast %61 : vector<1x64x64xbf16> to vector<64x64xbf16>
    %cst_40 = arith.constant dense<0.000000e+00> : vector<64x256xf32>
    %63 = tpu.matmul %62, %60, %cst_40 {dimension_numbers = #tpu.dot_dimension_numbers<[1], [0], [0], [1], [0, 0, 1, 1], [], []>} : vector<64x64xbf16>, vector<64x256xbf16>, vector<64x256xf32> -> vector<64x256xf32>
    %c0_41 = arith.constant 0 : index
    %c129 = arith.constant 129 : index
    %64 = vector.load %arg10[%c0_41, %c129] : memref<64x512xbf16, #tpu.memory_space<vmem>>, vector<64x256xbf16>
    %c5 = arith.constant 5 : index
    %c0_42 = arith.constant 0 : index
    %c0_43 = arith.constant 0 : index
    %65 = vector.load %arg2[%c5, %c0_42, %c0_43] : memref<9x64x64xbf16, #tpu.memory_space<vmem>>, vector<1x64x64xbf16>
    %66 = vector.shape_cast %65 : vector<1x64x64xbf16> to vector<64x64xbf16>
    %cst_44 = arith.constant dense<0.000000e+00> : vector<64x256xf32>
    %67 = tpu.matmul %66, %64, %cst_44 {dimension_numbers = #tpu.dot_dimension_numbers<[1], [0], [0], [1], [0, 0, 1, 1], [], []>} : vector<64x64xbf16>, vector<64x256xbf16>, vector<64x256xf32> -> vector<64x256xf32>
    %68 = arith.addf %63, %67 : vector<64x256xf32>
    %c0_45 = arith.constant 0 : index
    %c145 = arith.constant 145 : index
    %69 = vector.load %arg10[%c0_45, %c145] : memref<64x512xbf16, #tpu.memory_space<vmem>>, vector<64x256xbf16>
    %c8 = arith.constant 8 : index
    %c0_46 = arith.constant 0 : index
    %c0_47 = arith.constant 0 : index
    %70 = vector.load %arg2[%c8, %c0_46, %c0_47] : memref<9x64x64xbf16, #tpu.memory_space<vmem>>, vector<1x64x64xbf16>
    %71 = vector.shape_cast %70 : vector<1x64x64xbf16> to vector<64x64xbf16>
    %cst_48 = arith.constant dense<0.000000e+00> : vector<64x256xf32>
    %72 = tpu.matmul %71, %69, %cst_48 {dimension_numbers = #tpu.dot_dimension_numbers<[1], [0], [0], [1], [0, 0, 1, 1], [], []>} : vector<64x64xbf16>, vector<64x256xbf16>, vector<64x256xf32> -> vector<64x256xf32>
    %73 = arith.addf %68, %72 : vector<64x256xf32>
    %cst_49 = arith.constant 0.000000e+00 : f32
    %74 = vector.shape_cast %20 : vector<1x256xi1> to vector<1x256xi1>
    %75 = vector.broadcast %74 : vector<1x256xi1> to vector<64x256xi1>
    %76 = vector.broadcast %cst_49 : f32 to vector<64x256xf32>
    %77 = arith.select %75, %73, %76 : vector<64x256xi1>, vector<64x256xf32>
    %78 = arith.addf %59, %77 : vector<64x256xf32>
    %c0_50 = arith.constant 0 : index
    %c0_51 = arith.constant 0 : index
    %79 = vector.load %arg3[%c0_50, %c0_51] : memref<64x1xf32, #tpu.memory_space<vmem>>, vector<64x1xf32>
    %80 = vector.broadcast %79 : vector<64x1xf32> to vector<64x256xf32>
    %81 = arith.addf %78, %80 : vector<64x256xf32>
    %cst_52 = arith.constant dense<0.000000e+00> : vector<64xf32>
    %82 = vector.multi_reduction <add>, %81, %cst_52 [1] : vector<64x256xf32> to vector<64xf32>
    %83 = vector.shape_cast %82 : vector<64xf32> to vector<64x1xf32>
    %cst_53 = arith.constant 2.560000e+02 : f32
    %84 = vector.broadcast %cst_53 : f32 to vector<64x1xf32>
    %85 = arith.divf %83, %84 : vector<64x1xf32>
    %86 = vector.broadcast %85 : vector<64x1xf32> to vector<64x256xf32>
    %87 = arith.subf %81, %86 : vector<64x256xf32>
    %88 = arith.mulf %87, %87 : vector<64x256xf32>
    %cst_54 = arith.constant dense<0.000000e+00> : vector<64xf32>
    %89 = vector.multi_reduction <add>, %88, %cst_54 [1] : vector<64x256xf32> to vector<64xf32>
    %90 = vector.shape_cast %89 : vector<64xf32> to vector<64x1xf32>
    %cst_55 = arith.constant 2.560000e+02 : f32
    %91 = vector.broadcast %cst_55 : f32 to vector<64x1xf32>
    %92 = arith.divf %90, %91 : vector<64x1xf32>
    %93 = vector.broadcast %85 : vector<64x1xf32> to vector<64x256xf32>
    %94 = arith.subf %81, %93 : vector<64x256xf32>
    %cst_56 = arith.constant 9.99999974E-6 : f32
    %95 = vector.broadcast %cst_56 : f32 to vector<64x1xf32>
    %96 = arith.addf %92, %95 : vector<64x1xf32>
    %97 = math.rsqrt %96 : vector<64x1xf32>
    %98 = vector.broadcast %97 : vector<64x1xf32> to vector<64x256xf32>
    %99 = arith.mulf %94, %98 : vector<64x256xf32>
    %cst_57 = arith.constant 5.000000e-01 : f32
    %100 = vector.broadcast %cst_57 : f32 to vector<64x256xf32>
    %101 = arith.mulf %100, %99 : vector<64x256xf32>
    %cst_58 = arith.constant 4.471500e-02 : f32
    %102 = vector.broadcast %cst_58 : f32 to vector<64x256xf32>
    %103 = arith.mulf %102, %99 : vector<64x256xf32>
    %104 = arith.mulf %103, %99 : vector<64x256xf32>
    %105 = arith.mulf %104, %99 : vector<64x256xf32>
    %106 = arith.addf %99, %105 : vector<64x256xf32>
    %cst_59 = arith.constant 0.797884583 : f32
    %107 = vector.broadcast %cst_59 : f32 to vector<64x256xf32>
    %108 = arith.mulf %107, %106 : vector<64x256xf32>
    %109 = math.tanh %108 : vector<64x256xf32>
    %cst_60 = arith.constant 1.000000e+00 : f32
    %110 = vector.broadcast %cst_60 : f32 to vector<64x256xf32>
    %111 = arith.addf %110, %109 : vector<64x256xf32>
    %112 = arith.mulf %101, %111 : vector<64x256xf32>
    %113 = arith.truncf %112 : vector<64x256xf32> to vector<64x256xbf16>
    %c0_61 = arith.constant 0 : index
    %c128_62 = arith.constant 128 : index
    %114 = vector.load %arg10[%c0_61, %c128_62] : memref<64x512xbf16, #tpu.memory_space<vmem>>, vector<64x256xbf16>
    tpu.vector_store %arg10[%c0_61, %c128_62], %113 {strides = array<i32>} : memref<64x512xbf16, #tpu.memory_space<vmem>>, vector<64x256xbf16>,
    %c0_63 = arith.constant 0 : index
    %c112_64 = arith.constant 112 : index
    %115 = vector.load %arg10[%c0_63, %c112_64] : memref<64x512xbf16, #tpu.memory_space<vmem>>, vector<64x256xbf16>
    %c1_65 = arith.constant 1 : index
    %c0_66 = arith.constant 0 : index
    %c0_67 = arith.constant 0 : index
    %116 = vector.load %arg4[%c1_65, %c0_66, %c0_67] : memref<9x64x64xbf16, #tpu.memory_space<vmem>>, vector<1x64x64xbf16>
    %117 = vector.shape_cast %116 : vector<1x64x64xbf16> to vector<64x64xbf16>
    %cst_68 = arith.constant dense<0.000000e+00> : vector<64x256xf32>
    %118 = tpu.matmul %117, %115, %cst_68 {dimension_numbers = #tpu.dot_dimension_numbers<[1], [0], [0], [1], [0, 0, 1, 1], [], []>} : vector<64x64xbf16>, vector<64x256xbf16>, vector<64x256xf32> -> vector<64x256xf32>
    %c0_69 = arith.constant 0 : index
    %c128_70 = arith.constant 128 : index
    %119 = vector.load %arg10[%c0_69, %c128_70] : memref<64x512xbf16, #tpu.memory_space<vmem>>, vector<64x256xbf16>
    %c4_71 = arith.constant 4 : index
    %c0_72 = arith.constant 0 : index
    %c0_73 = arith.constant 0 : index
    %120 = vector.load %arg4[%c4_71, %c0_72, %c0_73] : memref<9x64x64xbf16, #tpu.memory_space<vmem>>, vector<1x64x64xbf16>
    %121 = vector.shape_cast %120 : vector<1x64x64xbf16> to vector<64x64xbf16>
    %cst_74 = arith.constant dense<0.000000e+00> : vector<64x256xf32>
    %122 = tpu.matmul %121, %119, %cst_74 {dimension_numbers = #tpu.dot_dimension_numbers<[1], [0], [0], [1], [0, 0, 1, 1], [], []>} : vector<64x64xbf16>, vector<64x256xbf16>, vector<64x256xf32> -> vector<64x256xf32>
    %123 = arith.addf %118, %122 : vector<64x256xf32>
    %c0_75 = arith.constant 0 : index
    %c144_76 = arith.constant 144 : index
    %124 = vector.load %arg10[%c0_75, %c144_76] : memref<64x512xbf16, #tpu.memory_space<vmem>>, vector<64x256xbf16>
    %c7_77 = arith.constant 7 : index
    %c0_78 = arith.constant 0 : index
    %c0_79 = arith.constant 0 : index
    %125 = vector.load %arg4[%c7_77, %c0_78, %c0_79] : memref<9x64x64xbf16, #tpu.memory_space<vmem>>, vector<1x64x64xbf16>
    %126 = vector.shape_cast %125 : vector<1x64x64xbf16> to vector<64x64xbf16>
    %cst_80 = arith.constant dense<0.000000e+00> : vector<64x256xf32>
    %127 = tpu.matmul %126, %124, %cst_80 {dimension_numbers = #tpu.dot_dimension_numbers<[1], [0], [0], [1], [0, 0, 1, 1], [], []>} : vector<64x64xbf16>, vector<64x256xbf16>, vector<64x256xf32> -> vector<64x256xf32>
    %128 = arith.addf %123, %127 : vector<64x256xf32>
    %c0_81 = arith.constant 0 : index
    %c111_82 = arith.constant 111 : index
    %129 = vector.load %arg10[%c0_81, %c111_82] : memref<64x512xbf16, #tpu.memory_space<vmem>>, vector<64x256xbf16>
    %c0_83 = arith.constant 0 : index
    %c0_84 = arith.constant 0 : index
    %c0_85 = arith.constant 0 : index
    %130 = vector.load %arg4[%c0_83, %c0_84, %c0_85] : memref<9x64x64xbf16, #tpu.memory_space<vmem>>, vector<1x64x64xbf16>
    %131 = vector.shape_cast %130 : vector<1x64x64xbf16> to vector<64x64xbf16>
    %cst_86 = arith.constant dense<0.000000e+00> : vector<64x256xf32>
    %132 = tpu.matmul %131, %129, %cst_86 {dimension_numbers = #tpu.dot_dimension_numbers<[1], [0], [0], [1], [0, 0, 1, 1], [], []>} : vector<64x64xbf16>, vector<64x256xbf16>, vector<64x256xf32> -> vector<64x256xf32>
    %c0_87 = arith.constant 0 : index
    %c127_88 = arith.constant 127 : index
    %133 = vector.load %arg10[%c0_87, %c127_88] : memref<64x512xbf16, #tpu.memory_space<vmem>>, vector<64x256xbf16>
    %c3_89 = arith.constant 3 : index
    %c0_90 = arith.constant 0 : index
    %c0_91 = arith.constant 0 : index
    %134 = vector.load %arg4[%c3_89, %c0_90, %c0_91] : memref<9x64x64xbf16, #tpu.memory_space<vmem>>, vector<1x64x64xbf16>
    %135 = vector.shape_cast %134 : vector<1x64x64xbf16> to vector<64x64xbf16>
    %cst_92 = arith.constant dense<0.000000e+00> : vector<64x256xf32>
    %136 = tpu.matmul %135, %133, %cst_92 {dimension_numbers = #tpu.dot_dimension_numbers<[1], [0], [0], [1], [0, 0, 1, 1], [], []>} : vector<64x64xbf16>, vector<64x256xbf16>, vector<64x256xf32> -> vector<64x256xf32>
    %137 = arith.addf %132, %136 : vector<64x256xf32>
    %c0_93 = arith.constant 0 : index
    %c143_94 = arith.constant 143 : index
    %138 = vector.load %arg10[%c0_93, %c143_94] : memref<64x512xbf16, #tpu.memory_space<vmem>>, vector<64x256xbf16>
    %c6_95 = arith.constant 6 : index
    %c0_96 = arith.constant 0 : index
    %c0_97 = arith.constant 0 : index
    %139 = vector.load %arg4[%c6_95, %c0_96, %c0_97] : memref<9x64x64xbf16, #tpu.memory_space<vmem>>, vector<1x64x64xbf16>
    %140 = vector.shape_cast %139 : vector<1x64x64xbf16> to vector<64x64xbf16>
    %cst_98 = arith.constant dense<0.000000e+00> : vector<64x256xf32>
    %141 = tpu.matmul %140, %138, %cst_98 {dimension_numbers = #tpu.dot_dimension_numbers<[1], [0], [0], [1], [0, 0, 1, 1], [], []>} : vector<64x64xbf16>, vector<64x256xbf16>, vector<64x256xf32> -> vector<64x256xf32>
    %142 = arith.addf %137, %141 : vector<64x256xf32>
    %cst_99 = arith.constant 0.000000e+00 : f32
    %143 = vector.shape_cast %18 : vector<1x256xi1> to vector<1x256xi1>
    %144 = vector.broadcast %143 : vector<1x256xi1> to vector<64x256xi1>
    %145 = vector.broadcast %cst_99 : f32 to vector<64x256xf32>
    %146 = arith.select %144, %142, %145 : vector<64x256xi1>, vector<64x256xf32>
    %147 = arith.addf %128, %146 : vector<64x256xf32>
    %c0_100 = arith.constant 0 : index
    %c113_101 = arith.constant 113 : index
    %148 = vector.load %arg10[%c0_100, %c113_101] : memref<64x512xbf16, #tpu.memory_space<vmem>>, vector<64x256xbf16>
    %c2_102 = arith.constant 2 : index
    %c0_103 = arith.constant 0 : index
    %c0_104 = arith.constant 0 : index
    %149 = vector.load %arg4[%c2_102, %c0_103, %c0_104] : memref<9x64x64xbf16, #tpu.memory_space<vmem>>, vector<1x64x64xbf16>
    %150 = vector.shape_cast %149 : vector<1x64x64xbf16> to vector<64x64xbf16>
    %cst_105 = arith.constant dense<0.000000e+00> : vector<64x256xf32>
    %151 = tpu.matmul %150, %148, %cst_105 {dimension_numbers = #tpu.dot_dimension_numbers<[1], [0], [0], [1], [0, 0, 1, 1], [], []>} : vector<64x64xbf16>, vector<64x256xbf16>, vector<64x256xf32> -> vector<64x256xf32>
    %c0_106 = arith.constant 0 : index
    %c129_107 = arith.constant 129 : index
    %152 = vector.load %arg10[%c0_106, %c129_107] : memref<64x512xbf16, #tpu.memory_space<vmem>>, vector<64x256xbf16>
    %c5_108 = arith.constant 5 : index
    %c0_109 = arith.constant 0 : index
    %c0_110 = arith.constant 0 : index
    %153 = vector.load %arg4[%c5_108, %c0_109, %c0_110] : memref<9x64x64xbf16, #tpu.memory_space<vmem>>, vector<1x64x64xbf16>
    %154 = vector.shape_cast %153 : vector<1x64x64xbf16> to vector<64x64xbf16>
    %cst_111 = arith.constant dense<0.000000e+00> : vector<64x256xf32>
    %155 = tpu.matmul %154, %152, %cst_111 {dimension_numbers = #tpu.dot_dimension_numbers<[1], [0], [0], [1], [0, 0, 1, 1], [], []>} : vector<64x64xbf16>, vector<64x256xbf16>, vector<64x256xf32> -> vector<64x256xf32>
    %156 = arith.addf %151, %155 : vector<64x256xf32>
    %c0_112 = arith.constant 0 : index
    %c145_113 = arith.constant 145 : index
    %157 = vector.load %arg10[%c0_112, %c145_113] : memref<64x512xbf16, #tpu.memory_space<vmem>>, vector<64x256xbf16>
    %c8_114 = arith.constant 8 : index
    %c0_115 = arith.constant 0 : index
    %c0_116 = arith.constant 0 : index
    %158 = vector.load %arg4[%c8_114, %c0_115, %c0_116] : memref<9x64x64xbf16, #tpu.memory_space<vmem>>, vector<1x64x64xbf16>
    %159 = vector.shape_cast %158 : vector<1x64x64xbf16> to vector<64x64xbf16>
    %cst_117 = arith.constant dense<0.000000e+00> : vector<64x256xf32>
    %160 = tpu.matmul %159, %157, %cst_117 {dimension_numbers = #tpu.dot_dimension_numbers<[1], [0], [0], [1], [0, 0, 1, 1], [], []>} : vector<64x64xbf16>, vector<64x256xbf16>, vector<64x256xf32> -> vector<64x256xf32>
    %161 = arith.addf %156, %160 : vector<64x256xf32>
    %cst_118 = arith.constant 0.000000e+00 : f32
    %162 = vector.shape_cast %20 : vector<1x256xi1> to vector<1x256xi1>
    %163 = vector.broadcast %162 : vector<1x256xi1> to vector<64x256xi1>
    %164 = vector.broadcast %cst_118 : f32 to vector<64x256xf32>
    %165 = arith.select %163, %161, %164 : vector<64x256xi1>, vector<64x256xf32>
    %166 = arith.addf %147, %165 : vector<64x256xf32>
    %c0_119 = arith.constant 0 : index
    %c0_120 = arith.constant 0 : index
    %167 = vector.load %arg5[%c0_119, %c0_120] : memref<64x1xf32, #tpu.memory_space<vmem>>, vector<64x1xf32>
    %168 = vector.broadcast %167 : vector<64x1xf32> to vector<64x256xf32>
    %169 = arith.addf %166, %168 : vector<64x256xf32>
    %cst_121 = arith.constant dense<0.000000e+00> : vector<64xf32>
    %170 = vector.multi_reduction <add>, %169, %cst_121 [1] : vector<64x256xf32> to vector<64xf32>
    %171 = vector.shape_cast %170 : vector<64xf32> to vector<64x1xf32>
    %cst_122 = arith.constant 2.560000e+02 : f32
    %172 = vector.broadcast %cst_122 : f32 to vector<64x1xf32>
    %173 = arith.divf %171, %172 : vector<64x1xf32>
    %174 = vector.broadcast %173 : vector<64x1xf32> to vector<64x256xf32>
    %175 = arith.subf %169, %174 : vector<64x256xf32>
    %176 = arith.mulf %175, %175 : vector<64x256xf32>
    %cst_123 = arith.constant dense<0.000000e+00> : vector<64xf32>
    %177 = vector.multi_reduction <add>, %176, %cst_123 [1] : vector<64x256xf32> to vector<64xf32>
    %178 = vector.shape_cast %177 : vector<64xf32> to vector<64x1xf32>
    %cst_124 = arith.constant 2.560000e+02 : f32
    %179 = vector.broadcast %cst_124 : f32 to vector<64x1xf32>
    %180 = arith.divf %178, %179 : vector<64x1xf32>
    %181 = vector.broadcast %173 : vector<64x1xf32> to vector<64x256xf32>
    %182 = arith.subf %169, %181 : vector<64x256xf32>
    %cst_125 = arith.constant 9.99999974E-6 : f32
    %183 = vector.broadcast %cst_125 : f32 to vector<64x1xf32>
    %184 = arith.addf %180, %183 : vector<64x1xf32>
    %185 = math.rsqrt %184 : vector<64x1xf32>
    %186 = vector.broadcast %185 : vector<64x1xf32> to vector<64x256xf32>
    %187 = arith.mulf %182, %186 : vector<64x256xf32>
    %cst_126 = arith.constant 5.000000e-01 : f32
    %188 = vector.broadcast %cst_126 : f32 to vector<64x256xf32>
    %189 = arith.mulf %188, %187 : vector<64x256xf32>
    %cst_127 = arith.constant 4.471500e-02 : f32
    %190 = vector.broadcast %cst_127 : f32 to vector<64x256xf32>
    %191 = arith.mulf %190, %187 : vector<64x256xf32>
    %192 = arith.mulf %191, %187 : vector<64x256xf32>
    %193 = arith.mulf %192, %187 : vector<64x256xf32>
    %194 = arith.addf %187, %193 : vector<64x256xf32>
    %cst_128 = arith.constant 0.797884583 : f32
    %195 = vector.broadcast %cst_128 : f32 to vector<64x256xf32>
    %196 = arith.mulf %195, %194 : vector<64x256xf32>
    %197 = math.tanh %196 : vector<64x256xf32>
    %cst_129 = arith.constant 1.000000e+00 : f32
    %198 = vector.broadcast %cst_129 : f32 to vector<64x256xf32>
    %199 = arith.addf %198, %197 : vector<64x256xf32>
    %200 = arith.mulf %189, %199 : vector<64x256xf32>
    %c0_130 = arith.constant 0 : index
    %c0_131 = arith.constant 0 : index
    %c0_132 = arith.constant 0 : index
    %201 = vector.load %arg6[%c0_130, %c0_131, %c0_132] : memref<1x1x256xbf16, #tpu.memory_space<vmem>>, vector<1x1x256xbf16>
    %202 = vector.shape_cast %201 : vector<1x1x256xbf16> to vector<1x256xbf16>
    %203 = arith.extf %202 : vector<1x256xbf16> to vector<1x256xf32>
    %c0_133 = arith.constant 0 : index
    %c0_134 = arith.constant 0 : index
    %204 = vector.load %arg7[%c0_133, %c0_134] : memref<128x256xbf16, #tpu.memory_space<vmem>>, vector<128x256xbf16>
    %205 = arith.extf %204 : vector<128x256xbf16> to vector<128x256xf32>
    %206 = vector.broadcast %203 : vector<1x256xf32> to vector<128x256xf32>
    %207 = arith.mulf %205, %206 : vector<128x256xf32>
    %cst_135 = arith.constant dense<0.000000e+00> : vector<128xf32>
    %208 = vector.multi_reduction <add>, %207, %cst_135 [1] : vector<128x256xf32> to vector<128xf32>
    %209 = vector.shape_cast %208 : vector<128xf32> to vector<128x1xf32>
    %c0_136 = arith.constant 0 : index
    %c0_137 = arith.constant 0 : index
    %210 = vector.load %arg8[%c0_136, %c0_137] : memref<128x1xf32, #tpu.memory_space<vmem>>, vector<128x1xf32>
    %211 = arith.addf %209, %210 : vector<128x1xf32>
    %212 = vector.extract_strided_slice %211 {offsets = [0, 0], sizes = [64, 1], strides = [1, 1]} : vector<128x1xf32> to vector<64x1xf32>
    %213 = vector.extract_strided_slice %211 {offsets = [64, 0], sizes = [64, 1], strides = [1, 1]} : vector<128x1xf32> to vector<64x1xf32>
    %cst_138 = arith.constant 1.000000e+00 : f32
    %214 = vector.broadcast %cst_138 : f32 to vector<64x1xf32>
    %215 = arith.addf %214, %212 : vector<64x1xf32>
    %216 = vector.broadcast %215 : vector<64x1xf32> to vector<64x256xf32>
    %217 = arith.mulf %200, %216 : vector<64x256xf32>
    %218 = vector.broadcast %213 : vector<64x1xf32> to vector<64x256xf32>
    %219 = arith.addf %217, %218 : vector<64x256xf32>
    %c0_139 = arith.constant 0 : index
    %c0_140 = arith.constant 0 : index
    %c0_141 = arith.constant 0 : index
    %220 = vector.load %arg9[%c0_139, %c0_140, %c0_141] : memref<1x64x256xf32, #tpu.memory_space<vmem>>, vector<1x64x256xf32>
    %221 = vector.shape_cast %220 : vector<1x64x256xf32> to vector<64x256xf32>
    %222 = vector.shape_cast %219 : vector<64x256xf32> to vector<1x64x256xf32>
    tpu.vector_store %arg9[%c0_139, %c0_140, %c0_141], %222 {strides = array<i32>} : memref<1x64x256xf32, #tpu.memory_space<vmem>>, vector<1x64x256xf32>,
    return
  }
  func.func @transform_0(%arg0: i32) -> (i32, i32, i32) {
    %c0_i32 = arith.constant 0 : i32
    %c0_i32_0 = arith.constant 0 : i32
    %c0_i32_1 = arith.constant 0 : i32
    return %arg0, %c0_i32, %c0_i32_0 : i32, i32, i32
  }
  func.func @transform_1(%arg0: i32) -> (i32, i32, i32) {
    %c0_i32 = arith.constant 0 : i32
    %c0_i32_0 = arith.constant 0 : i32
    %c0_i32_1 = arith.constant 0 : i32
    %c0_i32_2 = arith.constant 0 : i32
    return %c0_i32, %c0_i32_0, %c0_i32_1 : i32, i32, i32
  }
  func.func @transform_2(%arg0: i32) -> (i32, i32) {
    %c0_i32 = arith.constant 0 : i32
    %c0_i32_0 = arith.constant 0 : i32
    %c0_i32_1 = arith.constant 0 : i32
    return %c0_i32, %c0_i32_0 : i32, i32
  }
  func.func @transform_3(%arg0: i32) -> (i32, i32, i32) {
    %c0_i32 = arith.constant 0 : i32
    %c0_i32_0 = arith.constant 0 : i32
    %c0_i32_1 = arith.constant 0 : i32
    %c0_i32_2 = arith.constant 0 : i32
    return %c0_i32, %c0_i32_0, %c0_i32_1 : i32, i32, i32
  }
  func.func @transform_4(%arg0: i32) -> (i32, i32) {
    %c0_i32 = arith.constant 0 : i32
    %c0_i32_0 = arith.constant 0 : i32
    %c0_i32_1 = arith.constant 0 : i32
    return %c0_i32, %c0_i32_0 : i32, i32
  }
  func.func @transform_5(%arg0: i32) -> (i32, i32, i32) {
    %c0_i32 = arith.constant 0 : i32
    %c0_i32_0 = arith.constant 0 : i32
    %c0_i32_1 = arith.constant 0 : i32
    return %arg0, %c0_i32, %c0_i32_0 : i32, i32, i32
  }
  func.func @transform_6(%arg0: i32) -> (i32, i32) {
    %c0_i32 = arith.constant 0 : i32
    %c0_i32_0 = arith.constant 0 : i32
    %c0_i32_1 = arith.constant 0 : i32
    return %c0_i32, %c0_i32_0 : i32, i32
  }
  func.func @transform_7(%arg0: i32) -> (i32, i32) {
    %c0_i32 = arith.constant 0 : i32
    %c0_i32_0 = arith.constant 0 : i32
    %c0_i32_1 = arith.constant 0 : i32
    return %c0_i32, %c0_i32_0 : i32, i32
  }
  func.func @transform_8(%arg0: i32) -> (i32, i32, i32) {
    %c0_i32 = arith.constant 0 : i32
    %c0_i32_0 = arith.constant 0 : i32
    %c0_i32_1 = arith.constant 0 : i32
    return %arg0, %c0_i32, %c0_i32_0 : i32, i32, i32
  }
}

</mosaic_0001>

<bundles_post_ra>
// kernel: ginka_bottleneck_fwd.1
= control target key start
LH: loop header
LB: loop body
LE: loop exit
PB: predicated region body
PF: predicated region fallthrough
CT: control target
= control target key end

     0   :  { %s5416_s27 = smov 0   ;;  %s7273_s0 = inlined_call_operand.vmem [shape: bf16[2,64,256], index: 0, kind: input, shape index: {}]   ;;  %s7274_s1 = inlined_call_operand.vmem [shape: bf16[9,64,64], index: 1, kind: input, shape index: {}]   ;;  %s7275_s2 = inlined_call_operand.vmem [shape: f32[64,1], index: 2, kind: input, shape index: {}]   ;;  %s7276_s3 = inlined_call_operand.vmem [shape: bf16[9,64,64], index: 3, kind: input, shape index: {}]   ;;  %s7277_s4 = inlined_call_operand.vmem [shape: f32[64,1], index: 4, kind: input, shape index: {}]   ;;  %s7278_s5 = inlined_call_operand.vmem [shape: bf16[2,1,256], index: 5, kind: input, shape index: {}]   ;;  %s7279_s6 = inlined_call_operand.vmem [shape: bf16[128,256], index: 6, kind: input, shape index: {}]   ;;  %s7280_s7 = inlined_call_operand.vmem [shape: f32[128,1], index: 7, kind: input, shape index: {}]   ;;  %s7281_s8 = inlined_call_operand.vmem [shape: f32[2,64,256], index: 8, kind: output, shape index: {}]  }
   0x1 LB: > { %s4519_s28 = sadd.s32 4294967295, %s5360_s27   ;;  %p4523_p0 = scmp.ge.s32.totalorder %s5360_s27, 1  ;;  %s5360_s27 = sphi %s5416_s27, %s18_s27  }
   0x2   : > { %p271_p1 = scmp.lt.s32.totalorder %s5360_s27, 3 }
   0x4   : > { %p272_p2 = pnand %p4523_p0, %p271_p1 }
   0x5   : > { %p309_p3 = scmp.lt.s32.totalorder (!%p272_p2), %s4519_s28, 1  ;;  %v5362_v0 = vmov (!%p272_p2), 0   ;;  %s5363_s29 = smov (!%p272_p2), 16   ;;  %v5186_v9 = vld [vmem:[%s7274_s1 + $0x80] sm:$0xff] (!%p272_p2)   ;;  %vm469_vm0 = vcmask (!%p272_p2), 523264   ;;  %v5187_v10 = vld [vmem:[%s7274_s1 + $0x88] sm:$0xff] (!%p272_p2)  }
   0x6   : > { %275 = sbr.rel (%p272_p2) target bundleno = 1728 (0x6c0), region = 52  ;;  %514 = vmatprep.mubr.bf16.mxu0 (!%p272_p2), %v5362_v0  ;;  %1030 = vmatprep.mubr.bf16.mxu1 (!%p272_p2), %v5362_v0  ;;  %s5364_s14 = smov (!%p272_p2), 112   ;;  %v5188_v11 = vld [vmem:[%s7274_s1 + $0x90] sm:$0xff] (!%p272_p2)   ;;  %v5189_v12 = vld [vmem:[%s7274_s1 + $0x98] sm:$0xff] (!%p272_p2)   ;;  %vm611_vm1 = vcmask (!%p272_p2), 130048   ;;  %v5190_v36 = vld [vmem:[%s7274_s1 + $0x20] sm:$0xff] (!%p272_p2)  }
   0x7   : > { %5097 = vset.pattern.permute.xlu1 (!%p272_p2), %v5362_v0  ;;  %5098 = vset.pattern.permute.xlu0 (!%p272_p2), %v5362_v0  ;;  %s5365_s21 = smov (!%p272_p2), 1   ;;  %s5366_s22 = smov (!%p272_p2), 127   ;;  %vm790_vm2 = vcmask (!%p272_p2), 916480   ;;  %v5191_v46 = vld [vmem:[%s7274_s1 + $0x28] sm:$0xff] (!%p272_p2)   ;;  %v5192_v53 = vld [vmem:[%s7274_s1 + $0x30] sm:$0xff] (!%p272_p2)   ;;  %vm969_vm3 = vcmask (!%p272_p2), 7168  }
   0x8   : > { %5023 = vrot.lane.b32.xlu1 (!%p272_p2), %v5362_v0, %s5363_s29  ;;  %s5367_s23 = smov (!%p272_p2), 17   ;;  %s5368_s24 = smov (!%p272_p2), 15   ;;  %vm1486_vm4 = vcmask (!%p272_p2), 1039360   ;;  %vm1115_vm5 = vcmask (!%p272_p2), 138240   ;;  %vm1632_vm6 = vcmask (!%p272_p2), 121856   ;;  %vm1270_vm7 = vcmask (!%p272_p2), 924672  }
   0x9   : > { %s5369_s25 = smov (!%p272_p2), 113   ;;  %s5370_s26 = smov (!%p272_p2), 111   ;;  %vm1787_vm8 = vcmask (!%p272_p2), 908288  }
   0xd   : > { %s7291_s28 = smov (!%p309_p3, %s4519_s28), 1 }
   0xe   : > { %s4811_s30 = sshll.u32 %s7291_s28, 6  ;;  %s4526_s20 = sshll.u32 %s7291_s28, 1 }
   0xf   : > { %s313_s11 = scalar_lea.vmem %s7273_s0, %s4811_s30  ;;  %s4812_s13 = sshll.u32 %s7291_s28, 7 }
  0x10   : > { %v5436_v1 = vld [vmem:[%s313_s11] ss:$8 sps:$4 sm:$0xff]   ;;  %v5440_v2 = vld [vmem:[%s313_s11 + $0x10] ss:$8 sps:$4 sm:$0xff]   ;;  %v5442_v3 = vld [vmem:[%s313_s11 + $0x4] ss:$8 sps:$4 sm:$0xff]   ;;  %s7204_s16 = scalar_lea.vmem %s7281_s8, %s4812_s13 }
  0x11   : > { %589 = vrot.lane.b32.xlu0 %v5436_v1, %s5363_s29  ;;  %v5444_v4 = vld [vmem:[%s313_s11 + $0x20] ss:$8 sps:$4 sm:$0xff]   ;;  %595 = vrot.lane.b32.xlu1 %v5440_v2, %s5363_s29  ;;  %v5448_v5 = vld [vmem:[%s313_s11 + $0x14] ss:$8 sps:$4 sm:$0xff]  }
  0x12   : > { %482 = vmatprep.subr.bf16.mxu0 %v5442_v3  ;;  %v5454_v6 = vld [vmem:[%s313_s11 + $0x24] ss:$8 sps:$4 sm:$0xff]   ;;  %v5462_v7 = vld [vmem:[%s313_s11 + $0x34] ss:$8 sps:$4 sm:$0xff]   ;;  %v5467_v8 = vld [vmem:[%s313_s11 + $0x30] ss:$8 sps:$4 sm:$0xff]  }
  0x13   : > { %483 = vmatpush1.bf16.msra.mxu0 %v5436_v1 }
  0x14   : > { %484 = vmatprep.subr.bf16.mxu0 %v5448_v5 }
  0x15   : > { %591 = vrot.lane.b32.xlu0 %v5442_v3, %s5363_s29  ;;  %601 = vrot.lane.b32.xlu1 %v5444_v4, %s5363_s29 }
  0x17   : > { %485 = vmatpush1.bf16.msra.mxu0 %v5440_v2 }
  0x18   : > { %486 = vmatprep.subr.bf16.mxu0 %v5454_v6 }
  0x19   : > { %597 = vrot.lane.b32.xlu0 %v5448_v5, %s5363_s29  ;;  %5028 = vrot.lane.b32.xlu1 %v5362_v0, %s5363_s29 }
  0x1b   : > { %487 = vmatpush1.bf16.msra.mxu0 %v5444_v4 }
  0x1c   : > { %488 = vmatprep.subr.bf16.mxu0 %v5462_v7 }
  0x1d   : > { %603 = vrot.lane.b32.xlu0 %v5454_v6, %s5363_s29  ;;  %609 = vrot.lane.b32.xlu1 %v5462_v7, %s5363_s29 }
  0x1f   : > { %489 = vmatpush1.bf16.msra.mxu0 %v5467_v8 }
  0x21   : > { %607 = vrot.lane.b32.xlu0 %v5467_v8, %s5363_s29  ;;  %5033 = vrot.lane.b32.xlu1 %v5362_v0, %s5364_s14 }
  0x22   : > { %4557 = vmatmul.mubr.msk.bf16.vlgmr.msra.gmra.mrb[0].mxu0 %vm469_vm0, %v5186_v9 }
  0x23   : > { %524 = vmatprep.mubr.bf16.mxu0 %v5362_v0 }
  0x25   : > { %768 = vrot.lane.b32.xlu0 %v5442_v3, %s5364_s14  ;;  %774 = vrot.lane.b32.xlu1 %v5448_v5, %s5364_s14 }
  0x29   : > { %766 = vrot.lane.b32.xlu0 %v5436_v1, %s5364_s14  ;;  %780 = vrot.lane.b32.xlu1 %v5454_v6, %s5364_s14 }
  0x2a   : > { %4558 = vmatmul.mubr.msk.bf16.gmra.mrb[4].mxu0 %vm469_vm0, %v5187_v10  ;;  %v5194_v10 = vld [vmem:[%s7274_s1 + $0xe0] sm:$0xff]  }
  0x2b   : > { %534 = vmatprep.mubr.bf16.mxu0 %v5362_v0 }
  0x2d   : > { %772 = vrot.lane.b32.xlu0 %v5440_v2, %s5364_s14  ;;  %778 = vrot.lane.b32.xlu1 %v5444_v4, %s5364_s14 }
  0x31   : > { %5038 = vrot.lane.b32.xlu0 %v5362_v0, %s5364_s14  ;;  %784 = vrot.lane.b32.xlu1 %v5467_v8, %s5364_s14 }
  0x32   : > { %4559 = vmatmul.mubr.msk.bf16.gmra.mrb[8].mxu0 %vm469_vm0, %v5188_v11 }
  0x33   : > { %544 = vmatprep.mubr.bf16.mxu0 %v5362_v0 }
  0x35   : > { %786 = vrot.lane.b32.xlu0 %v5462_v7, %s5364_s14  ;;  %949 = vrot.lane.b32.xlu1 %v5442_v3, %s5365_s21 }
  0x39   : > { %947 = vrot.lane.b32.xlu0 %v5436_v1, %s5365_s21  ;;  %1464 = vrot.lane.b32.xlu1 %v5442_v3, %s5366_s22 }
  0x3a   : > { %4560 = vmatmul.mubr.msk.bf16.gmra.mrb[12].mxu0 %vm469_vm0, %v5189_v12 }
  0x3b   : > { %672 = vmatprep.mubr.bf16.mxu0 %v5362_v0 }
  0x3d   : > { %5043 = vrot.lane.b32.xlu0 %v5362_v0, %s5365_s21  ;;  %1462 = vrot.lane.b32.xlu1 %v5436_v1, %s5366_s22 }
  0x41   : > { %5048 = vrot.lane.b32.xlu0 %v5362_v0, %s5366_s22  ;;  %955 = vrot.lane.b32.xlu1 %v5448_v5, %s5365_s21 }
  0x45   : > { %953 = vrot.lane.b32.xlu0 %v5440_v2, %s5365_s21  ;;  %1468 = vrot.lane.b32.xlu1 %v5440_v2, %s5366_s22 }
  0x49   : > { %1470 = vrot.lane.b32.xlu0 %v5448_v5, %s5366_s22  ;;  %961 = vrot.lane.b32.xlu1 %v5454_v6, %s5365_s21 }
  0x4d   : > { %959 = vrot.lane.b32.xlu0 %v5444_v4, %s5365_s21  ;;  %1476 = vrot.lane.b32.xlu1 %v5454_v6, %s5366_s22 }
  0x51   : > { %5053 = vrot.lane.b32.xlu0 %v5362_v0, %s5365_s21  ;;  %1474 = vrot.lane.b32.xlu1 %v5444_v4, %s5366_s22 }
  0x55   : > { %5058 = vrot.lane.b32.xlu0 %v5362_v0, %s5366_s22  ;;  %967 = vrot.lane.b32.xlu1 %v5462_v7, %s5365_s21 }
  0x59   : > { %965 = vrot.lane.b32.xlu0 %v5467_v8, %s5365_s21  ;;  %1480 = vrot.lane.b32.xlu1 %v5467_v8, %s5366_s22 }
  0x5d   : > { %1482 = vrot.lane.b32.xlu0 %v5462_v7, %s5366_s22  ;;  %1095 = vrot.lane.b32.xlu1 %v5442_v3, %s5367_s23 }
  0x61   : > { %1093 = vrot.lane.b32.xlu0 %v5436_v1, %s5367_s23  ;;  %1610 = vrot.lane.b32.xlu1 %v5436_v1, %s5368_s24 }
  0x65   : > { %5063 = vrot.lane.b32.xlu0 %v5362_v0, %s5367_s23  ;;  %5068 = vrot.lane.b32.xlu1 %v5362_v0, %s5368_s24 }
  0x69   : > { %1612 = vrot.lane.b32.xlu0 %v5442_v3, %s5368_s24  ;;  %1101 = vrot.lane.b32.xlu1 %v5448_v5, %s5367_s23 }
  0x6d   : > { %1099 = vrot.lane.b32.xlu0 %v5440_v2, %s5367_s23  ;;  %1618 = vrot.lane.b32.xlu1 %v5448_v5, %s5368_s24 }
  0x71   : > { %1616 = vrot.lane.b32.xlu0 %v5440_v2, %s5368_s24  ;;  %1107 = vrot.lane.b32.xlu1 %v5454_v6, %s5367_s23 }
  0x75   : > { %1105 = vrot.lane.b32.xlu0 %v5444_v4, %s5367_s23  ;;  %1622 = vrot.lane.b32.xlu1 %v5444_v4, %s5368_s24 }
  0x79   : > { %5073 = vrot.lane.b32.xlu0 %v5362_v0, %s5367_s23  ;;  %5078 = vrot.lane.b32.xlu1 %v5362_v0, %s5368_s24 }
  0x7a   : > { %v5024_v13 = vpop.permute.xlu1 %5023 }
  0x7b   : > { %v5025_v15 = vunpack.i.l.bf16 %v5024_v13  ;;  %v5026_v19 = vunpack.i.h.bf16 %v5024_v13 }
  0x7d   : > { %1624 = vrot.lane.b32.xlu0 %v5454_v6, %s5368_s24  ;;  %1113 = vrot.lane.b32.xlu1 %v5462_v7, %s5367_s23 }
  0x81   : > { %1111 = vrot.lane.b32.xlu0 %v5467_v8, %s5367_s23  ;;  %1630 = vrot.lane.b32.xlu1 %v5462_v7, %s5368_s24 }
  0x83   : > { %v590_v14 = vpop.permute.xlu0 %589  ;;  %v596_v16 = vpop.permute.xlu1 %595 }
  0x84   : > { %v612_v21 = vsel %vm611_vm1, %v5025_v15, %v590_v14  ;;  %v614_v25 = vsel %vm611_vm1, %v5026_v19, %v596_v16 }
  0x85   : > { %1628 = vrot.lane.b32.xlu0 %v5467_v8, %s5368_s24  ;;  %5083 = vrot.lane.b32.xlu1 %v5362_v0, %s5369_s25 }
  0x87   : > { %v592_v17 = vpop.permute.xlu0 %591  ;;  %v602_v20 = vpop.permute.xlu1 %601 }
  0x88   : > { %v613_v18 = vsel %vm611_vm1, %v590_v14, %v592_v17 }
  0x89   : > { %1248 = vrot.lane.b32.xlu0 %v5442_v3, %s5369_s25  ;;  %640 = vmatprep.subr.bf16.mxu0 %v613_v18 }
  0x8a   : > { %641 = vmatpush1.bf16.msra.mxu0 %v612_v21  ;;  %1765 = vrot.lane.b32.xlu1 %v5442_v3, %s5370_s26 }
  0x8b   : > { %v598_v22 = vpop.permute.xlu0 %597  ;;  %v5029_v24 = vpop.permute.xlu1 %5028 }
  0x8c   : > { %v615_v23 = vsel %vm611_vm1, %v596_v16, %v598_v22  ;;  %v5030_v26 = vunpack.i.l.bf16 %v5029_v24  ;;  %v5031_v28 = vunpack.i.h.bf16 %v5029_v24  ;;  %v5195_v22 = vld [vmem:[%s7274_s1 + $0xe8] sm:$0xff]  }
  0x8d   : > { %1246 = vrot.lane.b32.xlu0 %v5436_v1, %s5369_s25  ;;  %642 = vmatprep.subr.bf16.mxu0 %v615_v23 }
  0x8e   : > { %643 = vmatpush1.bf16.msra.mxu0 %v614_v25  ;;  %1763 = vrot.lane.b32.xlu1 %v5436_v1, %s5370_s26  ;;  %v616_v31 = vsel %vm611_vm1, %v5030_v26, %v602_v20  ;;  %v5193_v1 = vld [vmem:[%s7274_s1 + $0x38] sm:$0xff]   ;;  %v1941_v25 = vld [vmem:[%s7275_s2] sm:$0xff] }
  0x8f   : > { %v604_v27 = vpop.permute.xlu0 %603  ;;  %v610_v30 = vpop.permute.xlu1 %609 }
  0x90   : > { %v617_v29 = vsel %vm611_vm1, %v602_v20, %v604_v27  ;;  %v1942_v27 = vld [vmem:[%s7275_s2 + $0x8] sm:$0xff] }
  0x91   : > { %5088 = vrot.lane.b32.xlu0 %v5362_v0, %s5370_s26  ;;  %644 = vmatprep.subr.bf16.mxu0 %v617_v29  ;;  %v1943_v29 = vld [vmem:[%s7275_s2 + $0x10] sm:$0xff] }
  0x92   : > { %645 = vmatpush1.bf16.msra.mxu0 %v616_v31  ;;  %1252 = vrot.lane.b32.xlu1 %v5440_v2, %s5369_s25  ;;  %v1945_v31 = vld [vmem:[%s7275_s2 + $0x20] sm:$0xff] }
  0x93   : > { %v608_v32 = vpop.permute.xlu0 %607  ;;  %v5034_v35 = vpop.permute.xlu1 %5033 }
  0x94   : > { %v619_v33 = vsel %vm611_vm1, %v608_v32, %v610_v30  ;;  %v618_v34 = vsel %vm611_vm1, %v5031_v28, %v608_v32  ;;  %v5035_v37 = vunpack.i.l.bf16 %v5034_v35  ;;  %v5036_v38 = vunpack.i.h.bf16 %v5034_v35 }
  0x95   : > { %1254 = vrot.lane.b32.xlu0 %v5448_v5, %s5369_s25  ;;  %646 = vmatprep.subr.bf16.mxu0 %v619_v33  ;;  %v5196_v33 = vld [vmem:[%s7274_s1 + $0xf0] sm:$0xff]  }
  0x96   : > { %647 = vmatpush1.bf16.msra.mxu0 %v618_v34  ;;  %1769 = vrot.lane.b32.xlu1 %v5440_v2, %s5370_s26 }
  0x97   : > { %v769_v39 = vpop.permute.xlu0 %768  ;;  %v775_v41 = vpop.permute.xlu1 %774 }
  0x98   : > { %v792_v40 = vsel %vm790_vm2, %v769_v39, %v5035_v37  ;;  %v794_v43 = vsel %vm790_vm2, %v775_v41, %v5036_v38  ;;  %v1947_v38 = vld [vmem:[%s7275_s2 + $0x30] sm:$0xff] }
  0x99   : > { %1771 = vrot.lane.b32.xlu0 %v5448_v5, %s5370_s26  ;;  %4565 = vmatmul.mubr.msk.bf16.vlgmr.msra.gmra.mrb[0].mxu0 %vm469_vm0, %v5190_v36  ;;  %v1944_v36 = vld [vmem:[%s7275_s2 + $0x18] sm:$0xff] }
  0x9a   : > { %819 = vmatprep.subr.bf16.mxu0 %v792_v40  ;;  %682 = vmatprep.mubr.bf16.mxu0 %v5362_v0 }
  0x9b   : > { %5093 = vrot.lane.b32.xlu1 %v5362_v0, %s5369_s25  ;;  %v767_v42 = vpop.permute.xlu0 %766  ;;  %v781_v45 = vpop.permute.xlu1 %780 }
  0x9c   : > { %v791_v44 = vsel %vm790_vm2, %v767_v42, %v769_v39 }
  0x9d   : > { %1260 = vrot.lane.b32.xlu0 %v5454_v6, %s5369_s25  ;;  %820 = vmatpush1.bf16.msra.mxu0 %v791_v44  ;;  %v1946_v44 = vld [vmem:[%s7275_s2 + $0x28] sm:$0xff] }
  0x9e   : > { %821 = vmatprep.subr.bf16.mxu0 %v794_v43 }
  0x9f   : > { %v773_v47 = vpop.permute.xlu0 %772  ;;  %1777 = vrot.lane.b32.xlu1 %v5454_v6, %s5370_s26  ;;  %v779_v49 = vpop.permute.xlu1 %778 }
  0xa0   : > { %v793_v48 = vsel %vm790_vm2, %v773_v47, %v775_v41  ;;  %v795_v56 = vsel %vm790_vm2, %v779_v49, %v781_v45 }
  0xa1   : > { %1258 = vrot.lane.b32.xlu0 %v5444_v4, %s5369_s25  ;;  %4566 = vmatmul.mubr.msk.bf16.gmra.mrb[4].mxu0 %vm469_vm0, %v5191_v46 }
  0xa2   : > { %822 = vmatpush1.bf16.msra.mxu0 %v793_v48  ;;  %692 = vmatprep.mubr.bf16.mxu0 %v5362_v0  ;;  %v5197_v48 = vld [vmem:[%s7274_s1 + $0xf8] sm:$0xff]  }
  0xa3   : > { %v5039_v50 = vpop.permute.xlu0 %5038  ;;  %1775 = vrot.lane.b32.xlu1 %v5444_v4, %s5370_s26  ;;  %v785_v52 = vpop.permute.xlu1 %784 }
  0xa4   : > { %v5040_v51 = vunpack.i.l.bf16 %v5039_v50  ;;  %v5041_v54 = vunpack.i.h.bf16 %v5039_v50  ;;  %v5198_v50 = vld [vmem:[%s7274_s1 + $0x60] sm:$0xff]  }
  0xa5   : > { %1779 = vrot.lane.b32.xlu0 %v5362_v0, %s5370_s26 }
  0xa6   : > { %v796_v55 = vsel %vm790_vm2, %v781_v45, %v5040_v51 }
  0xa7   : > { %v787_v57 = vpop.permute.xlu0 %786  ;;  %823 = vmatprep.subr.bf16.mxu0 %v796_v55  ;;  %1264 = vrot.lane.b32.xlu1 %v5467_v8, %s5369_s25  ;;  %v950_v59 = vpop.permute.xlu1 %949  ;;  %v1948_v55 = vld [vmem:[%s7275_s2 + $0x38] sm:$0xff] }
  0xa8   : > { %824 = vmatpush1.bf16.msra.mxu0 %v795_v56  ;;  %v798_v58 = vsel %vm790_vm2, %v787_v57, %v5041_v54  ;;  %v797_v61 = vsel %vm790_vm2, %v785_v52, %v787_v57 }
  0xa9   : > { %1266 = vrot.lane.b32.xlu0 %v5462_v7, %s5369_s25  ;;  %4567 = vmatmul.mubr.msk.bf16.gmra.mrb[8].mxu0 %vm469_vm0, %v5192_v53 }
  0xaa   : > { %825 = vmatprep.subr.bf16.mxu0 %v798_v58  ;;  %702 = vmatprep.mubr.bf16.mxu0 %v5362_v0 }
  0xab   : > { %v948_v60 = vpop.permute.xlu0 %947  ;;  %1785 = vrot.lane.b32.xlu1 %v5362_v0, %s5370_s26  ;;  %v1465_v63 = vpop.permute.xlu1 %1464 }
  0xac   : > { %826 = vmatpush1.bf16.msra.mxu0 %v797_v61  ;;  %v971_v62 = vsel %vm969_vm3, %v948_v60, %v950_v59  ;;  %v5199_v59 = vld [vmem:[%s7274_s1 + $0xa0] sm:$0xff]  }
  0xad   : > { %1783 = vrot.lane.b32.xlu0 %v5462_v7, %s5370_s26  ;;  %998 = vmatprep.subr.bf16.mxu1 %v971_v62 }
  0xaf   : > { %v5044_v2 = vpop.permute.xlu0 %5043  ;;  %v1463_v4 = vpop.permute.xlu1 %1462  ;;  %1951 = vperm.xlu1 %5097, %v1941_v25  }
  0xb0   : > { %v5045_v3 = vunpack.i.l.bf16 %v5044_v2  ;;  %v5046_v11 = vunpack.i.h.bf16 %v5044_v2  ;;  %v1487_v15 = vsel %vm1486_vm4, %v1463_v4, %v1465_v63 }
  0xb1   : > { %1781 = vrot.lane.b32.xlu0 %v5467_v8, %s5370_s26  ;;  %4568 = vmatmul.mubr.msk.bf16.gmra.mrb[12].mxu0 %vm469_vm0, %v5193_v1 }
  0xb2   : > { %v970_v5 = vsel %vm969_vm3, %v5045_v3, %v948_v60  ;;  %851 = vmatprep.mubr.bf16.mxu0 %v5362_v0  ;;  %v5200_v60 = vld [vmem:[%s7274_s1 + $0x68] sm:$0xff]  }
  0xb3   : > { %v5049_v6 = vpop.permute.xlu0 %5048  ;;  %999 = vmatpush1.bf16.msra.mxu1 %v970_v5  ;;  %v956_v9 = vpop.permute.xlu1 %955  ;;  %1961 = vperm.xlu1 %5097, %v1943_v29  }
  0xb4   : > { %v5050_v7 = vunpack.i.l.bf16 %v5049_v6  ;;  %v5051_v17 = vunpack.i.h.bf16 %v5049_v6 }
  0xb5   : > { %1956 = vperm.xlu0 %5098, %v1942_v27   ;;  %v5205_v27 = vld [vmem:[%s7274_s1 + $0xb8] sm:$0xff]  }
  0xb6   : > { %v1488_v12 = vsel %vm1486_vm4, %v1465_v63, %v5050_v7  ;;  %v5201_v7 = vld [vmem:[%s7274_s1 + $0xa8] sm:$0xff]  }
  0xb7   : > { %v954_v13 = vpop.permute.xlu0 %953  ;;  %1515 = vmatprep.subr.bf16.mxu0 %v1488_v12  ;;  %v1469_v16 = vpop.permute.xlu1 %1468  ;;  %1966 = vperm.xlu1 %5097, %v1944_v36  }
  0xb8   : > { %v973_v8 = vsel %vm969_vm3, %v954_v13, %v956_v9  ;;  %v972_v14 = vsel %vm969_vm3, %v5046_v11, %v954_v13  ;;  %v5202_v11 = vld [vmem:[%s7274_s1 + $0x70] sm:$0xff]  }
  0xb9   : > { %4581 = vmatmul.mubr.msk.bf16.vlgmr.msra.gmra.mrb[0].mxu0 %vm469_vm0, %v5194_v10  ;;  %1000 = vmatprep.subr.bf16.mxu1 %v973_v8 }
  0xba   : > { %1516 = vmatpush1.bf16.msra.mxu0 %v1487_v15  ;;  %1001 = vmatpush1.bf16.msra.mxu1 %v972_v14 }
  0xbb   : > { %v1471_v18 = vpop.permute.xlu0 %1470  ;;  %861 = vmatprep.mubr.bf16.mxu0 %v5362_v0  ;;  %v962_v21 = vpop.permute.xlu1 %961  ;;  %1971 = vperm.xlu0 %5098, %v1945_v31  }
  0xbc   : > { %v1490_v19 = vsel %vm1486_vm4, %v1471_v18, %v5051_v17  ;;  %v1489_v20 = vsel %vm1486_vm4, %v1469_v16, %v1471_v18  ;;  %1976 = vperm.xlu1 %5097, %v1946_v44  }
  0xbd   : > { %1517 = vmatprep.subr.bf16.mxu0 %v1490_v19  ;;  %v5203_v19 = vld [vmem:[%s7274_s1 + $0xb0] sm:$0xff]  }
  0xbe   : > { %1518 = vmatpush1.bf16.msra.mxu0 %v1489_v20 }
  0xbf   : > { %v960_v23 = vpop.permute.xlu0 %959  ;;  %v1477_v26 = vpop.permute.xlu1 %1476  ;;  %1981 = vperm.xlu0 %5098, %v1947_v38  }
  0xc0   : > { %v975_v24 = vsel %vm969_vm3, %v960_v23, %v962_v21  ;;  %1986 = vperm.xlu1 %5097, %v1948_v55   ;;  %v5204_v21 = vld [vmem:[%s7274_s1 + $0x78] sm:$0xff]  }
  0xc1   : > { %4582 = vmatmul.mubr.msk.bf16.gmra.mrb[4].mxu0 %vm469_vm0, %v5195_v22  ;;  %1002 = vmatprep.subr.bf16.mxu1 %v975_v24 }
  0xc2   : > { %871 = vmatprep.mubr.bf16.mxu0 %v5362_v0 }
  0xc3   : > { %v5054_v28 = vpop.permute.xlu0 %5053  ;;  %v1475_v32 = vpop.permute.xlu1 %1474 }
  0xc4   : > { %v5055_v30 = vunpack.i.l.bf16 %v5054_v28  ;;  %v5056_v40 = vunpack.i.h.bf16 %v5054_v28  ;;  %v1491_v42 = vsel %vm1486_vm4, %v1475_v32, %v1477_v26 }
  0xc6   : > { %v974_v34 = vsel %vm969_vm3, %v5055_v30, %v960_v23 }
  0xc7   : > { %v5059_v35 = vpop.permute.xlu0 %5058  ;;  %1003 = vmatpush1.bf16.msra.mxu1 %v974_v34  ;;  %v968_v39 = vpop.permute.xlu1 %967 }
  0xc8   : > { %v5060_v37 = vunpack.i.l.bf16 %v5059_v35  ;;  %v5061_v49 = vunpack.i.h.bf16 %v5059_v35 }
  0xc9   : > { %4583 = vmatmul.mubr.msk.bf16.gmra.mrb[8].mxu0 %vm469_vm0, %v5196_v33 }
  0xca   : > { %v1492_v41 = vsel %vm1486_vm4, %v1477_v26, %v5060_v37  ;;  %881 = vmatprep.mubr.bf16.mxu0 %v5362_v0 }
  0xcb   : > { %v966_v43 = vpop.permute.xlu0 %965  ;;  %1519 = vmatprep.subr.bf16.mxu0 %v1492_v41  ;;  %v1481_v47 = vpop.permute.xlu1 %1480 }
  0xcc   : > { %1520 = vmatpush1.bf16.msra.mxu0 %v1491_v42  ;;  %v977_v45 = vsel %vm969_vm3, %v966_v43, %v968_v39  ;;  %v976_v46 = vsel %vm969_vm3, %v5056_v40, %v966_v43  ;;  %v5206_v39 = vld [vmem:[%s7274_s1] sm:$0xff]  }
  0xcd   : > { %1004 = vmatprep.subr.bf16.mxu1 %v977_v45  ;;  %v5207_v45 = vld [vmem:[%s7274_s1 + $0x40] sm:$0xff]  }
  0xce   : > { %1005 = vmatpush1.bf16.msra.mxu1 %v976_v46 }
  0xcf   : > { %v1483_v51 = vpop.permute.xlu0 %1482  ;;  %v1096_v54 = vpop.permute.xlu1 %1095 }
  0xd0   : > { %v1494_v52 = vsel %vm1486_vm4, %v1483_v51, %v5061_v49  ;;  %v1493_v53 = vsel %vm1486_vm4, %v1481_v47, %v1483_v51 }
  0xd1   : > { %4584 = vmatmul.mubr.msk.bf16.gmra.mrb[12].mxu0 %vm469_vm0, %v5197_v48  ;;  %1521 = vmatprep.subr.bf16.mxu0 %v1494_v52 }
  0xd2   : > { %1522 = vmatpush1.bf16.msra.mxu0 %v1493_v53  ;;  %4597 = vmatmul.mubr.msk.bf16.vlgmr.msra.gmra.mrb[0].mxu1 %vm469_vm0, %v5198_v50  ;;  %v5208_v50 = vld [vmem:[%s7274_s1 + $0x8] sm:$0xff]  }
  0xd3   : > { %v1094_v56 = vpop.permute.xlu0 %1093  ;;  %1547 = vmatprep.mubr.bf16.mxu0 %v5362_v0  ;;  %1040 = vmatprep.mubr.bf16.mxu1 %v5362_v0  ;;  %v1611_v58 = vpop.permute.xlu1 %1610 }
  0xd4   : > { %v1117_v57 = vsel %vm1115_vm5, %v1094_v56, %v1096_v54  ;;  %v5209_v54 = vld [vmem:[%s7274_s1 + $0x48] sm:$0xff]  }
  0xd5   : > { %1144 = vmatprep.subr.bf16.mxu1 %v1117_v57 }
  0xd7   : > { %v5064_v61 = vpop.permute.xlu0 %5063  ;;  %v5069_v63 = vpop.permute.xlu1 %5068 }
  0xd8   : > { %v5065_v62 = vunpack.i.l.bf16 %v5064_v61  ;;  %v5070_v1 = vunpack.i.l.bf16 %v5069_v63  ;;  %v5066_v9 = vunpack.i.h.bf16 %v5064_v61  ;;  %v5071_v14 = vunpack.i.h.bf16 %v5069_v63 }
  0xd9   : > { %4645 = vmatmul.mubr.msk.bf16.vlgmr.msra.gmra.mrb[16].mxu0 %vm469_vm0, %v5199_v59 }
  0xda   : > { %v1116_v2 = vsel %vm1115_vm5, %v5065_v62, %v1094_v56  ;;  %4598 = vmatmul.mubr.msk.bf16.gmra.mrb[4].mxu1 %vm469_vm0, %v5200_v60  ;;  %1557 = vmatprep.mubr.bf16.mxu0 %v5362_v0  ;;  %v1633_v6 = vsel %vm1632_vm6, %v5070_v1, %v1611_v58  ;;  %v5210_v62 = vld [vmem:[%s7274_s1 + $0x10] sm:$0xff]  }
  0xdb   : > { %v1613_v3 = vpop.permute.xlu0 %1612  ;;  %1145 = vmatpush1.bf16.msra.mxu1 %v1116_v2  ;;  %1050 = vmatprep.mubr.bf16.mxu1 %v5362_v0  ;;  %v1102_v5 = vpop.permute.xlu1 %1101 }
  0xdc   : > { %v1634_v4 = vsel %vm1632_vm6, %v1611_v58, %v1613_v3  ;;  %v5211_v3 = vld [vmem:[%s7274_s1 + $0x50] sm:$0xff]  }
  0xdd   : > { %1661 = vmatprep.subr.bf16.mxu0 %v1634_v4 }
  0xde   : > { %1662 = vmatpush1.bf16.msra.mxu0 %v1633_v6 }
  0xdf   : > { %v1100_v10 = vpop.permute.xlu0 %1099  ;;  %v1619_v8 = vpop.permute.xlu1 %1618 }
  0xe0   : > { %v1119_v12 = vsel %vm1115_vm5, %v1100_v10, %v1102_v5  ;;  %v1118_v13 = vsel %vm1115_vm5, %v5066_v9, %v1100_v10 }
  0xe1   : > { %1146 = vmatprep.subr.bf16.mxu1 %v1119_v12  ;;  %4646 = vmatmul.mubr.msk.bf16.gmra.mrb[20].mxu0 %vm469_vm0, %v5201_v7  ;;  %v5212_v12 = vld [vmem:[%s7274_s1 + $0x18] sm:$0xff]  }
  0xe2   : > { %1147 = vmatpush1.bf16.msra.mxu1 %v1118_v13  ;;  %1567 = vmatprep.mubr.bf16.mxu0 %v5362_v0 }
  0xe3   : > { %v1617_v15 = vpop.permute.xlu0 %1616  ;;  %4599 = vmatmul.mubr.msk.bf16.gmra.mrb[8].mxu1 %vm469_vm0, %v5202_v11  ;;  %v1108_v18 = vpop.permute.xlu1 %1107 }
  0xe4   : > { %v1636_v16 = vsel %vm1632_vm6, %v1617_v15, %v1619_v8  ;;  %v1635_v17 = vsel %vm1632_vm6, %v5071_v14, %v1617_v15  ;;  %1060 = vmatprep.mubr.bf16.mxu1 %v5362_v0  ;;  %v5213_v14 = vld [vmem:[%s7274_s1 + $0x58] sm:$0xff]  }
  0xe5   : > { %1663 = vmatprep.subr.bf16.mxu0 %v1636_v16 }
  0xe6   : > { %1664 = vmatpush1.bf16.msra.mxu0 %v1635_v17 }
  0xe7   : > { %v1106_v20 = vpop.permute.xlu0 %1105  ;;  %v1623_v23 = vpop.permute.xlu1 %1622 }
  0xe8   : > { %v1121_v22 = vsel %vm1115_vm5, %v1106_v20, %v1108_v18 }
  0xe9   : > { %1148 = vmatprep.subr.bf16.mxu1 %v1121_v22  ;;  %4647 = vmatmul.mubr.msk.bf16.gmra.mrb[24].mxu0 %vm469_vm0, %v5203_v19 }
  0xea   : > { %1577 = vmatprep.mubr.bf16.mxu0 %v5362_v0 }
  0xeb   : > { %v5074_v24 = vpop.permute.xlu0 %5073  ;;  %4600 = vmatmul.mubr.msk.bf16.gmra.mrb[12].mxu1 %vm469_vm0, %v5204_v21  ;;  %v5079_v26 = vpop.permute.xlu1 %5078 }
  0xec   : > { %v5075_v25 = vunpack.i.l.bf16 %v5074_v24  ;;  %1176 = vmatprep.mubr.bf16.mxu1 %v5362_v0  ;;  %v5080_v28 = vunpack.i.l.bf16 %v5079_v26  ;;  %v5076_v34 = vunpack.i.h.bf16 %v5074_v24  ;;  %v5081_v40 = vunpack.i.h.bf16 %v5079_v26 }
  0xee   : > { %v1120_v29 = vsel %vm1115_vm5, %v5075_v25, %v1106_v20  ;;  %v1637_v33 = vsel %vm1632_vm6, %v5080_v28, %v1623_v23 }
  0xef   : > { %v1625_v30 = vpop.permute.xlu0 %1624  ;;  %1149 = vmatpush1.bf16.msra.mxu1 %v1120_v29  ;;  %v1114_v32 = vpop.permute.xlu1 %1113 }
  0xf0   : > { %v1638_v31 = vsel %vm1632_vm6, %v1623_v23, %v1625_v30 }
  0xf1   : > { %1665 = vmatprep.subr.bf16.mxu0 %v1638_v31  ;;  %4648 = vmatmul.mubr.msk.bf16.gmra.mrb[28].mxu0 %vm469_vm0, %v5205_v27  ;;  %v5214_v27 = vld [vmem:[%s7274_s1 + $0xc0] sm:$0xff]  }
  0xf2   : > { %1666 = vmatpush1.bf16.msra.mxu0 %v1637_v33  ;;  %1693 = vmatprep.mubr.bf16.mxu0 %v5362_v0  ;;  %v5216_v33 = vld [vmem:[%s7274_s1 + $0xc8] sm:$0xff]  }
  0xf3   : > { %v1112_v35 = vpop.permute.xlu0 %1111  ;;  %v1631_v38 = vpop.permute.xlu1 %1630 }
  0xf4   : > { %v1123_v36 = vsel %vm1115_vm5, %v1112_v35, %v1114_v32  ;;  %v1122_v37 = vsel %vm1115_vm5, %v5076_v34, %v1112_v35  ;;  %v5215_v32 = vld [vmem:[%s7274_s1 + $0x100] sm:$0xff]   ;;  %v5217_v34 = vld [vmem:[%s7274_s1 + $0x108] sm:$0xff]   ;;  %v5218_v35 = vld [vmem:[%s7274_s1 + $0xd0] sm:$0xff]  }
  0xf5   : > { %1150 = vmatprep.subr.bf16.mxu1 %v1123_v36  ;;  %v5219_v36 = vld [vmem:[%s7274_s1 + $0x110] sm:$0xff]  }
  0xf6   : > { %1151 = vmatpush1.bf16.msra.mxu1 %v1122_v37  ;;  %v5220_v37 = vld [vmem:[%s7274_s1 + $0xd8] sm:$0xff]  }
  0xf7   : > { %v1629_v41 = vpop.permute.xlu0 %1628  ;;  %v5084_v44 = vpop.permute.xlu1 %5083 }
  0xf8   : > { %v1640_v42 = vsel %vm1632_vm6, %v1629_v41, %v1631_v38  ;;  %v1639_v43 = vsel %vm1632_vm6, %v5081_v40, %v1629_v41  ;;  %v5085_v46 = vunpack.i.l.bf16 %v5084_v44  ;;  %v5086_v58 = vunpack.i.h.bf16 %v5084_v44  ;;  %v5221_v38 = vld [vmem:[%s7274_s1 + $0x118] sm:$0xff]  }
  0xf9   : > { %1667 = vmatprep.subr.bf16.mxu0 %v1640_v42  ;;  %4605 = vmatmul.mubr.msk.bf16.vlgmr.msra.gmra.mrb[0].mxu1 %vm469_vm0, %v5206_v39 }
  0xfa   : > { %1668 = vmatpush1.bf16.msra.mxu0 %v1639_v43  ;;  %1186 = vmatprep.mubr.bf16.mxu1 %v5362_v0 }
  0xfb   : > { %v1249_v47 = vpop.permute.xlu0 %1248 }
  0xfc   : > { %v1272_v48 = vsel %vm1270_vm7, %v1249_v47, %v5085_v46  ;;  %v1766_v49 = vpop.permute.xlu1 %1765 }
  0xfd   : > { %1299 = vmatprep.subr.bf16.mxu1 %v1272_v48  ;;  %4653 = vmatmul.mubr.msk.bf16.vlgmr.msra.gmra.mrb[16].mxu0 %vm469_vm0, %v5207_v45 }
  0xfe   : > { %1703 = vmatprep.mubr.bf16.mxu0 %v5362_v0 }
  0xff   : > { %v1247_v51 = vpop.permute.xlu0 %1246 }
 0x100   : > { %v1271_v52 = vsel %vm1270_vm7, %v1247_v51, %v1249_v47  ;;  %v1764_v53 = vpop.permute.xlu1 %1763 }
 0x101   : > { %1300 = vmatpush1.bf16.msra.mxu1 %v1271_v52  ;;  %v1788_v60 = vsel %vm1787_vm8, %v1764_v53, %v1766_v49 }
 0x102   : > { %4606 = vmatmul.mubr.msk.bf16.gmra.mrb[4].mxu1 %vm469_vm0, %v5208_v50 }
 0x103   : > { %v5089_v55 = vpop.permute.xlu0 %5088  ;;  %1196 = vmatprep.mubr.bf16.mxu1 %v5362_v0 }
 0x104   : > { %v5090_v56 = vunpack.i.l.bf16 %v5089_v55  ;;  %v1253_v57 = vpop.permute.xlu1 %1252  ;;  %v5091_v4 = vunpack.i.h.bf16 %v5089_v55  ;;  %v324_v55 = vlaneseq }
 0x105   : > { %4654 = vmatmul.mubr.msk.bf16.gmra.mrb[20].mxu0 %vm469_vm0, %v5209_v54 }
 0x106   : > { %v1789_v59 = vsel %vm1787_vm8, %v1766_v49, %v5090_v56  ;;  %1713 = vmatprep.mubr.bf16.mxu0 %v5362_v0  ;;  %v325_v56 = vand.u32 127, %v324_v55 }
 0x107   : > { %v1255_v61 = vpop.permute.xlu0 %1254  ;;  %1816 = vmatprep.subr.bf16.mxu0 %v1789_v59 }
 0x108   : > { %1817 = vmatpush1.bf16.msra.mxu0 %v1788_v60  ;;  %v1274_v63 = vsel %vm1270_vm7, %v1255_v61, %v5086_v58  ;;  %v1273_v1 = vsel %vm1270_vm7, %v1253_v57, %v1255_v61  ;;  %v1770_v2 = vpop.permute.xlu1 %1769  ;;  %v326_v57 = vadd.s32 128, %v325_v56  ;;  %v331_v58 = vand.u32 15, %v325_v56  ;;  %v4150_v60 = vld [vmem:[%s7279_s6 + $0x68] sm:$0xff] }
 0x109   : > { %1301 = vmatprep.subr.bf16.mxu1 %v1274_v63 }
 0x10a   : > { %1302 = vmatpush1.bf16.msra.mxu1 %v1273_v1  ;;  %v338_v59 = vand.u32 15, %v326_v57  ;;  %vm5905_vm9 = vcmp.ne.s32.totalorder %v331_v58, 0  ;;  %vm5921_vm11 = vcmp.ne.s32.totalorder %v331_v58, 15 }
 0x10b   : > { %v1772_v5 = vpop.permute.xlu0 %1771  ;;  %4607 = vmatmul.mubr.msk.bf16.gmra.mrb[8].mxu1 %vm469_vm0, %v5210_v62 }
 0x10c   : > { %v1791_v6 = vsel %vm1787_vm8, %v1772_v5, %v5091_v4  ;;  %v1790_v7 = vsel %vm1787_vm8, %v1770_v2, %v1772_v5  ;;  %1206 = vmatprep.mubr.bf16.mxu1 %v5362_v0  ;;  %vm5909_vm10 = vcmp.ne.s32.totalorder %v338_v59, 0  ;;  %vm5925_vm12 = vcmp.ne.s32.totalorder %v338_v59, 15 }
 0x10d   : > { %v5094_v9 = vpop.permute.xlu1 %5093  ;;  %1818 = vmatprep.subr.bf16.mxu0 %v1791_v6  ;;  %4655 = vmatmul.mubr.msk.bf16.gmra.mrb[24].mxu0 %vm469_vm0, %v5211_v3 }
 0x10e   : > { %v5095_v10 = vunpack.i.l.bf16 %v5094_v9  ;;  %1819 = vmatpush1.bf16.msra.mxu0 %v1790_v7  ;;  %1723 = vmatprep.mubr.bf16.mxu0 %v5362_v0  ;;  %v5096_v22 = vunpack.i.h.bf16 %v5094_v9 }
 0x10f   : > { %v1261_v11 = vpop.permute.xlu0 %1260 }
 0x110   : > { %v1276_v13 = vsel %vm1270_vm7, %v1261_v11, %v5095_v10 }
 0x111   : > { %1303 = vmatprep.subr.bf16.mxu1 %v1276_v13  ;;  %v1778_v8 = vpop.permute.xlu1 %1777  ;;  %v4151_v13 = vld [vmem:[%s7279_s6 + $0x70] sm:$0xff] }
 0x113   : > { %v1259_v15 = vpop.permute.xlu0 %1258  ;;  %4608 = vmatmul.mubr.msk.bf16.gmra.mrb[12].mxu1 %vm469_vm0, %v5212_v12 }
 0x114   : > { %v1275_v16 = vsel %vm1270_vm7, %v1259_v15, %v1261_v11  ;;  %1331 = vmatprep.mubr.bf16.mxu1 %v5362_v0 }
 0x115   : > { %1304 = vmatpush1.bf16.msra.mxu1 %v1275_v16  ;;  %v1776_v17 = vpop.permute.xlu1 %1775  ;;  %4656 = vmatmul.mubr.msk.bf16.gmra.mrb[28].mxu0 %vm469_vm0, %v5213_v14 }
 0x116   : > { %1848 = vmatprep.mubr.bf16.mxu0 %v5362_v0  ;;  %v1792_v20 = vsel %vm1787_vm8, %v1776_v17, %v1778_v8 }
 0x117   : > { %v1780_v18 = vpop.permute.xlu0 %1779 }
 0x118   : > { %v1793_v19 = vsel %vm1787_vm8, %v1778_v8, %v1780_v18 }
 0x119   : > { %1820 = vmatprep.subr.bf16.mxu0 %v1793_v19  ;;  %v1265_v21 = vpop.permute.xlu1 %1264 }
 0x11a   : > { %1821 = vmatpush1.bf16.msra.mxu0 %v1792_v20 }
 0x11b   : > { %v1267_v23 = vpop.permute.xlu0 %1266 }
 0x11c   : > { %v1278_v24 = vsel %vm1270_vm7, %v1267_v23, %v5096_v22  ;;  %v1277_v25 = vsel %vm1270_vm7, %v1265_v21, %v1267_v23 }
 0x11d   : > { %1305 = vmatprep.subr.bf16.mxu1 %v1278_v24  ;;  %v1786_v26 = vpop.permute.xlu1 %1785 }
 0x11e   : > { %1306 = vmatpush1.bf16.msra.mxu1 %v1277_v25 }
 0x11f   : > { %v1784_v28 = vpop.permute.xlu0 %1783 }
 0x120   : > { %v1795_v29 = vsel %vm1787_vm8, %v1784_v28, %v1786_v26 }
 0x121   : > { %4621 = vmatmul.mubr.msk.bf16.vlgmr.msra.gmra.mrb[0].mxu1 %vm469_vm0, %v5214_v27  ;;  %1822 = vmatprep.subr.bf16.mxu0 %v1795_v29 }
 0x122   : > { %1341 = vmatprep.mubr.bf16.mxu1 %v5362_v0 }
 0x123   : > { %v1782_v30 = vpop.permute.xlu0 %1781 }
 0x124   : > { %v1794_v31 = vsel %vm1787_vm8, %v1782_v30, %v1784_v28 }
 0x125   : > { %1823 = vmatpush1.bf16.msra.mxu0 %v1794_v31 }
 0x128   : > { %4669 = vmatmul.mubr.msk.bf16.vlgmr.msra.gmra.mrb[16].mxu0 %vm469_vm0, %v5215_v32 }
 0x129   : > { %4622 = vmatmul.mubr.msk.bf16.gmra.mrb[4].mxu1 %vm469_vm0, %v5216_v33  ;;  %1858 = vmatprep.mubr.bf16.mxu0 %v5362_v0 }
 0x12a   : > { %1351 = vmatprep.mubr.bf16.mxu1 %v5362_v0 }
 0x12e   : > { %v1952_v8 = vpop.permute.xlu1 %1951 }
 0x130   : > { %4670 = vmatmul.mubr.msk.bf16.gmra.mrb[20].mxu0 %vm469_vm0, %v5217_v34 }
 0x131   : > { %4623 = vmatmul.mubr.msk.bf16.gmra.mrb[8].mxu1 %vm469_vm0, %v5218_v35  ;;  %1868 = vmatprep.mubr.bf16.mxu0 %v5362_v0 }
 0x132   : > { %1361 = vmatprep.mubr.bf16.mxu1 %v5362_v0 }
 0x134   : > { %v1957_v34 = vpop.permute.xlu0 %1956 }
 0x138   : > { %4671 = vmatmul.mubr.msk.bf16.gmra.mrb[24].mxu0 %vm469_vm0, %v5219_v36 }
 0x139   : > { %4624 = vmatmul.mubr.msk.bf16.gmra.mrb[12].mxu1 %vm469_vm0, %v5220_v37  ;;  %1878 = vmatprep.mubr.bf16.mxu0 %v5362_v0 }
 0x13a   : > { %2388 = vmatprep.mubr.bf16.mxu1 %v5362_v0 }
 0x140   : > { %4672 = vmatmul.mubr.msk.bf16.gmra.mrb[28].mxu0 %vm469_vm0, %v5221_v38 }
 0x141   : > { %2901 = vmatprep.mubr.bf16.mxu0 %v5362_v0 }
 0x18c   : > { %v853_v39 = vpop.f32.mrb[0].mxu0 }
 0x18d   : > { %v855_v40 = vpop.f32.mrb[1].mxu0 }
 0x18e   : > { %v857_v41 = vpop.f32.mrb[2].mxu0 }
 0x18f   : > { %v859_v42 = vpop.f32.mrb[3].mxu0 }
 0x194   : > { %v863_v43 = vpop.f32.mrb[4].mxu0 }
 0x195   : > { %v865_v44 = vpop.f32.mrb[5].mxu0 }
 0x196   : > { %v867_v45 = vpop.f32.mrb[6].mxu0 }
 0x197   : > { %v869_v46 = vpop.f32.mrb[7].mxu0 }
 0x19c   : > { %v5888_v47 = vpop.f32.mrb[8].mxu0 }
 0x19d   : > { %v5890_v48 = vpop.f32.mrb[9].mxu0 }
 0x19e   : > { %v5892_v49 = vpop.f32.mrb[10].mxu0 }
 0x19f   : > { %v5894_v50 = vpop.f32.mrb[11].mxu0 }
 0x1a4   : > { %v5896_v51 = vpop.f32.mrb[12].mxu0 }
 0x1a5   : > { %v5898_v52 = vpop.f32.mrb[13].mxu0 }
 0x1a6   : > { %v5900_v53 = vpop.f32.mrb[14].mxu0 }
 0x1a7   : > { %v5902_v54 = vpop.f32.mrb[15].mxu0 }
 0x1f4   : > { %v1333_v62 = vpop.f32.mrb[0].mxu1 }
 0x1f5   : > { %v1392_v63 = vsel %vm5905_vm9, %v1333_v62, 0.0  ;;  %v1335_v1 = vpop.f32.mrb[1].mxu1 }
 0x1f6   : > { %v1408_v2 = vadd.f32 %v1392_v63, %v853_v39  ;;  %v1393_v3 = vsel %vm5909_vm10, %v1335_v1, 0.0  ;;  %v1337_v4 = vpop.f32.mrb[2].mxu1 }
 0x1f7   : > { %v1409_v5 = vadd.f32 %v1393_v3, %v855_v40  ;;  %v1394_v6 = vsel %vm5905_vm9, %v1337_v4, 0.0  ;;  %v1339_v7 = vpop.f32.mrb[3].mxu1 }
 0x1f8   : > { %v1410_v9 = vadd.f32 %v1394_v6, %v857_v41  ;;  %v1395_v10 = vsel %vm5909_vm10, %v1339_v7, 0.0 }
 0x1f9   : > { %v1411_v11 = vadd.f32 %v1395_v10, %v859_v42  ;;  %v1962_v42 = vpop.permute.xlu1 %1961 }
 0x1fb   : > { %v1850_v14 = vpop.f32.mrb[16].mxu0 }
 0x1fc   : > { %v1909_v15 = vsel %vm5921_vm11, %v1850_v14, 0.0  ;;  %v1343_v16 = vpop.f32.mrb[4].mxu1  ;;  %v1852_v17 = vpop.f32.mrb[17].mxu0 }
 0x1fd   : > { %v1925_v18 = vadd.f32 %v1909_v15, %v1408_v2  ;;  %v1396_v19 = vsel %vm5905_vm9, %v1343_v16, 0.0  ;;  %v1910_v20 = vsel %vm5925_vm12, %v1852_v17, 0.0  ;;  %v1345_v21 = vpop.f32.mrb[5].mxu1  ;;  %v1854_v22 = vpop.f32.mrb[18].mxu0 }
 0x1fe   : > { %v1412_v23 = vadd.f32 %v1396_v19, %v863_v43  ;;  %v1926_v24 = vadd.f32 %v1910_v20, %v1409_v5  ;;  %v1397_v25 = vsel %vm5909_vm10, %v1345_v21, 0.0  ;;  %v1911_v26 = vsel %vm5921_vm11, %v1854_v22, 0.0  ;;  %v1347_v27 = vpop.f32.mrb[6].mxu1  ;;  %v1856_v28 = vpop.f32.mrb[19].mxu0 }
 0x1ff   : > { %v1413_v29 = vadd.f32 %v1397_v25, %v865_v44  ;;  %v1927_v30 = vadd.f32 %v1911_v26, %v1410_v9  ;;  %v1398_v31 = vsel %vm5905_vm9, %v1347_v27, 0.0  ;;  %v1912_v32 = vsel %vm5925_vm12, %v1856_v28, 0.0  ;;  %v1349_v33 = vpop.f32.mrb[7].mxu1  ;;  %v1967_v15 = vpop.permute.xlu1 %1966 }
 0x200   : > { %v1414_v35 = vadd.f32 %v1398_v31, %v867_v45  ;;  %v1928_v36 = vadd.f32 %v1912_v32, %v1411_v11  ;;  %v1399_v37 = vsel %vm5909_vm10, %v1349_v33, 0.0  ;;  %v5945_v38 = vadd.f32 %v1952_v8, %v1925_v18 }
 0x201   : > { %v1415_v39 = vadd.f32 %v1399_v37, %v869_v46  ;;  %v5947_v40 = vadd.f32 %v1952_v8, %v1926_v24  ;;  %v5949_v41 = vadd.f32 %v1957_v34, %v1927_v30 }
 0x202   : > { %v5951_v43 = vadd.f32 %v1957_v34, %v1928_v36 }
 0x203   : > { %v1860_v44 = vpop.f32.mrb[20].mxu0  ;;  %v2005_v56 = vadd.f32 %v5947_v40, %v5945_v38 }
 0x204   : > { %v1913_v45 = vsel %vm5921_vm11, %v1860_v44, 0.0  ;;  %v1353_v57 = vpop.f32.mrb[8].mxu1  ;;  %v1862_v58 = vpop.f32.mrb[21].mxu0  ;;  %v2008_v59 = vadd.f32 %v5951_v43, %v5949_v41 }
 0x205   : > { %v1929_v46 = vadd.f32 %v1913_v45, %v1412_v23  ;;  %v1400_v62 = vsel %vm5905_vm9, %v1353_v57, 0.0  ;;  %2006 = vadd.xlane.f32.xlu0 %v2005_v56  ;;  %v1914_v63 = vsel %vm5925_vm12, %v1862_v58, 0.0  ;;  %v1355_v1 = vpop.f32.mrb[9].mxu1  ;;  %v1864_v2 = vpop.f32.mrb[22].mxu0 }
 0x206   : > { %v1416_v3 = vadd.f32 %v1400_v62, %v5888_v47  ;;  %v1930_v4 = vadd.f32 %v1914_v63, %v1413_v29  ;;  %v1401_v5 = vsel %vm5909_vm10, %v1355_v1, 0.0  ;;  %v1915_v6 = vsel %vm5921_vm11, %v1864_v2, 0.0  ;;  %v1357_v7 = vpop.f32.mrb[10].mxu1  ;;  %2009 = vadd.xlane.f32.xlu1 %v2008_v59  ;;  %v1866_v9 = vpop.f32.mrb[23].mxu0 }
 0x207   : > { %v1417_v10 = vadd.f32 %v1401_v5, %v5890_v48  ;;  %v1931_v11 = vadd.f32 %v1915_v6, %v1414_v35  ;;  %v1402_v8 = vsel %vm5905_vm9, %v1357_v7, 0.0  ;;  %v1916_v14 = vsel %vm5925_vm12, %v1866_v9, 0.0  ;;  %v1359_v47 = vpop.f32.mrb[11].mxu1  ;;  %v1977_v57 = vpop.permute.xlu1 %1976 }
 0x208   : > { %v1418_v16 = vadd.f32 %v1402_v8, %v5892_v49  ;;  %v1932_v17 = vadd.f32 %v1916_v14, %v1415_v39  ;;  %v1403_v18 = vsel %vm5909_vm10, %v1359_v47, 0.0  ;;  %v5976_v19 = vadd.f32 %v1962_v42, %v1929_v46  ;;  %v1972_v39 = vpop.permute.xlu0 %1971 }
 0x209   : > { %v1419_v20 = vadd.f32 %v1403_v18, %v5894_v50  ;;  %v5979_v48 = vadd.f32 %v1962_v42, %v1930_v4  ;;  %v5981_v21 = vadd.f32 %v1967_v15, %v1931_v11 }
 0x20a   : > { %v5983_v22 = vadd.f32 %v1967_v15, %v1932_v17 }
 0x20b   : > { %v1870_v23 = vpop.f32.mrb[24].mxu0  ;;  %v2011_v24 = vadd.f32 %v5979_v48, %v5976_v19  ;;  %v1987_v17 = vpop.permute.xlu1 %1986 }
 0x20c   : > { %v1917_v49 = vsel %vm5921_vm11, %v1870_v23, 0.0  ;;  %v1363_v25 = vpop.f32.mrb[12].mxu1  ;;  %v1872_v26 = vpop.f32.mrb[25].mxu0  ;;  %v2014_v31 = vadd.f32 %v5983_v22, %v5981_v21 }
 0x20d   : > { %v1933_v27 = vadd.f32 %v1917_v49, %v1416_v3  ;;  %v1404_v28 = vsel %vm5905_vm9, %v1363_v25, 0.0  ;;  %2012 = vadd.xlane.f32.xlu0 %v2011_v24  ;;  %v1918_v50 = vsel %vm5925_vm12, %v1872_v26, 0.0  ;;  %v1365_v29 = vpop.f32.mrb[13].mxu1  ;;  %v1874_v30 = vpop.f32.mrb[26].mxu0 }
 0x20e   : > { %v1420_v32 = vadd.f32 %v1404_v28, %v5896_v51  ;;  %v1934_v33 = vadd.f32 %v1918_v50, %v1417_v10  ;;  %v1405_v34 = vsel %vm5909_vm10, %v1365_v29, 0.0  ;;  %v1919_v35 = vsel %vm5921_vm11, %v1874_v30, 0.0  ;;  %v1367_v36 = vpop.f32.mrb[14].mxu1  ;;  %v1876_v37 = vpop.f32.mrb[27].mxu0 }
 0x20f   : > { %v1421_v42 = vadd.f32 %v1405_v34, %v5898_v52  ;;  %v1935_v44 = vadd.f32 %v1919_v35, %v1418_v16  ;;  %v1406_v56 = vsel %vm5905_vm9, %v1367_v36, 0.0  ;;  %v1920_v45 = vsel %vm5925_vm12, %v1876_v37, 0.0  ;;  %v1369_v51 = vpop.f32.mrb[15].mxu1  ;;  %v1982_v10 = vpop.permute.xlu0 %1981 }
 0x210   : > { %v1422_v58 = vadd.f32 %v1406_v56, %v5900_v53  ;;  %v1936_v59 = vadd.f32 %v1920_v45, %v1419_v20  ;;  %v1407_v46 = vsel %vm5909_vm10, %v1369_v51, 0.0  ;;  %v6008_v62 = vadd.f32 %v1972_v39, %v1933_v27 }
 0x211   : > { %v1423_v63 = vadd.f32 %v1407_v46, %v5902_v54  ;;  %2015 = vadd.xlane.f32.xlu0 %v2014_v31  ;;  %v6011_v52 = vadd.f32 %v1972_v39, %v1934_v33  ;;  %v6013_v1 = vadd.f32 %v1977_v57, %v1935_v44 }
 0x212   : > { %v6015_v2 = vadd.f32 %v1977_v57, %v1936_v59 }
 0x213   : > { %v1880_v3 = vpop.f32.mrb[28].mxu0  ;;  %v2017_v4 = vadd.f32 %v6011_v52, %v6008_v62 }
 0x214   : > { %v1921_v53 = vsel %vm5921_vm11, %v1880_v3, 0.0  ;;  %v1882_v5 = vpop.f32.mrb[29].mxu0  ;;  %v2020_v6 = vadd.f32 %v6015_v2, %v6013_v1 }
 0x215   : > { %v1937_v7 = vadd.f32 %v1921_v53, %v1420_v32  ;;  %2018 = vadd.xlane.f32.xlu1 %v2017_v4  ;;  %v1922_v54 = vsel %vm5925_vm12, %v1882_v5, 0.0  ;;  %v1884_v9 = vpop.f32.mrb[30].mxu0 }
 0x216   : > { %v1938_v11 = vadd.f32 %v1922_v54, %v1421_v42  ;;  %v1923_v8 = vsel %vm5921_vm11, %v1884_v9, 0.0  ;;  %2021 = vadd.xlane.f32.xlu0 %v2020_v6  ;;  %v1886_v14 = vpop.f32.mrb[31].mxu0 }
 0x217   : > { %v1939_v47 = vadd.f32 %v1923_v8, %v1422_v58  ;;  %v1924_v15 = vsel %vm5925_vm12, %v1886_v14, 0.0  ;;  %v2001_v16 = vadd.f32 %v1982_v10, %v1937_v7 }
 0x218   : > { %v1940_v18 = vadd.f32 %v1924_v15, %v1423_v63  ;;  %v2002_v20 = vadd.f32 %v1982_v10, %v1938_v11 }
 0x219   : > { %v2003_v23 = vadd.f32 %v1987_v17, %v1939_v47 }
 0x21a   : > { %v2023_v24 = vadd.f32 %v2002_v20, %v2001_v16  ;;  %v2004_v49 = vadd.f32 %v1987_v17, %v1940_v18 }
 0x21c   : > { %2024 = vadd.xlane.f32.xlu1 %v2023_v24  ;;  %v2026_v25 = vadd.f32 %v2004_v49, %v2003_v23 }
 0x21e   : > { %2027 = vadd.xlane.f32.xlu0 %v2026_v25 }
 0x292   : > { %v2007_v26 = vpop.xlane.xlu0 %2006 }
 0x293   : > { %v2030_v27 = vmul.f32 0.00390625, %v2007_v26  ;;  %v2010_v28 = vpop.xlane.xlu1 %2009 }
 0x294   : > { %v2031_v50 = vmul.f32 0.00390625, %v2010_v28 }
 0x295   : > { %v6030_v29 = vsub.f32 %v5945_v38, %v2030_v27  ;;  %v6033_v30 = vsub.f32 %v5947_v40, %v2030_v27 }
 0x296   : > { %v6036_v31 = vsub.f32 %v5949_v41, %v2031_v50  ;;  %v6039_v32 = vsub.f32 %v5951_v43, %v2031_v50 }
 0x297   : > { %v2054_v33 = vmul.f32 %v6030_v29, %v6030_v29  ;;  %v2055_v34 = vmul.f32 %v6033_v30, %v6033_v30 }
 0x298   : > { %v2056_v35 = vmul.f32 %v6036_v31, %v6036_v31  ;;  %v2057_v38 = vmul.f32 %v6039_v32, %v6039_v32 }
 0x299   : > { %v2070_v40 = vadd.f32 %v2055_v34, %v2054_v33 }
 0x29a   : > { %v2013_v36 = vpop.xlane.xlu0 %2012  ;;  %v2073_v37 = vadd.f32 %v2057_v38, %v2056_v35 }
 0x29b   : > { %v2032_v41 = vmul.f32 0.00390625, %v2013_v36  ;;  %2071 = vadd.xlane.f32.xlu1 %v2070_v40 }
 0x29c   : > { %2074 = vadd.xlane.f32.xlu0 %v2073_v37 }
 0x29d   : > { %v6050_v43 = vsub.f32 %v5976_v19, %v2032_v41  ;;  %v6053_v39 = vsub.f32 %v5979_v48, %v2032_v41 }
 0x29e   : > { %v2016_v42 = vpop.xlane.xlu0 %2015 }
 0x29f   : > { %v2058_v44 = vmul.f32 %v6050_v43, %v6050_v43  ;;  %v2059_v56 = vmul.f32 %v6053_v39, %v6053_v39  ;;  %v2033_v45 = vmul.f32 0.00390625, %v2016_v42 }
 0x2a1   : > { %v6060_v51 = vsub.f32 %v5981_v21, %v2033_v45  ;;  %v6063_v57 = vsub.f32 %v5983_v22, %v2033_v45  ;;  %v2076_v58 = vadd.f32 %v2059_v56, %v2058_v44 }
 0x2a2   : > { %v2019_v19 = vpop.xlane.xlu1 %2018 }
 0x2a3   : > { %v2060_v48 = vmul.f32 %v6060_v51, %v6060_v51  ;;  %v2061_v59 = vmul.f32 %v6063_v57, %v6063_v57  ;;  %v2034_v46 = vmul.f32 0.00390625, %v2019_v19  ;;  %2077 = vadd.xlane.f32.xlu1 %v2076_v58  ;;  %v2022_v63 = vpop.xlane.xlu0 %2021 }
 0x2a4   : > { %v2035_v3 = vmul.f32 0.00390625, %v2022_v63 }
 0x2a5   : > { %v6070_v4 = vsub.f32 %v6008_v62, %v2034_v46  ;;  %v6073_v21 = vsub.f32 %v6011_v52, %v2034_v46  ;;  %v2079_v22 = vadd.f32 %v2061_v59, %v2060_v48 }
 0x2a6   : > { %v6076_v53 = vsub.f32 %v6013_v1, %v2035_v3  ;;  %v6079_v5 = vsub.f32 %v6015_v2, %v2035_v3 }
 0x2a7   : > { %v2062_v6 = vmul.f32 %v6070_v4, %v6070_v4  ;;  %v2063_v7 = vmul.f32 %v6073_v21, %v6073_v21  ;;  %2080 = vadd.xlane.f32.xlu0 %v2079_v22 }
 0x2a8   : > { %v2064_v62 = vmul.f32 %v6076_v53, %v6076_v53  ;;  %v2065_v52 = vmul.f32 %v6079_v5, %v6079_v5 }
 0x2a9   : > { %v2025_v54 = vpop.xlane.xlu1 %2024  ;;  %v2082_v9 = vadd.f32 %v2063_v7, %v2062_v6 }
 0x2aa   : > { %v2036_v1 = vmul.f32 0.00390625, %v2025_v54  ;;  %v2085_v10 = vadd.f32 %v2065_v52, %v2064_v62 }
 0x2ab   : > { %2083 = vadd.xlane.f32.xlu1 %v2082_v9  ;;  %v2028_v2 = vpop.xlane.xlu0 %2027 }
 0x2ac   : > { %v6089_v11 = vsub.f32 %v2001_v16, %v2036_v1  ;;  %v6091_v8 = vsub.f32 %v2002_v20, %v2036_v1  ;;  %v2037_v14 = vmul.f32 0.00390625, %v2028_v2  ;;  %2086 = vadd.xlane.f32.xlu0 %v2085_v10 }
 0x2ae   : > { %v2066_v47 = vmul.f32 %v6089_v11, %v6089_v11  ;;  %v2067_v15 = vmul.f32 %v6091_v8, %v6091_v8  ;;  %v6097_v17 = vsub.f32 %v2003_v23, %v2037_v14  ;;  %v6099_v18 = vsub.f32 %v2004_v49, %v2037_v14 }
 0x2b0   : > { %v2068_v24 = vmul.f32 %v6097_v17, %v6097_v17  ;;  %v2069_v16 = vmul.f32 %v6099_v18, %v6099_v18  ;;  %v2088_v20 = vadd.f32 %v2067_v15, %v2066_v47 }
 0x2b2   : > { %2089 = vadd.xlane.f32.xlu1 %v2088_v20  ;;  %v2091_v25 = vadd.f32 %v2069_v16, %v2068_v24 }
 0x2b4   : > { %2092 = vadd.xlane.f32.xlu0 %v2091_v25 }
 0x2c3   : > { %5100 = vrot.lane.b32.xlu1 %v5362_v0, %s5363_s29 }
 0x2c7   : > { %5105 = vrot.lane.b32.xlu1 %v5362_v0, %s5363_s29 }
 0x2cb   : > { %5110 = vrot.lane.b32.xlu1 %v5362_v0, %s5364_s14 }
 0x328   : > { %v2072_v23 = vpop.xlane.xlu1 %2071 }
 0x329   : > { %v2094_v49 = vmul.f32 0.00390625, %v2072_v23  ;;  %v2075_v26 = vpop.xlane.xlu0 %2074 }
 0x32a   : > { %v2095_v27 = vmul.f32 0.00390625, %v2075_v26 }
 0x32b   : > { %v2102_v28 = vadd.f32 1e-05, %v2094_v49 }
 0x32c   : > { %v2103_v50 = vadd.f32 1e-05, %v2095_v27 }
 0x32d   : > { %5258 = vrsqrt.f32 %v2102_v28 }
 0x32e   : > { %5260 = vrsqrt.f32 %v2103_v50 }
 0x330   : > { %v2078_v33 = vpop.xlane.xlu1 %2077 }
 0x331   : > { %v2096_v34 = vmul.f32 0.00390625, %v2078_v33 }
 0x333   : > { %v2104_v35 = vadd.f32 1e-05, %v2096_v34 }
 0x334   : > { %v2081_v38 = vpop.xlane.xlu0 %2080 }
 0x335   : > { %5262 = vrsqrt.f32 %v2104_v35  ;;  %v2097_v40 = vmul.f32 0.00390625, %v2081_v38 }
 0x337   : > { %v5259_v36 = vpop.eup %5258  ;;  %v2105_v37 = vadd.f32 1e-05, %v2097_v40 }
 0x338   : > { %v5261_v41 = vpop.eup %5260  ;;  %v6112_v42 = vmul.f32 %v5259_v36, %v6030_v29  ;;  %v6115_v44 = vmul.f32 %v5259_v36, %v6033_v30  ;;  %v2084_v56 = vpop.xlane.xlu1 %2083 }
 0x339   : > { %v6118_v45 = vmul.f32 %v5261_v41, %v6036_v31  ;;  %v6121_v58 = vmul.f32 %v5261_v41, %v6039_v32  ;;  %5264 = vrsqrt.f32 %v2105_v37  ;;  %v2098_v19 = vmul.f32 0.00390625, %v2084_v56  ;;  %v2087_v48 = vpop.xlane.xlu0 %2086 }
 0x33a   : > { %v2150_v59 = vmul.f32 0.044715, %v6112_v42  ;;  %v2151_v46 = vmul.f32 0.044715, %v6115_v44  ;;  %v2099_v22 = vmul.f32 0.00390625, %v2087_v48 }
 0x33b   : > { %v2152_v29 = vmul.f32 0.044715, %v6118_v45  ;;  %v2153_v63 = vmul.f32 0.044715, %v6121_v58  ;;  %v2106_v31 = vadd.f32 1e-05, %v2098_v19 }
 0x33c   : > { %v2166_v30 = vmul.f32 %v2150_v59, %v6112_v42  ;;  %v2167_v3 = vmul.f32 %v2151_v46, %v6115_v44  ;;  %v2107_v52 = vadd.f32 1e-05, %v2099_v22 }
 0x33d   : > { %v2168_v32 = vmul.f32 %v2152_v29, %v6118_v45  ;;  %v2169_v6 = vmul.f32 %v2153_v63, %v6121_v58  ;;  %5266 = vrsqrt.f32 %v2106_v31  ;;  %v2134_v29 = vmul.f32 0.5, %v6112_v42 }
 0x33e   : > { %v2182_v7 = vmul.f32 %v2166_v30, %v6112_v42  ;;  %v2183_v62 = vmul.f32 %v2167_v3, %v6115_v44  ;;  %5268 = vrsqrt.f32 %v2107_v52 }
 0x33f   : > { %v5263_v54 = vpop.eup %5262  ;;  %v2184_v9 = vmul.f32 %v2168_v32, %v6118_v45  ;;  %v2185_v1 = vmul.f32 %v2169_v6, %v6121_v58  ;;  %v2090_v10 = vpop.xlane.xlu1 %2089  ;;  %v2135_v6 = vmul.f32 0.5, %v6115_v44 }
 0x340   : > { %v2198_v2 = vadd.f32 %v2182_v7, %v6112_v42  ;;  %v2199_v14 = vadd.f32 %v2183_v62, %v6115_v44  ;;  %v6138_v47 = vmul.f32 %v5263_v54, %v6050_v43  ;;  %v6141_v15 = vmul.f32 %v5263_v54, %v6053_v39 }
 0x341   : > { %v2200_v24 = vadd.f32 %v2184_v9, %v6118_v45  ;;  %v2201_v16 = vadd.f32 %v2185_v1, %v6121_v58  ;;  %v2100_v20 = vmul.f32 0.00390625, %v2090_v10  ;;  %v2093_v49 = vpop.xlane.xlu0 %2092  ;;  %v2136_v9 = vmul.f32 0.5, %v6118_v45 }
 0x342   : > { %v2214_v25 = vmul.f32 0.7978846, %v2198_v2  ;;  %v2215_v23 = vmul.f32 0.7978846, %v2199_v14  ;;  %v2154_v50 = vmul.f32 0.044715, %v6138_v47 }
 0x343   : > { %v5265_v26 = vpop.eup %5264  ;;  %v2216_v27 = vmul.f32 0.7978846, %v2200_v24  ;;  %v2217_v28 = vmul.f32 0.7978846, %v2201_v16  ;;  %v2155_v43 = vmul.f32 0.044715, %v6141_v15 }
 0x344   : > { %5270 = vtanh.f32 %v2214_v25  ;;  %v6148_v39 = vmul.f32 %v5265_v26, %v6060_v51  ;;  %v6151_v33 = vmul.f32 %v5265_v26, %v6063_v57  ;;  %v2170_v34 = vmul.f32 %v2154_v50, %v6138_v47 }
 0x345   : > { %5272 = vtanh.f32 %v2215_v23  ;;  %v2108_v35 = vadd.f32 1e-05, %v2100_v20  ;;  %v2101_v38 = vmul.f32 0.00390625, %v2093_v49  ;;  %v2171_v40 = vmul.f32 %v2155_v43, %v6141_v15 }
 0x346   : > { %5274 = vtanh.f32 %v2216_v27  ;;  %v2186_v36 = vmul.f32 %v2170_v34, %v6138_v47  ;;  %v2156_v37 = vmul.f32 0.044715, %v6148_v39  ;;  %v2157_v41 = vmul.f32 0.044715, %v6151_v33 }
 0x347   : > { %5276 = vtanh.f32 %v2217_v28  ;;  %v5267_v51 = vpop.eup %5266  ;;  %v2187_v56 = vmul.f32 %v2171_v40, %v6141_v15  ;;  %v2109_v57 = vadd.f32 1e-05, %v2101_v38  ;;  %v2137_v25 = vmul.f32 0.5, %v6121_v58 }
 0x348   : > { %5278 = vrsqrt.f32 %v2108_v35  ;;  %v2202_v19 = vadd.f32 %v2186_v36, %v6138_v47  ;;  %v2172_v48 = vmul.f32 %v2156_v37, %v6148_v39  ;;  %v2173_v59 = vmul.f32 %v2157_v41, %v6151_v33  ;;  %v5269_v3 = vpop.eup %5268 }
 0x349   : > { %v6163_v46 = vmul.f32 %v5267_v51, %v6070_v4  ;;  %v2203_v63 = vadd.f32 %v2187_v56, %v6141_v15  ;;  %v6168_v30 = vmul.f32 %v5267_v51, %v6073_v21  ;;  %5280 = vrsqrt.f32 %v2109_v57 }
 0x34a   : > { %v2218_v31 = vmul.f32 0.7978846, %v2202_v19  ;;  %v2188_v22 = vmul.f32 %v2172_v48, %v6148_v39  ;;  %v2189_v32 = vmul.f32 %v2173_v59, %v6151_v33  ;;  %v6175_v62 = vmul.f32 %v5269_v3, %v6076_v53 }
 0x34b   : > { %v2219_v7 = vmul.f32 0.7978846, %v2203_v63  ;;  %v2158_v4 = vmul.f32 0.044715, %v6163_v46  ;;  %v2159_v52 = vmul.f32 0.044715, %v6168_v30  ;;  %v6183_v44 = vmul.f32 %v5269_v3, %v6079_v5 }
 0x34c   : > { %5282 = vtanh.f32 %v2218_v31  ;;  %v2204_v42 = vadd.f32 %v2188_v22, %v6148_v39  ;;  %v2205_v21 = vadd.f32 %v2189_v32, %v6151_v33  ;;  %v2160_v45 = vmul.f32 0.044715, %v6175_v62 }
 0x34d   : > { %5284 = vtanh.f32 %v2219_v7  ;;  %v2174_v1 = vmul.f32 %v2158_v4, %v6163_v46  ;;  %v2175_v24 = vmul.f32 %v2159_v52, %v6168_v30  ;;  %v2161_v58 = vmul.f32 0.044715, %v6183_v44 }
 0x34e   : > { %v5271_v54 = vpop.eup %5270  ;;  %v2220_v53 = vmul.f32 0.7978846, %v2204_v42  ;;  %v2221_v14 = vmul.f32 0.7978846, %v2205_v21  ;;  %v2176_v40 = vmul.f32 %v2160_v45, %v6175_v62  ;;  %v2138_v63 = vmul.f32 0.5, %v6138_v47 }
 0x34f   : > { %v5273_v10 = vpop.eup %5272  ;;  %v2246_v2 = vadd.f32 1.0, %v5271_v54  ;;  %v2190_v23 = vmul.f32 %v2174_v1, %v6163_v46  ;;  %v2191_v5 = vmul.f32 %v2175_v24, %v6168_v30  ;;  %v2177_v48 = vmul.f32 %v2161_v58, %v6183_v44 }
 0x350   : > { %v5275_v16 = vpop.eup %5274  ;;  %v2247_v20 = vadd.f32 1.0, %v5273_v10  ;;  %5286 = vtanh.f32 %v2220_v53  ;;  %v2192_v59 = vmul.f32 %v2176_v40, %v6175_v62  ;;  %v2139_v52 = vmul.f32 0.5, %v6141_v15 }
 0x351   : > { %v5277_v49 = vpop.eup %5276  ;;  %v2262_v26 = vmul.f32 %v2246_v2, %v2134_v29  ;;  %v2248_v27 = vadd.f32 1.0, %v5275_v16  ;;  %5288 = vtanh.f32 %v2221_v14  ;;  %v2206_v34 = vadd.f32 %v2190_v23, %v6163_v46 }
 0x352   : > { %v5279_v28 = vpop.eup %5278  ;;  %v2263_v50 = vmul.f32 %v2247_v20, %v2135_v6  ;;  %v2249_v43 = vadd.f32 1.0, %v5277_v49  ;;  %v2207_v38 = vadd.f32 %v2191_v5, %v6168_v30  ;;  %v2208_v31 = vadd.f32 %v2192_v59, %v6175_v62 }
 0x353   : > { %v2264_v35 = vmul.f32 %v2248_v27, %v2136_v9  ;;  %v2222_v37 = vmul.f32 0.7978846, %v2206_v34  ;;  %v6195_v41 = vmul.f32 %v5279_v28, %v6089_v11  ;;  %v6198_v51 = vmul.f32 %v5279_v28, %v6091_v8  ;;  %v5281_v56 = vpop.eup %5280 }
 0x354   : > { %v2265_v36 = vmul.f32 %v2249_v43, %v2137_v25  ;;  %v2223_v19 = vmul.f32 0.7978846, %v2207_v38  ;;  %v2193_v11 = vmul.f32 %v2177_v48, %v6183_v44  ;;  %v6214_v6 = vmul.f32 %v5281_v56, %v6097_v17 }
 0x355   : > { %v6200_v57 = vpack.c.bf16 %v2264_v35, %v2262_v26  ;;  %5290 = vtanh.f32 %v2222_v37  ;;  %v2162_v8 = vmul.f32 0.044715, %v6195_v41  ;;  %v2163_v32 = vmul.f32 0.044715, %v6198_v51 }
 0x356   : > { %v6204_v29 = vpack.c.bf16 %v2265_v36, %v2263_v50  ;;  %v5283_v3 = vpop.eup %5282  ;;  %5292 = vtanh.f32 %v2223_v19  ;;  %v6217_v47 = vmul.f32 %v5281_v56, %v6099_v18  ;;  %v2209_v4 = vadd.f32 %v2193_v11, %v6183_v44 }
 0x357   : > { %2463 = vrot.lane.b32.xlu1 %v6200_v57, %s5363_s29  ;;  %v5285_v22 = vpop.eup %5284  ;;  %v2250_v7 = vadd.f32 1.0, %v5283_v3  ;;  %v2224_v42 = vmul.f32 0.7978846, %v2208_v31  ;;  %v2178_v21 = vmul.f32 %v2162_v8, %v6195_v41  ;;  %v2140_v17 = vmul.f32 0.5, %v6148_v39 }
 0x358   : > { %2465 = vrot.lane.b32.xlu0 %v6204_v29, %s5363_s29  ;;  %2356 = vmatprep.subr.bf16.mxu1 %v6204_v29  ;;  %v2141_v18 = vmul.f32 0.5, %v6151_v33  ;;  %v2179_v54 = vmul.f32 %v2163_v32, %v6198_v51  ;;  %v2251_v1 = vadd.f32 1.0, %v5285_v22  ;;  %v2225_v10 = vmul.f32 0.7978846, %v2209_v4 }
 0x359   : > { %2357 = vmatpush1.bf16.msra.mxu1 %v6200_v57  ;;  %5294 = vtanh.f32 %v2224_v42  ;;  %v2194_v2 = vmul.f32 %v2178_v21, %v6195_v41  ;;  %v2164_v16 = vmul.f32 0.044715, %v6214_v6  ;;  %v2165_v15 = vmul.f32 0.044715, %v6217_v47 }
 0x35a   : > { %v5287_v9 = vpop.eup %5286  ;;  %v2195_v24 = vmul.f32 %v2179_v54, %v6198_v51  ;;  %v2266_v39 = vmul.f32 %v2250_v7, %v2138_v63  ;;  %5296 = vtanh.f32 %v2225_v10  ;;  %v2267_v26 = vmul.f32 %v2251_v1, %v2139_v52 }
 0x35b   : > { %v5289_v53 = vpop.eup %5288  ;;  %v2252_v14 = vadd.f32 1.0, %v5287_v9  ;;  %v2210_v20 = vadd.f32 %v2194_v2, %v6195_v41  ;;  %v2180_v45 = vmul.f32 %v2164_v16, %v6214_v6  ;;  %v2181_v49 = vmul.f32 %v2165_v15, %v6217_v47 }
 0x35c   : > { %2641 = vrot.lane.b32.xlu0 %v6204_v29, %s5364_s14  ;;  %v2253_v33 = vadd.f32 1.0, %v5289_v53  ;;  %v2211_v23 = vadd.f32 %v2195_v24, %v6198_v51  ;;  %v2142_v59 = vmul.f32 0.5, %v6163_v46  ;;  %v2144_v3 = vmul.f32 0.5, %v6175_v62 }
 0x35d   : > { %v2268_v25 = vmul.f32 %v2252_v14, %v2140_v17  ;;  %v2226_v5 = vmul.f32 0.7978846, %v2210_v20  ;;  %v2196_v43 = vmul.f32 %v2180_v45, %v6214_v6  ;;  %v2197_v34 = vmul.f32 %v2181_v49, %v6217_v47 }
 0x35e   : > { %v2269_v27 = vmul.f32 %v2253_v33, %v2141_v18  ;;  %v2227_v50 = vmul.f32 0.7978846, %v2211_v23  ;;  %v2143_v8 = vmul.f32 0.5, %v6168_v30  ;;  %v2145_v32 = vmul.f32 0.5, %v6183_v44 }
 0x35f   : > { %v6239_v28 = vpack.c.bf16 %v2268_v25, %v2266_v39  ;;  %v5291_v35 = vpop.eup %5290  ;;  %5298 = vtanh.f32 %v2226_v5  ;;  %v2212_v40 = vadd.f32 %v2196_v43, %v6214_v6  ;;  %v2213_v36 = vadd.f32 %v2197_v34, %v6217_v47  ;;  %v5101_v25 = vpop.permute.xlu1 %5100 }
 0x360   : > { %2639 = vrot.lane.b32.xlu0 %v6200_v57, %s5364_s14  ;;  %v6245_v38 = vpack.c.bf16 %v2269_v27, %v2267_v26  ;;  %v5293_v58 = vpop.eup %5292  ;;  %5300 = vtanh.f32 %v2227_v50  ;;  %v2254_v37 = vadd.f32 1.0, %v5291_v35  ;;  %v2146_v9 = vmul.f32 0.5, %v6195_v41  ;;  %v5222_v41 = vld [vmem:[%s7276_s3 + $0x80] sm:$0xff]  }
 0x361   : > { %2469 = vrot.lane.b32.xlu1 %v6239_v28, %s5363_s29  ;;  %v2228_v56 = vmul.f32 0.7978846, %v2212_v40  ;;  %v2229_v19 = vmul.f32 0.7978846, %v2213_v36  ;;  %v2255_v63 = vadd.f32 1.0, %v5293_v58  ;;  %v2148_v1 = vmul.f32 0.5, %v6214_v6 }
 0x362   : > { %2358 = vmatprep.subr.bf16.mxu1 %v6245_v38  ;;  %v2270_v22 = vmul.f32 %v2254_v37, %v2142_v59  ;;  %v2147_v2 = vmul.f32 0.5, %v6198_v51  ;;  %v2149_v53 = vmul.f32 0.5, %v6217_v47  ;;  %v5223_v51 = vld [vmem:[%s7276_s3 + $0x88] sm:$0xff]   ;;  %v5224_v6 = vld [vmem:[%s7276_s3 + $0x90] sm:$0xff]   ;;  %v5225_v47 = vld [vmem:[%s7276_s3 + $0x98] sm:$0xff]   ;;  %v5102_v49 = vunpack.i.l.bf16 %v5101_v25 }
 0x363   : > { %2359 = vmatpush1.bf16.msra.mxu1 %v6239_v28  ;;  %v5295_v48 = vpop.eup %5294  ;;  %5302 = vtanh.f32 %v2228_v56  ;;  %v2271_v46 = vmul.f32 %v2255_v63, %v2143_v8  ;;  %v5106_v23 = vpop.permute.xlu1 %5105  ;;  %v5103_v58 = vunpack.i.h.bf16 %v5101_v25 }
 0x364   : > { %2471 = vrot.lane.b32.xlu0 %v6245_v38, %s5363_s29  ;;  %v2256_v11 = vadd.f32 1.0, %v5295_v48  ;;  %v5297_v31 = vpop.eup %5296  ;;  %5304 = vtanh.f32 %v2229_v19  ;;  %v5107_v48 = vunpack.i.l.bf16 %v5106_v23  ;;  %v5108_v8 = vunpack.i.h.bf16 %v5106_v23 }
 0x365   : > { %2647 = vrot.lane.b32.xlu1 %v6245_v38, %s5364_s14  ;;  %v2257_v7 = vadd.f32 1.0, %v5297_v31 }
 0x366   : > { %v2272_v4 = vmul.f32 %v2256_v11, %v2144_v3 }
 0x367   : > { %v2273_v42 = vmul.f32 %v2257_v7, %v2145_v32  ;;  %v6383_v45 = vpop.permute.xlu1 %5110  ;;  %v5226_v32 = vld [vmem:[%s7276_s3 + $0x20] sm:$0xff]  }
 0x368   : > { %2645 = vrot.lane.b32.xlu0 %v6239_v28, %s5364_s14  ;;  %v6263_v62 = vpack.c.bf16 %v2272_v4, %v2270_v22  ;;  %v5112_v11 = vunpack.i.l.bf16 %v6383_v45 }
 0x369   : > { %v5299_v21 = vpop.eup %5298  ;;  %v6265_v52 = vpack.c.bf16 %v2273_v42, %v2271_v46  ;;  %v5113_v42 = vunpack.i.h.bf16 %v6383_v45 }
 0x36a   : > { %2475 = vrot.lane.b32.xlu1 %v6263_v62, %s5363_s29  ;;  %v5301_v30 = vpop.eup %5300  ;;  %v2258_v44 = vadd.f32 1.0, %v5299_v21 }
 0x36b   : > { %2360 = vmatprep.subr.bf16.mxu1 %v6265_v52  ;;  %v2259_v18 = vadd.f32 1.0, %v5301_v30 }
 0x36c   : > { %2477 = vrot.lane.b32.xlu0 %v6265_v52, %s5363_s29  ;;  %2361 = vmatpush1.bf16.msra.mxu1 %v6263_v62  ;;  %v2274_v24 = vmul.f32 %v2258_v44, %v2146_v9 }
 0x36d   : > { %v5303_v17 = vpop.eup %5302  ;;  %v2275_v15 = vmul.f32 %v2259_v18, %v2147_v2 }
 0x36e   : > { %2653 = vrot.lane.b32.xlu1 %v6265_v52, %s5364_s14  ;;  %v5305_v54 = vpop.eup %5304  ;;  %v2260_v10 = vadd.f32 1.0, %v5303_v17 }
 0x36f   : > { %v2261_v14 = vadd.f32 1.0, %v5305_v54 }
 0x370   : > { %v2276_v16 = vmul.f32 %v2260_v10, %v2148_v1 }
 0x371   : > { %v2277_v39 = vmul.f32 %v2261_v14, %v2149_v53 }
 0x372   : > { %v6279_v33 = vpack.c.bf16 %v2276_v16, %v2274_v24  ;;  %v3799_v16 = vld [vmem:[%s7277_s4] sm:$0xff] }
 0x373   : > { %v6281_v20 = vpack.c.bf16 %v2277_v39, %v2275_v15  ;;  %v3800_v39 = vld [vmem:[%s7277_s4 + $0x8] sm:$0xff] }
 0x374   : > { %2481 = vrot.lane.b32.xlu0 %v6279_v33, %s5363_s29 }
 0x375   : > { %2362 = vmatprep.subr.bf16.mxu1 %v6281_v20  ;;  %2483 = vrot.lane.b32.xlu1 %v6281_v20, %s5363_s29 }
 0x376   : > { %2363 = vmatpush1.bf16.msra.mxu1 %v6279_v33 }
 0x378   : > { %5115 = vrot.lane.b32.xlu0 %v5362_v0, %s5364_s14 }
 0x379   : > { %2651 = vrot.lane.b32.xlu1 %v6263_v62, %s5364_s14  ;;  %4693 = vmatmul.mubr.msk.bf16.vlgmr.msra.gmra.mrb[16].mxu1 %vm469_vm0, %v5222_v41 }
 0x37a   : > { %2398 = vmatprep.mubr.bf16.mxu1 %v5362_v0 }
 0x37c   : > { %2819 = vrot.lane.b32.xlu0 %v6200_v57, %s5365_s21 }
 0x37d   : > { %2821 = vrot.lane.b32.xlu1 %v6204_v29, %s5365_s21 }
 0x380   : > { %5120 = vrot.lane.b32.xlu0 %v5362_v0, %s5365_s21 }
 0x381   : > { %3329 = vrot.lane.b32.xlu1 %v6204_v29, %s5366_s22  ;;  %4694 = vmatmul.mubr.msk.bf16.gmra.mrb[20].mxu1 %vm469_vm0, %v5223_v51  ;;  %v3801_v51 = vld [vmem:[%s7277_s4 + $0x10] sm:$0xff] }
 0x382   : > { %2408 = vmatprep.mubr.bf16.mxu1 %v5362_v0 }
 0x384   : > { %5125 = vrot.lane.b32.xlu0 %v5362_v0, %s5366_s22 }
 0x385   : > { %3327 = vrot.lane.b32.xlu1 %v6200_v57, %s5366_s22 }
 0x388   : > { %2825 = vrot.lane.b32.xlu0 %v6239_v28, %s5365_s21 }
 0x389   : > { %2827 = vrot.lane.b32.xlu1 %v6245_v38, %s5365_s21  ;;  %4695 = vmatmul.mubr.msk.bf16.gmra.mrb[24].mxu1 %vm469_vm0, %v5224_v6 }
 0x38a   : > { %2418 = vmatprep.mubr.bf16.mxu1 %v5362_v0 }
 0x38c   : > { %3335 = vrot.lane.b32.xlu0 %v6245_v38, %s5366_s22 }
 0x38d   : > { %3333 = vrot.lane.b32.xlu1 %v6239_v28, %s5366_s22 }
 0x390   : > { %2831 = vrot.lane.b32.xlu0 %v6263_v62, %s5365_s21 }
 0x391   : > { %2833 = vrot.lane.b32.xlu1 %v6265_v52, %s5365_s21  ;;  %4696 = vmatmul.mubr.msk.bf16.gmra.mrb[28].mxu1 %vm469_vm0, %v5225_v47 }
 0x392   : > { %2545 = vmatprep.mubr.bf16.mxu1 %v5362_v0 }
 0x394   : > { %2659 = vrot.lane.b32.xlu0 %v6281_v20, %s5364_s14 }
 0x395   : > { %2657 = vrot.lane.b32.xlu1 %v6279_v33, %s5364_s14 }
 0x398   : > { %5130 = vrot.lane.b32.xlu0 %v5362_v0, %s5365_s21 }
 0x399   : > { %3341 = vrot.lane.b32.xlu1 %v6265_v52, %s5366_s22 }
 0x39c   : > { %5135 = vrot.lane.b32.xlu0 %v5362_v0, %s5366_s22 }
 0x39d   : > { %3339 = vrot.lane.b32.xlu1 %v6263_v62, %s5366_s22 }
 0x3a0   : > { %2964 = vrot.lane.b32.xlu0 %v6200_v57, %s5367_s23 }
 0x3a1   : > { %2966 = vrot.lane.b32.xlu1 %v6204_v29, %s5367_s23 }
 0x3a4   : > { %5140 = vrot.lane.b32.xlu0 %v5362_v0, %s5367_s23 }
 0x3a5   : > { %3474 = vrot.lane.b32.xlu1 %v6200_v57, %s5368_s24 }
 0x3a8   : > { %3476 = vrot.lane.b32.xlu0 %v6204_v29, %s5368_s24 }
 0x3a9   : > { %5145 = vrot.lane.b32.xlu1 %v5362_v0, %s5368_s24 }
 0x3ac   : > { %2970 = vrot.lane.b32.xlu0 %v6239_v28, %s5367_s23 }
 0x3ad   : > { %2972 = vrot.lane.b32.xlu1 %v6245_v38, %s5367_s23 }
 0x3b0   : > { %2837 = vrot.lane.b32.xlu0 %v6279_v33, %s5365_s21 }
 0x3b1   : > { %2839 = vrot.lane.b32.xlu1 %v6281_v20, %s5365_s21  ;;  %s317_s21 = scalar_lea.vmem %s7278_s5, %s4526_s20 }
 0x3b4   : > { %3347 = vrot.lane.b32.xlu0 %v6281_v20, %s5366_s22 }
 0x3b5   : > { %3345 = vrot.lane.b32.xlu1 %v6279_v33, %s5366_s22 }
 0x3b8   : > { %3480 = vrot.lane.b32.xlu0 %v6239_v28, %s5368_s24 }
 0x3b9   : > { %3482 = vrot.lane.b32.xlu1 %v6245_v38, %s5368_s24 }
 0x3bc   : > { %2976 = vrot.lane.b32.xlu0 %v6263_v62, %s5367_s23 }
 0x3bd   : > { %2978 = vrot.lane.b32.xlu1 %v6265_v52, %s5367_s23 }
 0x3c0   : > { %5150 = vrot.lane.b32.xlu0 %v5362_v0, %s5367_s23 }
 0x3c1   : > { %3486 = vrot.lane.b32.xlu1 %v6263_v62, %s5368_s24 }
 0x3c4   : > { %3488 = vrot.lane.b32.xlu0 %v6265_v52, %s5368_s24 }
 0x3c5   : > { %5155 = vrot.lane.b32.xlu1 %v5362_v0, %s5368_s24 }
 0x3c8   : > { %3118 = vrot.lane.b32.xlu0 %v6204_v29, %s5369_s25 }
 0x3c9   : > { %v2464_v26 = vpop.permute.xlu1 %2463  ;;  %5160 = vrot.lane.b32.xlu1 %v5362_v0, %s5369_s25 }
 0x3ca   : > { %v2466_v27 = vpop.permute.xlu0 %2465  ;;  %v2485_v5 = vsel %vm611_vm1, %v5102_v49, %v2464_v26  ;;  %v3803_v49 = vld [vmem:[%s7277_s4 + $0x20] sm:$0xff] }
 0x3cb   : > { %v2486_v50 = vsel %vm611_vm1, %v2464_v26, %v2466_v27  ;;  %v3804_v27 = vld [vmem:[%s7277_s4 + $0x28] sm:$0xff] }
 0x3cc   : > { %2513 = vmatprep.subr.bf16.mxu1 %v2486_v50  ;;  %3116 = vrot.lane.b32.xlu0 %v6200_v57, %s5369_s25 }
 0x3cd   : > { %2514 = vmatpush1.bf16.msra.mxu1 %v2485_v5  ;;  %3628 = vrot.lane.b32.xlu1 %v6204_v29, %s5370_s26  ;;  %v5229_v5 = vld [vmem:[%s7276_s3 + $0x38] sm:$0xff]  }
 0x3ce   : > { %v2642_v43 = vpop.permute.xlu0 %2641 }
 0x3cf   : > { %v2664_v4 = vsel %vm790_vm2, %v2642_v43, %v5112_v11 }
 0x3d0   : > { %2982 = vrot.lane.b32.xlu0 %v6279_v33, %s5367_s23 }
 0x3d1   : > { %2984 = vrot.lane.b32.xlu1 %v6281_v20, %s5367_s23 }
 0x3d2   : > { %v2640_v34 = vpop.permute.xlu0 %2639 }
 0x3d3   : > { %v2470_v35 = vpop.permute.xlu1 %2469  ;;  %v2663_v21 = vsel %vm790_vm2, %v2640_v34, %v2642_v43  ;;  %v3805_v43 = vld [vmem:[%s7277_s4 + $0x30] sm:$0xff] }
 0x3d4   : > { %3492 = vrot.lane.b32.xlu0 %v6279_v33, %s5368_s24  ;;  %v2487_v29 = vsel %vm611_vm1, %v5103_v58, %v2470_v35 }
 0x3d5   : > { %3494 = vrot.lane.b32.xlu1 %v6281_v20, %s5368_s24 }
 0x3d6   : > { %v2472_v40 = vpop.permute.xlu0 %2471 }
 0x3d7   : > { %v2488_v36 = vsel %vm611_vm1, %v2470_v35, %v2472_v40  ;;  %v2648_v37 = vpop.permute.xlu1 %2647 }
 0x3d8   : > { %2515 = vmatprep.subr.bf16.mxu1 %v2488_v36  ;;  %5165 = vrot.lane.b32.xlu0 %v5362_v0, %s5370_s26  ;;  %v2666_v44 = vsel %vm790_vm2, %v2648_v37, %v5113_v42  ;;  %v3806_v36 = vld [vmem:[%s7277_s4 + $0x38] sm:$0xff] }
 0x3d9   : > { %2516 = vmatpush1.bf16.msra.mxu1 %v2487_v29  ;;  %3626 = vrot.lane.b32.xlu1 %v6200_v57, %s5370_s26 }
 0x3da   : > { %v2646_v56 = vpop.permute.xlu0 %2645 }
 0x3db   : > { %v2665_v54 = vsel %vm790_vm2, %v2646_v56, %v2648_v37 }
 0x3dc   : > { %v2476_v19 = vpop.permute.xlu1 %2475  ;;  %3124 = vrot.lane.b32.xlu0 %v6245_v38, %s5369_s25 }
 0x3dd   : > { %3122 = vrot.lane.b32.xlu1 %v6239_v28, %s5369_s25  ;;  %v2489_v3 = vsel %vm611_vm1, %v5107_v48, %v2476_v19 }
 0x3de   : > { %v2478_v59 = vpop.permute.xlu0 %2477 }
 0x3df   : > { %v2490_v63 = vsel %vm611_vm1, %v2476_v19, %v2478_v59  ;;  %v5230_v59 = vld [vmem:[%s7276_s3 + $0xe0] sm:$0xff]  }
 0x3e0   : > { %2517 = vmatprep.subr.bf16.mxu1 %v2490_v63  ;;  %3634 = vrot.lane.b32.xlu0 %v6245_v38, %s5370_s26  ;;  %v2654_v57 = vpop.permute.xlu1 %2653 }
 0x3e1   : > { %2518 = vmatpush1.bf16.msra.mxu1 %v2489_v3  ;;  %3632 = vrot.lane.b32.xlu1 %v6239_v28, %s5370_s26 }
 0x3e4   : > { %3130 = vrot.lane.b32.xlu0 %v6265_v52, %s5369_s25 }
 0x3e5   : > { %5170 = vrot.lane.b32.xlu1 %v5362_v0, %s5369_s25 }
 0x3e6   : > { %v2482_v31 = vpop.permute.xlu0 %2481 }
 0x3e7   : > { %v2484_v22 = vpop.permute.xlu1 %2483  ;;  %v2491_v28 = vsel %vm611_vm1, %v5108_v8, %v2482_v31 }
 0x3e8   : > { %3128 = vrot.lane.b32.xlu0 %v6263_v62, %s5369_s25  ;;  %v2492_v38 = vsel %vm611_vm1, %v2482_v31, %v2484_v22 }
 0x3e9   : > { %3640 = vrot.lane.b32.xlu1 %v6265_v52, %s5370_s26  ;;  %2519 = vmatprep.subr.bf16.mxu1 %v2492_v38 }
 0x3ea   : > { %v6439_v7 = vpop.permute.xlu0 %5115  ;;  %2520 = vmatpush1.bf16.msra.mxu1 %v2491_v28 }
 0x3eb   : > { %v2652_v46 = vpop.permute.xlu1 %2651  ;;  %2691 = vmatprep.subr.bf16.mxu1 %v2664_v4  ;;  %v5117_v52 = vunpack.i.l.bf16 %v6439_v7  ;;  %v5118_v58 = vunpack.i.h.bf16 %v6439_v7 }
 0x3ec   : > { %3642 = vrot.lane.b32.xlu0 %v5362_v0, %s5370_s26  ;;  %v2667_v53 = vsel %vm790_vm2, %v2652_v46, %v2654_v57  ;;  %v5231_v46 = vld [vmem:[%s7276_s3 + $0xe8] sm:$0xff]  }
 0x3ed   : > { %3638 = vrot.lane.b32.xlu1 %v6263_v62, %s5370_s26  ;;  %4701 = vmatmul.mubr.msk.bf16.vlgmr.msra.gmra.mrb[16].mxu1 %vm469_vm0, %v5226_v32  ;;  %v5227_v62 = vld [vmem:[%s7276_s3 + $0x28] sm:$0xff]   ;;  %v2668_v1 = vsel %vm790_vm2, %v2654_v57, %v5117_v52 }
 0x3ee   : > { %v2820_v30 = vpop.permute.xlu0 %2819  ;;  %2692 = vmatpush1.bf16.msra.mxu1 %v2663_v21  ;;  %2555 = vmatprep.mubr.bf16.mxu1 %v5362_v0 }
 0x3ef   : > { %v2822_v17 = vpop.permute.xlu1 %2821  ;;  %2693 = vmatprep.subr.bf16.mxu1 %v2666_v44 }
 0x3f0   : > { %3136 = vrot.lane.b32.xlu0 %v6281_v20, %s5369_s25  ;;  %v2842_v18 = vsel %vm969_vm3, %v2820_v30, %v2822_v17  ;;  %v5232_v17 = vld [vmem:[%s7276_s3 + $0xf0] sm:$0xff]  }
 0x3f1   : > { %3134 = vrot.lane.b32.xlu1 %v6279_v33, %s5369_s25  ;;  %2869 = vmatprep.subr.bf16.mxu0 %v2842_v18 }
 0x3f2   : > { %v5121_v9 = vpop.permute.xlu0 %5120  ;;  %2694 = vmatpush1.bf16.msra.mxu1 %v2665_v54 }
 0x3f3   : > { %v5122_v10 = vunpack.i.l.bf16 %v5121_v9  ;;  %v6462_v2 = vpop.permute.xlu1 %3329  ;;  %2695 = vmatprep.subr.bf16.mxu1 %v2668_v1  ;;  %v5123_v47 = vunpack.i.h.bf16 %v5121_v9  ;;  %v5233_v1 = vld [vmem:[%s7276_s3 + $0xf8] sm:$0xff]  }
 0x3f4   : > { %3646 = vrot.lane.b32.xlu0 %v6281_v20, %s5370_s26  ;;  %v5228_v20 = vld [vmem:[%s7276_s3 + $0x30] sm:$0xff]  }
 0x3f5   : > { %3648 = vrot.lane.b32.xlu1 %v5362_v0, %s5370_s26  ;;  %4702 = vmatmul.mubr.msk.bf16.gmra.mrb[20].mxu1 %vm469_vm0, %v5227_v62  ;;  %v2841_v14 = vsel %vm969_vm3, %v5122_v10, %v2820_v30 }
 0x3f6   : > { %v6471_v24 = vpop.permute.xlu0 %5125  ;;  %2870 = vmatpush1.bf16.msra.mxu0 %v2841_v14  ;;  %2696 = vmatpush1.bf16.msra.mxu1 %v2667_v53 }
 0x3f7   : > { %v3328_v15 = vpop.permute.xlu1 %3327  ;;  %2565 = vmatprep.mubr.bf16.mxu1 %v5362_v0  ;;  %v5127_v40 = vunpack.i.l.bf16 %v6471_v24  ;;  %v5128_v11 = vunpack.i.h.bf16 %v6471_v24 }
 0x3f8   : > { %3644 = vrot.lane.b32.xlu0 %v6279_v33, %s5370_s26  ;;  %v3802_v33 = vld [vmem:[%s7277_s4 + $0x18] sm:$0xff]  ;;  %v3351_v31 = vsel %vm1486_vm4, %v3328_v15, %v6462_v2 }
 0x3f9   : > { %3809 = vperm.xlu1 %5097, %v3799_v16   ;;  %v3352_v48 = vsel %vm1486_vm4, %v6462_v2, %v5127_v40 }
 0x3fa   : > { %v2826_v41 = vpop.permute.xlu0 %2825 }
 0x3fb   : > { %v2828_v6 = vpop.permute.xlu1 %2827  ;;  %v2843_v45 = vsel %vm969_vm3, %v5123_v47, %v2826_v41 }
 0x3fc   : > { %3814 = vperm.xlu0 %5098, %v3800_v39   ;;  %v2844_v25 = vsel %vm969_vm3, %v2826_v41, %v2828_v6  ;;  %v5234_v39 = vld [vmem:[%s7276_s3 + $0x60] sm:$0xff]  }
 0x3fd   : > { %3819 = vperm.xlu1 %5097, %v3801_v51   ;;  %4703 = vmatmul.mubr.msk.bf16.gmra.mrb[24].mxu1 %vm469_vm0, %v5228_v20 }
 0x3fe   : > { %v3336_v23 = vpop.permute.xlu0 %3335  ;;  %2871 = vmatprep.subr.bf16.mxu0 %v2844_v25  ;;  %2575 = vmatprep.mubr.bf16.mxu1 %v5362_v0 }
 0x3ff   : > { %2872 = vmatpush1.bf16.msra.mxu0 %v2843_v45  ;;  %v3334_v26 = vpop.permute.xlu1 %3333  ;;  %v3354_v38 = vsel %vm1486_vm4, %v3336_v23, %v5128_v11  ;;  %v5235_v45 = vld [vmem:[%s7276_s3 + $0xa0] sm:$0xff]  }
 0x400   : > { %3824 = vperm.xlu0 %5098, %v3802_v33   ;;  %v3353_v7 = vsel %vm1486_vm4, %v3334_v26, %v3336_v23 }
 0x401   : > { %3829 = vperm.xlu1 %5097, %v3803_v49  }
 0x402   : > { %v2832_v50 = vpop.permute.xlu0 %2831 }
 0x403   : > { %v2834_v34 = vpop.permute.xlu1 %2833 }
 0x404   : > { %3834 = vperm.xlu0 %5098, %v3804_v27   ;;  %v2846_v35 = vsel %vm969_vm3, %v2832_v50, %v2834_v34 }
 0x405   : > { %3839 = vperm.xlu1 %5097, %v3805_v43   ;;  %4704 = vmatmul.mubr.msk.bf16.gmra.mrb[28].mxu1 %vm469_vm0, %v5229_v5 }
 0x406   : > { %v2660_v37 = vpop.permute.xlu0 %2659  ;;  %2873 = vmatprep.subr.bf16.mxu0 %v2846_v35  ;;  %2723 = vmatprep.mubr.bf16.mxu1 %v5362_v0  ;;  %v5236_v35 = vld [vmem:[%s7276_s3 + $0x68] sm:$0xff]  }
 0x407   : > { %v2658_v29 = vpop.permute.xlu1 %2657  ;;  %v2670_v56 = vsel %vm790_vm2, %v2660_v37, %v5118_v58 }
 0x408   : > { %v2669_v19 = vsel %vm790_vm2, %v2658_v29, %v2660_v37  ;;  %3844 = vperm.xlu0 %5098, %v3806_v36   ;;  %2697 = vmatprep.subr.bf16.mxu1 %v2670_v56  ;;  %v5237_v56 = vld [vmem:[%s7276_s3 + $0xa8] sm:$0xff]  }
 0x409   : > { %2698 = vmatpush1.bf16.msra.mxu1 %v2669_v19 }
 0x40a   : > { %v5131_v63 = vpop.permute.xlu0 %5130  ;;  %3379 = vmatprep.subr.bf16.mxu1 %v3352_v48 }
 0x40b   : > { %v5132_v3 = vunpack.i.l.bf16 %v5131_v63  ;;  %v3342_v57 = vpop.permute.xlu1 %3341  ;;  %v5133_v2 = vunpack.i.h.bf16 %v5131_v63 }
 0x40d   : > { %4717 = vmatmul.mubr.msk.bf16.vlgmr.msra.gmra.mrb[16].mxu1 %vm469_vm0, %v5230_v59  ;;  %v2845_v8 = vsel %vm969_vm3, %v5132_v3, %v2832_v50  ;;  %v5238_v3 = vld [vmem:[%s7276_s3 + $0x70] sm:$0xff]  }
 0x40e   : > { %v5136_v22 = vpop.permute.xlu0 %5135  ;;  %2874 = vmatpush1.bf16.msra.mxu0 %v2845_v8  ;;  %3380 = vmatpush1.bf16.msra.mxu1 %v3351_v31 }
 0x40f   : > { %v5137_v28 = vunpack.i.l.bf16 %v5136_v22  ;;  %3381 = vmatprep.subr.bf16.mxu1 %v3354_v38  ;;  %v3340_v32 = vpop.permute.xlu1 %3339  ;;  %2733 = vmatprep.mubr.bf16.mxu1 %v5362_v0  ;;  %v5138_v24 = vunpack.i.h.bf16 %v5136_v22  ;;  %v5239_v22 = vld [vmem:[%s7276_s3 + $0xb0] sm:$0xff]  }
 0x410   : > { %v3355_v52 = vsel %vm1486_vm4, %v3340_v32, %v3342_v57 }
 0x411   : > { %v3356_v4 = vsel %vm1486_vm4, %v3342_v57, %v5137_v28 }
 0x412   : > { %v2965_v42 = vpop.permute.xlu0 %2964  ;;  %3382 = vmatpush1.bf16.msra.mxu1 %v3353_v7  ;;  %v5240_v7 = vld [vmem:[%s7276_s3 + $0x78] sm:$0xff]  }
 0x413   : > { %3383 = vmatprep.subr.bf16.mxu1 %v3356_v4  ;;  %v2967_v21 = vpop.permute.xlu1 %2966 }
 0x414   : > { %v2987_v41 = vsel %vm1115_vm5, %v2965_v42, %v2967_v21 }
 0x415   : > { %4718 = vmatmul.mubr.msk.bf16.gmra.mrb[20].mxu1 %vm469_vm0, %v5231_v46 }
 0x416   : > { %v5141_v30 = vpop.permute.xlu0 %5140  ;;  %3384 = vmatpush1.bf16.msra.mxu1 %v3355_v52  ;;  %2743 = vmatprep.mubr.bf16.mxu1 %v5362_v0 }
 0x417   : > { %v3475_v44 = vpop.permute.xlu1 %3474  ;;  %v5142_v16 = vunpack.i.l.bf16 %v5141_v30  ;;  %v5143_v27 = vunpack.i.h.bf16 %v5141_v30 }
 0x419   : > { %v2986_v33 = vsel %vm1115_vm5, %v5142_v16, %v2965_v42  ;;  %v5241_v42 = vld [vmem:[%s7276_s3 + $0xb8] sm:$0xff]  }
 0x41a   : > { %v3477_v18 = vpop.permute.xlu0 %3476 }
 0x41b   : > { %v5146_v54 = vpop.permute.xlu1 %5145  ;;  %v3497_v23 = vsel %vm1632_vm6, %v3475_v44, %v3477_v18 }
 0x41c   : > { %v5147_v25 = vunpack.i.l.bf16 %v5146_v54  ;;  %v5148_v40 = vunpack.i.h.bf16 %v5146_v54  ;;  %v5242_v54 = vld [vmem:[%s7276_s3] sm:$0xff]  }
 0x41d   : > { %4719 = vmatmul.mubr.msk.bf16.gmra.mrb[24].mxu1 %vm469_vm0, %v5232_v17 }
 0x41e   : > { %v2971_v62 = vpop.permute.xlu0 %2970  ;;  %2753 = vmatprep.mubr.bf16.mxu1 %v5362_v0  ;;  %v3496_v34 = vsel %vm1632_vm6, %v5147_v25, %v3475_v44 }
 0x41f   : > { %v2973_v9 = vpop.permute.xlu1 %2972  ;;  %v2988_v43 = vsel %vm1115_vm5, %v5143_v27, %v2971_v62 }
 0x420   : > { %v2989_v26 = vsel %vm1115_vm5, %v2971_v62, %v2973_v9 }
 0x422   : > { %v2838_v10 = vpop.permute.xlu0 %2837 }
 0x423   : > { %v2840_v53 = vpop.permute.xlu1 %2839  ;;  %v2847_v15 = vsel %vm969_vm3, %v5133_v2, %v2838_v10 }
 0x424   : > { %v2848_v14 = vsel %vm969_vm3, %v2838_v10, %v2840_v53 }
 0x425   : > { %4720 = vmatmul.mubr.msk.bf16.gmra.mrb[28].mxu1 %vm469_vm0, %v5233_v1  ;;  %2875 = vmatprep.subr.bf16.mxu0 %v2848_v14 }
 0x426   : > { %v3348_v20 = vpop.permute.xlu0 %3347  ;;  %2876 = vmatpush1.bf16.msra.mxu0 %v2847_v15  ;;  %3411 = vmatprep.mubr.bf16.mxu1 %v5362_v0 }
 0x427   : > { %v3346_v51 = vpop.permute.xlu1 %3345  ;;  %3014 = vmatprep.subr.bf16.mxu0 %v2987_v41  ;;  %v3358_v6 = vsel %vm1486_vm4, %v3348_v20, %v5138_v24  ;;  %v5243_v24 = vld [vmem:[%s7276_s3 + $0x40] sm:$0xff]  }
 0x428   : > { %v3357_v47 = vsel %vm1486_vm4, %v3346_v51, %v3348_v20  ;;  %3385 = vmatprep.subr.bf16.mxu1 %v3358_v6  ;;  %v5244_v6 = vld [vmem:[%s7276_s3 + $0x8] sm:$0xff]  }
 0x429   : > { %4733 = vmatmul.mubr.msk.bf16.vlgmr.msra.gmra.mrb[32].mxu0 %vm469_vm0, %v5234_v39  ;;  %3386 = vmatpush1.bf16.msra.mxu1 %v3357_v47 }
 0x42a   : > { %v3481_v49 = vpop.permute.xlu0 %3480  ;;  %3015 = vmatpush1.bf16.msra.mxu0 %v2986_v33  ;;  %3524 = vmatprep.subr.bf16.mxu1 %v3497_v23 }
 0x42b   : > { %v3483_v5 = vpop.permute.xlu1 %3482  ;;  %3016 = vmatprep.subr.bf16.mxu0 %v2989_v26  ;;  %2911 = vmatprep.mubr.bf16.mxu0 %v5362_v0  ;;  %v3498_v29 = vsel %vm1632_vm6, %v5148_v40, %v3481_v49  ;;  %v5245_v26 = vld [vmem:[%s7276_s3 + $0x48] sm:$0xff]   ;;  %v4187_v40 = vshrl.u32 %v324_v55, 7 }
 0x42c   : > { %v3499_v50 = vsel %vm1632_vm6, %v3481_v49, %v3483_v5 }
 0x42d   : > { %4781 = vmatmul.mubr.msk.bf16.vlgmr.msra.gmra.mrb[32].mxu1 %vm469_vm0, %v5235_v45  ;;  %v4192_v55 = vsub.s32 2, %v4187_v40 }
 0x42e   : > { %v2977_v58 = vpop.permute.xlu0 %2976  ;;  %3525 = vmatpush1.bf16.msra.mxu1 %v3496_v34  ;;  %3017 = vmatpush1.bf16.msra.mxu0 %v2988_v43  ;;  %v5246_v43 = vld [vmem:[%s7276_s3 + $0x10] sm:$0xff]  }
 0x42f   : > { %3526 = vmatprep.subr.bf16.mxu1 %v3499_v50  ;;  %v2979_v36 = vpop.permute.xlu1 %2978  ;;  %3421 = vmatprep.mubr.bf16.mxu1 %v5362_v0 }
 0x430   : > { %v2991_v37 = vsel %vm1115_vm5, %v2977_v58, %v2979_v36  ;;  %v4135_v36 = vld [vmem:[%s317_s21] sm:$0x3] }
 0x431   : > { %4734 = vmatmul.mubr.msk.bf16.gmra.mrb[36].mxu0 %vm469_vm0, %v5236_v35  ;;  %3018 = vmatprep.subr.bf16.mxu0 %v2991_v37 }
 0x432   : > { %v5151_v19 = vpop.permute.xlu0 %5150  ;;  %3527 = vmatpush1.bf16.msra.mxu1 %v3498_v29  ;;  %2921 = vmatprep.mubr.bf16.mxu0 %v5362_v0 }
 0x433   : > { %v5152_v48 = vunpack.i.l.bf16 %v5151_v19  ;;  %v3487_v59 = vpop.permute.xlu1 %3486  ;;  %v5153_v30 = vunpack.i.h.bf16 %v5151_v19 }
 0x435   : > { %v2990_v63 = vsel %vm1115_vm5, %v5152_v48, %v2977_v58  ;;  %4782 = vmatmul.mubr.msk.bf16.gmra.mrb[36].mxu1 %vm469_vm0, %v5237_v56  ;;  %v5247_v56 = vld [vmem:[%s7276_s3 + $0x50] sm:$0xff]  }
 0x436   : > { %v3489_v57 = vpop.permute.xlu0 %3488  ;;  %3019 = vmatpush1.bf16.msra.mxu0 %v2990_v63  ;;  %3431 = vmatprep.mubr.bf16.mxu1 %v5362_v0  ;;  %v4188_v63 = vsub.s32 0, %v4187_v40  ;;  %v5253_v40 = vld [vmem:[%s7276_s3 + $0x108] sm:$0xff]  }
 0x437   : > { %v5156_v11 = vpop.permute.xlu1 %5155  ;;  %v3501_v31 = vsel %vm1632_vm6, %v3487_v59, %v3489_v57 }
 0x438   : > { %v5157_v8 = vunpack.i.l.bf16 %v5156_v11  ;;  %3528 = vmatprep.subr.bf16.mxu1 %v3501_v31  ;;  %v5158_v1 = vunpack.i.h.bf16 %v5156_v11 }
 0x439   : > { %4735 = vmatmul.mubr.msk.bf16.gmra.mrb[40].mxu0 %vm469_vm0, %v5238_v3  ;;  %v5248_v3 = vld [vmem:[%s7276_s3 + $0x18] sm:$0xff]  }
 0x43a   : > { %v3119_v38 = vpop.permute.xlu0 %3118  ;;  %v3500_v28 = vsel %vm1632_vm6, %v5157_v8, %v3487_v59  ;;  %2931 = vmatprep.mubr.bf16.mxu0 %v5362_v0  ;;  %v4136_v59 = vunpack.c.l.bf16 %v4135_v36 }
 0x43b   : > { %v5161_v32 = vpop.permute.xlu1 %5160  ;;  %3529 = vmatpush1.bf16.msra.mxu1 %v3500_v28 }
 0x43c   : > { %v5162_v21 = vunpack.i.l.bf16 %v5161_v32  ;;  %v5163_v41 = vunpack.i.h.bf16 %v5161_v32 }
 0x43d   : > { %4783 = vmatmul.mubr.msk.bf16.gmra.mrb[40].mxu1 %vm469_vm0, %v5239_v22  ;;  %v4189_v22 = vrot.slane %v4136_v59, %v4188_v63 }
 0x43e   : > { %v3117_v4 = vpop.permute.xlu0 %3116  ;;  %3441 = vmatprep.mubr.bf16.mxu1 %v5362_v0  ;;  %v3141_v9 = vsel %vm1270_vm7, %v3119_v38, %v5162_v21 }
 0x43f   : > { %v3629_v46 = vpop.permute.xlu1 %3628  ;;  %v3140_v53 = vsel %vm1270_vm7, %v3117_v4, %v3119_v38  ;;  %v4193_v38 = vrot.slane %v4136_v59, %v4192_v55  ;;  %v6664_v21 = vrot.slane %v4189_v22, %v4188_v63  ;;  %v5256_v59 = vld [vmem:[%s7276_s3 + $0xd8] sm:$0xff]   ;;  %v4142_v55 = vld [vmem:[%s7279_s6 + $0x28] sm:$0xff] }
 0x441   : > { %4736 = vmatmul.mubr.msk.bf16.gmra.mrb[44].mxu0 %vm469_vm0, %v5240_v7  ;;  %v5249_v7 = vld [vmem:[%s7276_s3 + $0x58] sm:$0xff]  }
 0x442   : > { %v2983_v52 = vpop.permute.xlu0 %2982  ;;  %3046 = vmatprep.mubr.bf16.mxu0 %v5362_v0 }
 0x443   : > { %v2985_v44 = vpop.permute.xlu1 %2984  ;;  %v2992_v18 = vsel %vm1115_vm5, %v5153_v30, %v2983_v52  ;;  %v5250_v30 = vld [vmem:[%s7276_s3 + $0xc0] sm:$0xff]  }
 0x444   : > { %v2993_v17 = vsel %vm1115_vm5, %v2983_v52, %v2985_v44  ;;  %v6666_v52 = vrot.slane %v4193_v38, %v4188_v63  ;;  %v5257_v63 = vld [vmem:[%s7276_s3 + $0x118] sm:$0xff]  }
 0x445   : > { %3020 = vmatprep.subr.bf16.mxu0 %v2993_v17  ;;  %4784 = vmatmul.mubr.msk.bf16.gmra.mrb[44].mxu1 %vm469_vm0, %v5241_v42  ;;  %v4138_v17 = vld [vmem:[%s7279_s6 + $0x8] sm:$0xff] }
 0x446   : > { %v3493_v62 = vpop.permute.xlu0 %3492  ;;  %3021 = vmatpush1.bf16.msra.mxu0 %v2992_v18  ;;  %3556 = vmatprep.mubr.bf16.mxu1 %v5362_v0  ;;  %v4137_v18 = vld [vmem:[%s7279_s6] sm:$0xff] }
 0x447   : > { %v3495_v10 = vpop.permute.xlu1 %3494  ;;  %3168 = vmatprep.subr.bf16.mxu0 %v3141_v9  ;;  %v3502_v14 = vsel %vm1632_vm6, %v5158_v1, %v3493_v62  ;;  %v4156_v9 = vunpack.c.h.bf16 %v4138_v17  ;;  %v4153_v1 = vunpack.c.l.bf16 %v4137_v18 }
 0x448   : > { %v3503_v2 = vsel %vm1632_vm6, %v3493_v62, %v3495_v10  ;;  %v4155_v62 = vunpack.c.l.bf16 %v4138_v17  ;;  %v4154_v10 = vunpack.c.h.bf16 %v4137_v18 }
 0x449   : > { %4741 = vmatmul.mubr.msk.bf16.vlgmr.msra.gmra.mrb[32].mxu0 %vm469_vm0, %v5242_v54  ;;  %3530 = vmatprep.subr.bf16.mxu1 %v3503_v2 }
 0x44a   : > { %v5166_v16 = vpop.permute.xlu0 %5165  ;;  %3169 = vmatpush1.bf16.msra.mxu0 %v3140_v53  ;;  %3531 = vmatpush1.bf16.msra.mxu1 %v3502_v14  ;;  %v4206_v53 = vmul.f32 %v6664_v21, %v4155_v62  ;;  %v4207_v14 = vmul.f32 %v6666_v52, %v4156_v9  ;;  %v4145_v62 = vld [vmem:[%s7279_s6 + $0x40] sm:$0xff] }
 0x44b   : > { %v5167_v15 = vunpack.i.l.bf16 %v5166_v16  ;;  %v3627_v39 = vpop.permute.xlu1 %3626  ;;  %3056 = vmatprep.mubr.bf16.mxu0 %v5362_v0  ;;  %v5168_v45 = vunpack.i.h.bf16 %v5166_v16 }
 0x44c   : > { %v3650_v20 = vsel %vm1787_vm8, %v3627_v39, %v3629_v46  ;;  %v4139_v39 = vld [vmem:[%s7279_s6 + $0x10] sm:$0xff] }
 0x44d   : > { %v3651_v51 = vsel %vm1787_vm8, %v3629_v46, %v5167_v15  ;;  %4789 = vmatmul.mubr.msk.bf16.vlgmr.msra.gmra.mrb[32].mxu1 %vm469_vm0, %v5243_v24  ;;  %v4204_v24 = vmul.f32 %v6664_v21, %v4153_v1  ;;  %v4205_v15 = vmul.f32 %v6666_v52, %v4154_v10  ;;  %v4169_v10 = vunpack.c.l.bf16 %v4145_v62 }
 0x44e   : > { %v3125_v47 = vpop.permute.xlu0 %3124  ;;  %3678 = vmatprep.subr.bf16.mxu1 %v3651_v51  ;;  %3566 = vmatprep.mubr.bf16.mxu1 %v5362_v0  ;;  %v4239_v51 = vadd.f32 %v4207_v14, %v4206_v53 }
 0x44f   : > { %3679 = vmatpush1.bf16.msra.mxu1 %v3650_v20  ;;  %v3123_v25 = vpop.permute.xlu1 %3122  ;;  %v3143_v33 = vsel %vm1270_vm7, %v3125_v47, %v5163_v41  ;;  %v5251_v41 = vld [vmem:[%s7276_s3 + $0x100] sm:$0xff]   ;;  %v4220_v14 = vmul.f32 %v6664_v21, %v4169_v10 }
 0x450   : > { %v3142_v23 = vsel %vm1270_vm7, %v3123_v25, %v3125_v47  ;;  %3170 = vmatprep.subr.bf16.mxu0 %v3143_v33  ;;  %v4158_v47 = vunpack.c.h.bf16 %v4139_v39  ;;  %v4236_v25 = vadd.f32 %v4205_v15, %v4204_v24  ;;  %v5252_v33 = vld [vmem:[%s7276_s3 + $0xc8] sm:$0xff]   ;;  %4240 = vadd.xlane.f32.xlu1 %v4239_v51 }
 0x451   : > { %4742 = vmatmul.mubr.msk.bf16.gmra.mrb[36].mxu0 %vm469_vm0, %v5244_v6  ;;  %v4157_v6 = vunpack.c.l.bf16 %v4139_v39 }
 0x452   : > { %v3635_v49 = vpop.permute.xlu0 %3634  ;;  %3171 = vmatpush1.bf16.msra.mxu0 %v3142_v23  ;;  %3066 = vmatprep.mubr.bf16.mxu0 %v5362_v0 }
 0x453   : > { %v3633_v27 = vpop.permute.xlu1 %3632  ;;  %v3653_v5 = vsel %vm1787_vm8, %v3635_v49, %v5168_v45  ;;  %v4208_v23 = vmul.f32 %v6664_v21, %v4157_v6  ;;  %v4209_v45 = vmul.f32 %v6666_v52, %v4158_v47  ;;  %4237 = vadd.xlane.f32.xlu0 %v4236_v25 }
 0x454   : > { %v3652_v50 = vsel %vm1787_vm8, %v3633_v27, %v3635_v49  ;;  %3680 = vmatprep.subr.bf16.mxu1 %v3653_v5  ;;  %v4141_v49 = vld [vmem:[%s7279_s6 + $0x20] sm:$0xff] }
 0x455   : > { %3681 = vmatpush1.bf16.msra.mxu1 %v3652_v50  ;;  %v4161_v27 = vunpack.c.l.bf16 %v4141_v49  ;;  %v4162_v5 = vunpack.c.h.bf16 %v4141_v49 }
 0x456   : > { %v3131_v34 = vpop.permute.xlu0 %3130  ;;  %4790 = vmatmul.mubr.msk.bf16.gmra.mrb[36].mxu1 %vm469_vm0, %v5245_v26  ;;  %v4242_v26 = vadd.f32 %v4209_v45, %v4208_v23 }
 0x457   : > { %v5171_v35 = vpop.permute.xlu1 %5170  ;;  %3576 = vmatprep.mubr.bf16.mxu1 %v5362_v0  ;;  %v4212_v50 = vmul.f32 %v6664_v21, %v4161_v27 }
 0x458   : > { %v5172_v58 = vunpack.i.l.bf16 %v5171_v35  ;;  %v5173_v28 = vunpack.i.h.bf16 %v5171_v35  ;;  %4243 = vadd.xlane.f32.xlu0 %v4242_v26 }
 0x459   : > { %4743 = vmatmul.mubr.msk.bf16.gmra.mrb[40].mxu0 %vm469_vm0, %v5246_v43  ;;  %v4213_v43 = vmul.f32 %v6666_v52, %v4162_v5 }
 0x45a   : > { %v3129_v37 = vpop.permute.xlu0 %3128  ;;  %v3145_v29 = vsel %vm1270_vm7, %v3131_v34, %v5172_v58  ;;  %3076 = vmatprep.mubr.bf16.mxu0 %v5362_v0 }
 0x45b   : > { %v3144_v19 = vsel %vm1270_vm7, %v3129_v37, %v3131_v34  ;;  %v3641_v48 = vpop.permute.xlu1 %3640  ;;  %3172 = vmatprep.subr.bf16.mxu0 %v3145_v29  ;;  %v4140_v34 = vld [vmem:[%s7279_s6 + $0x18] sm:$0xff]  ;;  %v4248_v36 = vadd.f32 %v4213_v43, %v4212_v50 }
 0x45c   : > { %3173 = vmatpush1.bf16.msra.mxu0 %v3144_v19  ;;  %v4159_v35 = vunpack.c.l.bf16 %v4140_v34  ;;  %v4160_v58 = vunpack.c.h.bf16 %v4140_v34 }
 0x45d   : > { %4249 = vadd.xlane.f32.xlu0 %v4248_v36 }
 0x45e   : > { %v3643_v57 = vpop.permute.xlu0 %3642  ;;  %4791 = vmatmul.mubr.msk.bf16.gmra.mrb[40].mxu1 %vm469_vm0, %v5247_v56  ;;  %v4210_v37 = vmul.f32 %v6664_v21, %v4159_v35  ;;  %v4211_v29 = vmul.f32 %v6666_v52, %v4160_v58  ;;  %v5254_v56 = vld [vmem:[%s7276_s3 + $0xd0] sm:$0xff]  }
 0x45f   : > { %v3639_v11 = vpop.permute.xlu1 %3638  ;;  %v3655_v31 = vsel %vm1787_vm8, %v3641_v48, %v3643_v57  ;;  %3586 = vmatprep.mubr.bf16.mxu1 %v5362_v0  ;;  %v4164_v57 = vunpack.c.h.bf16 %v4142_v55 }
 0x460   : > { %v3654_v8 = vsel %vm1787_vm8, %v3639_v11, %v3641_v48  ;;  %3682 = vmatprep.subr.bf16.mxu1 %v3655_v31  ;;  %v4245_v19 = vadd.f32 %v4211_v29, %v4210_v37  ;;  %v5255_v48 = vld [vmem:[%s7276_s3 + $0x110] sm:$0xff]  }
 0x461   : > { %4744 = vmatmul.mubr.msk.bf16.gmra.mrb[44].mxu0 %vm469_vm0, %v5248_v3  ;;  %3683 = vmatpush1.bf16.msra.mxu1 %v3654_v8  ;;  %v4163_v3 = vunpack.c.l.bf16 %v4142_v55  ;;  %v4215_v31 = vmul.f32 %v6666_v52, %v4164_v57 }
 0x462   : > { %v3137_v32 = vpop.permute.xlu0 %3136  ;;  %3200 = vmatprep.mubr.bf16.mxu0 %v5362_v0  ;;  %4246 = vadd.xlane.f32.xlu1 %v4245_v19 }
 0x463   : > { %v3135_v4 = vpop.permute.xlu1 %3134  ;;  %v3147_v46 = vsel %vm1270_vm7, %v3137_v32, %v5173_v28  ;;  %v4214_v11 = vmul.f32 %v6664_v21, %v4163_v3  ;;  %v4143_v28 = vld [vmem:[%s7279_s6 + $0x30] sm:$0xff] }
 0x464   : > { %v3146_v42 = vsel %vm1270_vm7, %v3135_v4, %v3137_v32  ;;  %3174 = vmatprep.subr.bf16.mxu0 %v3147_v46  ;;  %v4165_v4 = vunpack.c.l.bf16 %v4143_v28  ;;  %v4166_v46 = vunpack.c.h.bf16 %v4143_v28 }
 0x465   : > { %3175 = vmatpush1.bf16.msra.mxu0 %v3146_v42  ;;  %v4251_v8 = vadd.f32 %v4215_v31, %v4214_v11  ;;  %v4146_v42 = vld [vmem:[%s7279_s6 + $0x48] sm:$0xff] }
 0x466   : > { %v3647_v44 = vpop.permute.xlu0 %3646  ;;  %4792 = vmatmul.mubr.msk.bf16.gmra.mrb[44].mxu1 %vm469_vm0, %v5249_v7  ;;  %v4217_v17 = vmul.f32 %v6666_v52, %v4166_v46  ;;  %v4171_v18 = vunpack.c.l.bf16 %v4146_v42 }
 0x467   : > { %v3649_v54 = vpop.permute.xlu1 %3648  ;;  %3710 = vmatprep.mubr.bf16.mxu1 %v5362_v0  ;;  %4252 = vadd.xlane.f32.xlu1 %v4251_v8 }
 0x468   : > { %v3657_v2 = vsel %vm1787_vm8, %v3647_v44, %v3649_v54  ;;  %v4172_v54 = vunpack.c.h.bf16 %v4146_v42  ;;  %v4222_v1 = vmul.f32 %v6664_v21, %v4171_v18 }
 0x469   : > { %4757 = vmatmul.mubr.msk.bf16.vlgmr.msra.gmra.mrb[32].mxu0 %vm469_vm0, %v5250_v30  ;;  %3684 = vmatprep.subr.bf16.mxu1 %v3657_v2  ;;  %v4170_v2 = vunpack.c.h.bf16 %v4145_v62 }
 0x46a   : > { %v3645_v16 = vpop.permute.xlu0 %3644  ;;  %3210 = vmatprep.mubr.bf16.mxu0 %v5362_v0  ;;  %v4223_v53 = vmul.f32 %v6666_v52, %v4172_v54 }
 0x46b   : > { %v3656_v20 = vsel %vm1787_vm8, %v3645_v16, %v3647_v44  ;;  %v4216_v44 = vmul.f32 %v6664_v21, %v4165_v4  ;;  %v4221_v24 = vmul.f32 %v6666_v52, %v4170_v2 }
 0x46c   : > { %3685 = vmatpush1.bf16.msra.mxu1 %v3656_v20  ;;  %v4263_v16 = vadd.f32 %v4223_v53, %v4222_v1 }
 0x46d   : > { %v4254_v9 = vadd.f32 %v4217_v17, %v4216_v44  ;;  %v4260_v15 = vadd.f32 %v4221_v24, %v4220_v14 }
 0x46f   : > { %4805 = vmatmul.mubr.msk.bf16.vlgmr.msra.gmra.mrb[32].mxu1 %vm469_vm0, %v5251_v41  ;;  %4255 = vadd.xlane.f32.xlu0 %v4254_v9 }
 0x470   : > { %3720 = vmatprep.mubr.bf16.mxu1 %v5362_v0 }
 0x471   : > { %4758 = vmatmul.mubr.msk.bf16.gmra.mrb[36].mxu0 %vm469_vm0, %v5252_v33 }
 0x472   : > { %3220 = vmatprep.mubr.bf16.mxu0 %v5362_v0 }
 0x473   : > { %4261 = vadd.xlane.f32.xlu0 %v4260_v15 }
 0x477   : > { %4806 = vmatmul.mubr.msk.bf16.gmra.mrb[36].mxu1 %vm469_vm0, %v5253_v40 }
 0x478   : > { %3730 = vmatprep.mubr.bf16.mxu1 %v5362_v0  ;;  %v3810_v3 = vpop.permute.xlu1 %3809 }
 0x479   : > { %4759 = vmatmul.mubr.msk.bf16.gmra.mrb[40].mxu0 %vm469_vm0, %v5254_v56 }
 0x47a   : > { %3230 = vmatprep.mubr.bf16.mxu0 %v5362_v0 }
 0x47b   : > { %v3815_v18 = vpop.permute.xlu0 %3814 }
 0x47f   : > { %4807 = vmatmul.mubr.msk.bf16.gmra.mrb[40].mxu1 %vm469_vm0, %v5255_v48 }
 0x480   : > { %3740 = vmatprep.mubr.bf16.mxu1 %v5362_v0  ;;  %v4144_v0 = vld [vmem:[%s7279_s6 + $0x38] sm:$0xff] }
 0x481   : > { %4760 = vmatmul.mubr.msk.bf16.gmra.mrb[44].mxu0 %vm469_vm0, %v5256_v59  ;;  %v4167_v22 = vunpack.c.l.bf16 %v4144_v0  ;;  %v4168_v38 = vunpack.c.h.bf16 %v4144_v0 }
 0x483   : > { %v4218_v32 = vmul.f32 %v6664_v21, %v4167_v22  ;;  %v4219_v7 = vmul.f32 %v6666_v52, %v4168_v38 }
 0x485   : > { %v4257_v30 = vadd.f32 %v4219_v7, %v4218_v32 }
 0x487   : > { %4808 = vmatmul.mubr.msk.bf16.gmra.mrb[44].mxu1 %vm469_vm0, %v5257_v63  ;;  %4258 = vadd.xlane.f32.xlu1 %v4257_v30 }
 0x48b   : > { %4264 = vadd.xlane.f32.xlu1 %v4263_v16 }
 0x4e0   : > { %v2725_v39 = vpop.f32.mrb[16].mxu1 }
 0x4e1   : > { %v2727_v20 = vpop.f32.mrb[17].mxu1 }
 0x4e2   : > { %v2729_v41 = vpop.f32.mrb[18].mxu1 }
 0x4e3   : > { %v2731_v51 = vpop.f32.mrb[19].mxu1 }
 0x4e8   : > { %v2735_v6 = vpop.f32.mrb[20].mxu1 }
 0x4e9   : > { %v2737_v47 = vpop.f32.mrb[21].mxu1 }
 0x4ea   : > { %v2739_v25 = vpop.f32.mrb[22].mxu1 }
 0x4eb   : > { %v2741_v33 = vpop.f32.mrb[23].mxu1 }
 0x4f0   : > { %v6760_v23 = vpop.f32.mrb[24].mxu1 }
 0x4f1   : > { %v6762_v45 = vpop.f32.mrb[25].mxu1 }
 0x4f2   : > { %v6764_v49 = vpop.f32.mrb[26].mxu1 }
 0x4f3   : > { %v6766_v26 = vpop.f32.mrb[27].mxu1 }
 0x4f8   : > { %v6768_v27 = vpop.f32.mrb[28].mxu1 }
 0x4f9   : > { %v6770_v5 = vpop.f32.mrb[29].mxu1 }
 0x4fa   : > { %v6772_v50 = vpop.f32.mrb[30].mxu1 }
 0x4fb   : > { %v6774_v43 = vpop.f32.mrb[31].mxu1 }
 0x53c   : > { %v3202_v34 = vpop.f32.mrb[32].mxu0 }
 0x53d   : > { %v3257_v35 = vsel %vm5905_vm9, %v3202_v34, 0.0  ;;  %v3204_v58 = vpop.f32.mrb[33].mxu0 }
 0x53e   : > { %v3273_v40 = vadd.f32 %v3257_v35, %v2725_v39  ;;  %v3258_v36 = vsel %vm5909_vm10, %v3204_v58, 0.0  ;;  %v3206_v37 = vpop.f32.mrb[34].mxu0 }
 0x53f   : > { %v3274_v29 = vadd.f32 %v3258_v36, %v2727_v20  ;;  %v3259_v56 = vsel %vm5905_vm9, %v3206_v37, 0.0  ;;  %v3208_v19 = vpop.f32.mrb[35].mxu0  ;;  %v4148_v20 = vld [vmem:[%s7279_s6 + $0x58] sm:$0xff] }
 0x540   : > { %v3275_v48 = vadd.f32 %v3259_v56, %v2729_v41  ;;  %v3260_v59 = vsel %vm5909_vm10, %v3208_v19, 0.0 }
 0x541   : > { %v3276_v63 = vadd.f32 %v3260_v59, %v2731_v51  ;;  %v3820_v51 = vpop.permute.xlu1 %3819 }
 0x542   : > { %v3712_v55 = vpop.f32.mrb[32].mxu1 }
 0x543   : > { %v3767_v57 = vsel %vm5921_vm11, %v3712_v55, 0.0  ;;  %v3714_v11 = vpop.f32.mrb[33].mxu1 }
 0x544   : > { %v3783_v31 = vadd.f32 %v3767_v57, %v3273_v40  ;;  %v3768_v0 = vsel %vm5925_vm12, %v3714_v11, 0.0  ;;  %v3716_v8 = vpop.f32.mrb[34].mxu1  ;;  %v3212_v22 = vpop.f32.mrb[36].mxu0  ;;  %v4175_v40 = vunpack.c.l.bf16 %v4148_v20 }
 0x545   : > { %v3784_v38 = vadd.f32 %v3768_v0, %v3274_v29  ;;  %v3769_v28 = vsel %vm5921_vm11, %v3716_v8, 0.0  ;;  %v3261_v32 = vsel %vm5905_vm9, %v3212_v22, 0.0  ;;  %v3718_v7 = vpop.f32.mrb[35].mxu1  ;;  %v3214_v4 = vpop.f32.mrb[37].mxu0 }
 0x546   : > { %v6792_v46 = vadd.f32 %v3810_v3, %v3783_v31  ;;  %v3785_v42 = vadd.f32 %v3769_v28, %v3275_v48  ;;  %v3277_v30 = vadd.f32 %v3261_v32, %v2735_v6  ;;  %v3770_v44 = vsel %vm5925_vm12, %v3718_v7, 0.0  ;;  %v3216_v17 = vpop.f32.mrb[38].mxu0  ;;  %v3825_v11 = vpop.permute.xlu0 %3824 }
 0x547   : > { %v6796_v54 = vadd.f32 %v3810_v3, %v3784_v38  ;;  %v3786_v62 = vadd.f32 %v3770_v44, %v3276_v63  ;;  %v3262_v9 = vsel %vm5909_vm10, %v3214_v4, 0.0  ;;  %v3263_v1 = vsel %vm5905_vm9, %v3216_v17, 0.0  ;;  %v3218_v10 = vpop.f32.mrb[39].mxu0  ;;  %v4147_v17 = vld [vmem:[%s7279_s6 + $0x50] sm:$0xff] }
 0x548   : > { %v6802_v2 = vadd.f32 %v3815_v18, %v3785_v42  ;;  %v3278_v53 = vadd.f32 %v3262_v9, %v2737_v47  ;;  %v3279_v14 = vadd.f32 %v3263_v1, %v2739_v25  ;;  %v3264_v24 = vsel %vm5909_vm10, %v3218_v10, 0.0 }
 0x549   : > { %v6806_v16 = vadd.f32 %v3815_v18, %v3786_v62  ;;  %v3280_v15 = vadd.f32 %v3264_v24, %v2741_v33  ;;  %v3863_v39 = vadd.f32 %v6796_v54, %v6792_v46  ;;  %v4176_v48 = vunpack.c.h.bf16 %v4148_v20  ;;  %v3830_v18 = vpop.permute.xlu1 %3829 }
 0x54a   : > { %v3722_v41 = vpop.f32.mrb[36].mxu1 }
 0x54b   : > { %v3771_v6 = vsel %vm5921_vm11, %v3722_v41, 0.0  ;;  %3864 = vadd.xlane.f32.xlu1 %v3863_v39  ;;  %v3724_v47 = vpop.f32.mrb[37].mxu1  ;;  %v3866_v25 = vadd.f32 %v6806_v16, %v6802_v2 }
 0x54c   : > { %v3787_v34 = vadd.f32 %v3771_v6, %v3277_v30  ;;  %v3772_v33 = vsel %vm5925_vm12, %v3724_v47, 0.0  ;;  %v3726_v35 = vpop.f32.mrb[38].mxu1  ;;  %v3222_v58 = vpop.f32.mrb[40].mxu0 }
 0x54d   : > { %v3788_v36 = vadd.f32 %v3772_v33, %v3278_v53  ;;  %v3773_v37 = vsel %vm5921_vm11, %v3726_v35, 0.0  ;;  %v3265_v29 = vsel %vm5905_vm9, %v3222_v58, 0.0  ;;  %3867 = vadd.xlane.f32.xlu0 %v3866_v25  ;;  %v3728_v56 = vpop.f32.mrb[39].mxu1  ;;  %v3224_v19 = vpop.f32.mrb[41].mxu0  ;;  %v4226_v53 = vmul.f32 %v6664_v21, %v4175_v40 }
 0x54e   : > { %v6823_v59 = vadd.f32 %v3820_v51, %v3787_v34  ;;  %v3789_v63 = vadd.f32 %v3773_v37, %v3279_v14  ;;  %v3281_v55 = vadd.f32 %v3265_v29, %v6760_v23  ;;  %v3774_v3 = vsel %vm5925_vm12, %v3728_v56, 0.0  ;;  %v3226_v57 = vpop.f32.mrb[42].mxu0  ;;  %v3835_v35 = vpop.permute.xlu0 %3834 }
 0x54f   : > { %v6828_v31 = vadd.f32 %v3820_v51, %v3788_v36  ;;  %v3790_v0 = vadd.f32 %v3774_v3, %v3280_v15  ;;  %v3266_v8 = vsel %vm5909_vm10, %v3224_v19, 0.0  ;;  %v3267_v22 = vsel %vm5905_vm9, %v3226_v57, 0.0  ;;  %v3228_v38 = vpop.f32.mrb[43].mxu0 }
 0x550   : > { %v6834_v28 = vadd.f32 %v3825_v11, %v3789_v63  ;;  %v3282_v32 = vadd.f32 %v3266_v8, %v6762_v45  ;;  %v3283_v23 = vadd.f32 %v3267_v22, %v6764_v49  ;;  %v3268_v7 = vsel %vm5909_vm10, %v3228_v38, 0.0 }
 0x551   : > { %v6840_v4 = vadd.f32 %v3825_v11, %v3790_v0  ;;  %v3284_v42 = vadd.f32 %v3268_v7, %v6766_v26  ;;  %v3869_v30 = vadd.f32 %v6828_v31, %v6823_v59  ;;  %v4227_v14 = vmul.f32 %v6666_v52, %v4176_v48  ;;  %v3840_v7 = vpop.permute.xlu1 %3839 }
 0x552   : > { %v3732_v44 = vpop.f32.mrb[40].mxu1  ;;  %v4173_v51 = vunpack.c.l.bf16 %v4147_v17  ;;  %v4174_v57 = vunpack.c.h.bf16 %v4147_v17 }
 0x553   : > { %v3775_v45 = vsel %vm5921_vm11, %v3732_v44, 0.0  ;;  %3870 = vadd.xlane.f32.xlu0 %v3869_v30  ;;  %v3734_v49 = vpop.f32.mrb[41].mxu1  ;;  %v3872_v62 = vadd.f32 %v6840_v4, %v6834_v28  ;;  %v4269_v0 = vadd.f32 %v4227_v14, %v4226_v53 }
 0x554   : > { %v3791_v9 = vadd.f32 %v3775_v45, %v3281_v55  ;;  %v3776_v26 = vsel %vm5925_vm12, %v3734_v49, 0.0  ;;  %v3736_v1 = vpop.f32.mrb[42].mxu1  ;;  %v3232_v10 = vpop.f32.mrb[44].mxu0  ;;  %v4224_v17 = vmul.f32 %v6664_v21, %v4173_v51 }
 0x555   : > { %v3792_v24 = vadd.f32 %v3776_v26, %v3282_v32  ;;  %v3777_v15 = vsel %vm5921_vm11, %v3736_v1, 0.0  ;;  %v3269_v39 = vsel %vm5905_vm9, %v3232_v10, 0.0  ;;  %3873 = vadd.xlane.f32.xlu1 %v3872_v62  ;;  %v3738_v20 = vpop.f32.mrb[43].mxu1  ;;  %v3234_v41 = vpop.f32.mrb[45].mxu0  ;;  %v4179_v32 = vunpack.c.l.bf16 %v4150_v60  ;;  %v4152_v26 = vld [vmem:[%s7279_s6 + $0x78] sm:$0xff] }
 0x556   : > { %v6860_v6 = vadd.f32 %v3830_v18, %v3791_v9  ;;  %v3793_v47 = vadd.f32 %v3777_v15, %v3283_v23  ;;  %v3285_v25 = vadd.f32 %v3269_v39, %v6768_v27  ;;  %v3778_v34 = vsel %vm5925_vm12, %v3738_v20, 0.0  ;;  %v3236_v33 = vpop.f32.mrb[46].mxu0  ;;  %v3845_v1 = vpop.permute.xlu0 %3844 }
 0x557   : > { %v6865_v58 = vadd.f32 %v3830_v18, %v3792_v24  ;;  %v3794_v40 = vadd.f32 %v3778_v34, %v3284_v42  ;;  %v3270_v36 = vsel %vm5909_vm10, %v3234_v41, 0.0  ;;  %v3271_v37 = vsel %vm5905_vm9, %v3236_v33, 0.0  ;;  %v3238_v29 = vpop.f32.mrb[47].mxu0 }
 0x558   : > { %v6871_v56 = vadd.f32 %v3835_v35, %v3793_v47  ;;  %v3286_v19 = vadd.f32 %v3270_v36, %v6770_v5  ;;  %v3287_v27 = vadd.f32 %v3271_v37, %v6772_v50  ;;  %v3272_v48 = vsel %vm5909_vm10, %v3238_v29, 0.0 }
 0x559   : > { %v6877_v63 = vadd.f32 %v3835_v35, %v3794_v40  ;;  %v3288_v55 = vadd.f32 %v3272_v48, %v6774_v43  ;;  %v3875_v3 = vadd.f32 %v6865_v58, %v6860_v6  ;;  %v4149_v43 = vld [vmem:[%s7279_s6 + $0x60] sm:$0xff]  ;;  %v4180_v23 = vunpack.c.h.bf16 %v4150_v60  ;;  %v4285_v60 = vld [vmem:[%s7280_s7 + $0x8] sm:$0xff] }
 0x55a   : > { %v3742_v11 = vpop.f32.mrb[44].mxu1  ;;  %v4225_v18 = vmul.f32 %v6666_v52, %v4174_v57  ;;  %v4177_v9 = vunpack.c.l.bf16 %v4149_v43  ;;  %v4178_v53 = vunpack.c.h.bf16 %v4149_v43  ;;  %v4230_v24 = vmul.f32 %v6664_v21, %v4179_v32  ;;  %v4238_v57 = vpop.xlane.xlu0 %4237  ;;  %v4288_v43 = vld [vmem:[%s7280_s7 + $0x20] sm:$0xff] }
 0x55b   : > { %v3779_v5 = vsel %vm5921_vm11, %v3742_v11, 0.0  ;;  %3876 = vadd.xlane.f32.xlu0 %v3875_v3  ;;  %v3744_v50 = vpop.f32.mrb[45].mxu1  ;;  %v3878_v61 = vadd.f32 %v6877_v63, %v6871_v56  ;;  %v4231_v15 = vmul.f32 %v6666_v52, %v4180_v23  ;;  %v4183_v41 = vunpack.c.l.bf16 %v4152_v26  ;;  %v4241_v11 = vpop.xlane.xlu1 %4240  ;;  %v4287_v23 = vld [vmem:[%s7280_s7 + $0x18] sm:$0xff] }
 0x55c   : > { %v3795_v8 = vadd.f32 %v3779_v5, %v3285_v25  ;;  %v3780_v22 = vsel %vm5925_vm12, %v3744_v50, 0.0  ;;  %v3746_v38 = vpop.f32.mrb[46].mxu1  ;;  %v4184_v51 = vunpack.c.h.bf16 %v4152_v26  ;;  %v4266_v47 = vadd.f32 %v4225_v18, %v4224_v17 }
 0x55d   : > { %v3796_v42 = vadd.f32 %v3780_v22, %v3286_v19  ;;  %v3781_v30 = vsel %vm5921_vm11, %v3746_v38, 0.0  ;;  %3879 = vadd.xlane.f32.xlu1 %v3878_v61  ;;  %v3748_v44 = vpop.f32.mrb[47].mxu1  ;;  %v4228_v25 = vmul.f32 %v6664_v21, %v4177_v9  ;;  %v4229_v33 = vmul.f32 %v6666_v52, %v4178_v53 }
 0x55e   : > { %v6898_v45 = vadd.f32 %v3840_v7, %v3795_v8  ;;  %v3797_v49 = vadd.f32 %v3781_v30, %v3287_v27  ;;  %v3782_v62 = vsel %vm5925_vm12, %v3748_v44, 0.0  ;;  %v4181_v35 = vunpack.c.l.bf16 %v4151_v13  ;;  %v4244_v5 = vpop.xlane.xlu0 %4243 }
 0x55f   : > { %v6905_v12 = vadd.f32 %v3840_v7, %v3796_v42  ;;  %v3798_v10 = vadd.f32 %v3782_v62, %v3288_v55  ;;  %v4182_v40 = vunpack.c.h.bf16 %v4151_v13  ;;  %v4275_v36 = vadd.f32 %v4231_v15, %v4230_v24  ;;  %v4247_v7 = vpop.xlane.xlu1 %4246 }
 0x560   : > { %v6907_v14 = vadd.f32 %v3845_v1, %v3797_v49  ;;  %v4234_v37 = vmul.f32 %v6664_v21, %v4183_v41  ;;  %v4235_v29 = vmul.f32 %v6666_v52, %v4184_v51  ;;  %v4272_v19 = vadd.f32 %v4229_v33, %v4228_v25 }
 0x561   : > { %v6914_v39 = vadd.f32 %v3845_v1, %v3798_v10  ;;  %4270 = vadd.xlane.f32.xlu1 %v4269_v0  ;;  %v3881_v20 = vadd.f32 %v6905_v12, %v6898_v45  ;;  %v4232_v27 = vmul.f32 %v6664_v21, %v4181_v35  ;;  %v4233_v48 = vmul.f32 %v6666_v52, %v4182_v40  ;;  %v4286_v21 = vld [vmem:[%s7280_s7 + $0x10] sm:$0xff]  ;;  %v4284_v52 = vld [vmem:[%s7280_s7] sm:$0xff] }
 0x562   : > { %v4281_v55 = vadd.f32 %v4235_v29, %v4234_v37  ;;  %v4301_v50 = vadd.f32 %v4285_v60, %v4241_v11  ;;  %v4302_v0 = vadd.f32 %v4286_v21, %v4244_v5  ;;  %v4250_v8 = vpop.xlane.xlu0 %4249  ;;  %v4300_v22 = vadd.f32 %v4284_v52, %v4238_v57 }
 0x563   : > { %3882 = vadd.xlane.f32.xlu0 %v3881_v20  ;;  %v3884_v34 = vadd.f32 %v6914_v39, %v6907_v14  ;;  %v4278_v3 = vadd.f32 %v4233_v48, %v4232_v27  ;;  %v4304_v32 = vadd.f32 %v4288_v43, %v4250_v8  ;;  %v4303_v30 = vadd.f32 %v4287_v23, %v4247_v7  ;;  %v6941_v18 = vpop.xlane.xlu1 %4252 }
 0x564   : > { %v4317_v61 = vadd.f32 1.0, %v4301_v50  ;;  %v4318_v38 = vadd.f32 1.0, %v4302_v0  ;;  %v4316_v42 = vadd.f32 1.0, %v4300_v22 }
 0x565   : > { %3885 = vadd.xlane.f32.xlu1 %v3884_v34  ;;  %v4320_v44 = vadd.f32 1.0, %v4304_v32  ;;  %v4319_v17 = vadd.f32 1.0, %v4303_v30 }
 0x566   : > { %v6945_v62 = vpop.xlane.xlu0 %4255 }
 0x567   : > { %4267 = vadd.xlane.f32.xlu0 %v4266_v47  ;;  %v6943_v49 = vpop.xlane.xlu1 %4258 }
 0x569   : > { %4276 = vadd.xlane.f32.xlu1 %v4275_v36 }
 0x56a   : > { %v6949_v26 = vpop.xlane.xlu0 %4261 }
 0x56b   : > { %4273 = vadd.xlane.f32.xlu0 %v4272_v19  ;;  %v6947_v9 = vpop.xlane.xlu1 %4264 }
 0x56d   : > { %4282 = vadd.xlane.f32.xlu1 %v4281_v55 }
 0x56f   : > { %4279 = vadd.xlane.f32.xlu0 %v4278_v3 }
 0x57e   : > { %4331 = vperm.xlu1 %5097, %v4317_v61  }
 0x582   : > { %4336 = vperm.xlu1 %5097, %v4318_v38  }
 0x585   : > { %4326 = vperm.xlu0 %5098, %v4316_v42  }
 0x586   : > { %4346 = vperm.xlu1 %5097, %v4320_v44  }
 0x589   : > { %4341 = vperm.xlu0 %5098, %v4319_v17  }
 0x5d8   : > { %v3865_v1 = vpop.xlane.xlu1 %3864 }
 0x5d9   : > { %v3887_v10 = vmul.f32 0.00390625, %v3865_v1  ;;  %v4290_v1 = vld [vmem:[%s7280_s7 + $0x30] sm:$0xff] }
 0x5da   : > { %v3868_v53 = vpop.xlane.xlu0 %3867 }
 0x5db   : > { %v6952_v24 = vsub.f32 %v6792_v46, %v3887_v10  ;;  %v6955_v15 = vsub.f32 %v6796_v54, %v3887_v10  ;;  %v3888_v13 = vmul.f32 0.00390625, %v3868_v53  ;;  %v4291_v53 = vld [vmem:[%s7280_s7 + $0x38] sm:$0xff] }
 0x5dd   : > { %v3911_v20 = vmul.f32 %v6952_v24, %v6952_v24  ;;  %v3912_v41 = vmul.f32 %v6955_v15, %v6955_v15  ;;  %v6962_v51 = vsub.f32 %v6802_v2, %v3888_v13  ;;  %v6965_v47 = vsub.f32 %v6806_v16, %v3888_v13 }
 0x5df   : > { %v3913_v46 = vmul.f32 %v6962_v51, %v6962_v51  ;;  %v3914_v54 = vmul.f32 %v6965_v47, %v6965_v47  ;;  %v3927_v25 = vadd.f32 %v3912_v41, %v3911_v20  ;;  %v4292_v20 = vld [vmem:[%s7280_s7 + $0x40] sm:$0xff] }
 0x5e0   : > { %v3871_v34 = vpop.xlane.xlu0 %3870 }
 0x5e1   : > { %v3889_v33 = vmul.f32 0.00390625, %v3871_v34  ;;  %3928 = vadd.xlane.f32.xlu0 %v3927_v25  ;;  %v3930_v35 = vadd.f32 %v3914_v54, %v3913_v46  ;;  %v4307_v54 = vadd.f32 %v4291_v53, %v6943_v49 }
 0x5e2   : > { %v3874_v40 = vpop.xlane.xlu1 %3873 }
 0x5e3   : > { %v6972_v36 = vsub.f32 %v6823_v59, %v3889_v33  ;;  %v6975_v2 = vsub.f32 %v6828_v31, %v3889_v33  ;;  %v3890_v16 = vmul.f32 0.00390625, %v3874_v40  ;;  %3931 = vadd.xlane.f32.xlu1 %v3930_v35  ;;  %v4323_v34 = vadd.f32 1.0, %v4307_v54  ;;  %v4296_v33 = vld [vmem:[%s7280_s7 + $0x60] sm:$0xff]  ;;  %v4293_v40 = vld [vmem:[%s7280_s7 + $0x48] sm:$0xff] }
 0x5e5   : > { %v3915_v37 = vmul.f32 %v6972_v36, %v6972_v36  ;;  %v3916_v29 = vmul.f32 %v6975_v2, %v6975_v2  ;;  %v6982_v19 = vsub.f32 %v6834_v28, %v3890_v16  ;;  %v6985_v27 = vsub.f32 %v6840_v4, %v3890_v16 }
 0x5e6   : > { %v4309_v16 = vadd.f32 %v4293_v40, %v6947_v9  ;;  %v4299_v9 = vld [vmem:[%s7280_s7 + $0x78] sm:$0xff] }
 0x5e7   : > { %v3917_v59 = vmul.f32 %v6982_v19, %v6982_v19  ;;  %v3918_v31 = vmul.f32 %v6985_v27, %v6985_v27  ;;  %v3933_v48 = vadd.f32 %v3916_v29, %v3915_v37  ;;  %v4295_v37 = vld [vmem:[%s7280_s7 + $0x58] sm:$0xff] }
 0x5e8   : > { %v3877_v55 = vpop.xlane.xlu0 %3876 }
 0x5e9   : > { %v3891_v3 = vmul.f32 0.00390625, %v3877_v55  ;;  %3934 = vadd.xlane.f32.xlu0 %v3933_v48  ;;  %v3936_v57 = vadd.f32 %v3918_v31, %v3917_v59  ;;  %v4297_v59 = vld [vmem:[%s7280_s7 + $0x68] sm:$0xff] }
 0x5ea   : > { %v3880_v60 = vpop.xlane.xlu1 %3879 }
 0x5eb   : > { %v6992_v11 = vsub.f32 %v6860_v6, %v3891_v3  ;;  %v6995_v28 = vsub.f32 %v6865_v58, %v3891_v3  ;;  %v3892_v4 = vmul.f32 0.00390625, %v3880_v60  ;;  %3937 = vadd.xlane.f32.xlu1 %v3936_v57 }
 0x5ed   : > { %v3919_v5 = vmul.f32 %v6992_v11, %v6992_v11  ;;  %v3920_v50 = vmul.f32 %v6995_v28, %v6995_v28  ;;  %v7002_v21 = vsub.f32 %v6871_v56, %v3892_v4  ;;  %v7005_v61 = vsub.f32 %v6877_v63, %v3892_v4 }
 0x5ee   : > { %v4271_v52 = vpop.xlane.xlu1 %4270 }
 0x5ef   : > { %v3921_v6 = vmul.f32 %v7002_v21, %v7002_v21  ;;  %v3922_v58 = vmul.f32 %v7005_v61, %v7005_v61  ;;  %v3939_v0 = vadd.f32 %v3920_v50, %v3919_v5  ;;  %v4311_v55 = vadd.f32 %v4295_v37, %v4271_v52 }
 0x5f0   : > { %v3883_v43 = vpop.xlane.xlu0 %3882 }
 0x5f1   : > { %v3893_v8 = vmul.f32 0.00390625, %v3883_v43  ;;  %3940 = vadd.xlane.f32.xlu0 %v3939_v0  ;;  %v3942_v22 = vadd.f32 %v3922_v58, %v3921_v6 }
 0x5f2   : > { %v3886_v38 = vpop.xlane.xlu1 %3885 }
 0x5f3   : > { %v7012_v32 = vsub.f32 %v6898_v45, %v3893_v8  ;;  %v7015_v56 = vsub.f32 %v6905_v12, %v3893_v8  ;;  %v3894_v63 = vmul.f32 0.00390625, %v3886_v38  ;;  %3943 = vadd.xlane.f32.xlu1 %v3942_v22 }
 0x5f4   : > { %v4268_v41 = vpop.xlane.xlu0 %4267 }
 0x5f5   : > { %v3923_v23 = vmul.f32 %v7012_v32, %v7012_v32  ;;  %v3924_v7 = vmul.f32 %v7015_v56, %v7015_v56  ;;  %v7022_v42 = vsub.f32 %v6907_v14, %v3894_v63  ;;  %v7025_v30 = vsub.f32 %v6914_v39, %v3894_v63  ;;  %v4289_v14 = vld [vmem:[%s7280_s7 + $0x28] sm:$0xff] }
 0x5f6   : > { %v4306_v39 = vadd.f32 %v4290_v1, %v6945_v62  ;;  %v4305_v10 = vadd.f32 %v4289_v14, %v6941_v18  ;;  %v4294_v62 = vld [vmem:[%s7280_s7 + $0x50] sm:$0xff]  ;;  %v4308_v18 = vadd.f32 %v4292_v20, %v6949_v26  ;;  %v4277_v31 = vpop.xlane.xlu1 %4276 }
 0x5f7   : > { %v3925_v45 = vmul.f32 %v7022_v42, %v7022_v42  ;;  %v3926_v12 = vmul.f32 %v7025_v30, %v7025_v30  ;;  %v3945_v44 = vadd.f32 %v3924_v7, %v3923_v23  ;;  %v4310_v25 = vadd.f32 %v4294_v62, %v4268_v41  ;;  %v4298_v26 = vld [vmem:[%s7280_s7 + $0x70] sm:$0xff] }
 0x5f8   : > { %v4322_v13 = vadd.f32 1.0, %v4306_v39  ;;  %v4321_v46 = vadd.f32 1.0, %v4305_v10  ;;  %v4274_v35 = vpop.xlane.xlu0 %4273  ;;  %v4313_v3 = vadd.f32 %v4297_v59, %v4277_v31 }
 0x5f9   : > { %3946 = vadd.xlane.f32.xlu0 %v3945_v44  ;;  %v3948_v17 = vadd.f32 %v3926_v12, %v3925_v45  ;;  %v4312_v49 = vadd.f32 %v4296_v33, %v4274_v35 }
 0x5fa   : > { %v4283_v57 = vpop.xlane.xlu1 %4282 }
 0x5fb   : > { %3949 = vadd.xlane.f32.xlu1 %v3948_v17  ;;  %v4315_v60 = vadd.f32 %v4299_v9, %v4283_v57 }
 0x5fc   : > { %v4280_v29 = vpop.xlane.xlu0 %4279 }
 0x5fd   : > { %v4314_v48 = vadd.f32 %v4298_v26, %v4280_v29 }
 0x5fe   : > { %v7069_v4 = vpop.permute.xlu1 %4331 }
 0x602   : > { %v7073_v50 = vpop.permute.xlu1 %4336 }
 0x604   : > { %v7071_v5 = vpop.permute.xlu0 %4326 }
 0x606   : > { %v7077_v52 = vpop.permute.xlu1 %4346 }
 0x608   : > { %v7075_v6 = vpop.permute.xlu0 %4341 }
 0x60c   : > { %4356 = vperm.xlu1 %5097, %v4322_v13  }
 0x60f   : > { %4351 = vperm.xlu0 %5098, %v4321_v46  }
 0x610   : > { %4382 = vperm.xlu1 %5097, %v4308_v18  }
 0x613   : > { %4361 = vperm.xlu0 %5098, %v4323_v34  }
 0x614   : > { %4392 = vperm.xlu1 %5097, %v4310_v25  }
 0x617   : > { %4387 = vperm.xlu0 %5098, %v4309_v16  }
 0x618   : > { %4402 = vperm.xlu1 %5097, %v4312_v49  }
 0x61b   : > { %4397 = vperm.xlu0 %5098, %v4311_v55  }
 0x61c   : > { %4412 = vperm.xlu1 %5097, %v4314_v48  }
 0x61f   : > { %4407 = vperm.xlu0 %5098, %v4313_v3  }
 0x623   : > { %4417 = vperm.xlu0 %5098, %v4315_v60  }
 0x66e   : > { %v3929_v58 = vpop.xlane.xlu0 %3928 }
 0x66f   : > { %v3951_v0 = vmul.f32 0.00390625, %v3929_v58 }
 0x670   : > { %v3932_v43 = vpop.xlane.xlu1 %3931 }
 0x671   : > { %v3959_v8 = vadd.f32 1e-05, %v3951_v0  ;;  %v3952_v22 = vmul.f32 0.00390625, %v3932_v43 }
 0x673   : > { %5306 = vrsqrt.f32 %v3959_v8  ;;  %v3960_v38 = vadd.f32 1e-05, %v3952_v22 }
 0x675   : > { %5308 = vrsqrt.f32 %v3960_v38 }
 0x676   : > { %v3935_v63 = vpop.xlane.xlu0 %3934 }
 0x677   : > { %v3953_v23 = vmul.f32 0.00390625, %v3935_v63 }
 0x678   : > { %v3938_v7 = vpop.xlane.xlu1 %3937 }
 0x679   : > { %v3961_v45 = vadd.f32 1e-05, %v3953_v23  ;;  %v3954_v12 = vmul.f32 0.00390625, %v3938_v7 }
 0x67b   : > { %5310 = vrsqrt.f32 %v3961_v45  ;;  %v3962_v44 = vadd.f32 1e-05, %v3954_v12 }
 0x67d   : > { %v5307_v17 = vpop.eup %5306  ;;  %5312 = vrsqrt.f32 %v3962_v44 }
 0x67e   : > { %v7080_v1 = vmul.f32 %v5307_v17, %v6952_v24  ;;  %v7083_v14 = vmul.f32 %v5307_v17, %v6955_v15  ;;  %v3941_v39 = vpop.xlane.xlu0 %3940 }
 0x67f   : > { %v5309_v10 = vpop.eup %5308  ;;  %v3955_v53 = vmul.f32 0.00390625, %v3941_v39 }
 0x680   : > { %v7086_v13 = vmul.f32 %v5309_v10, %v6962_v51  ;;  %v7089_v20 = vmul.f32 %v5309_v10, %v6965_v47  ;;  %v3944_v41 = vpop.xlane.xlu1 %3943  ;;  %v4007_v62 = vmul.f32 0.044715, %v7080_v1  ;;  %v4008_v24 = vmul.f32 0.044715, %v7083_v14 }
 0x681   : > { %v3963_v46 = vadd.f32 1e-05, %v3955_v53  ;;  %v3956_v54 = vmul.f32 0.00390625, %v3944_v41 }
 0x682   : > { %v4009_v15 = vmul.f32 0.044715, %v7086_v13  ;;  %v4023_v25 = vmul.f32 %v4007_v62, %v7080_v1  ;;  %v4010_v34 = vmul.f32 0.044715, %v7089_v20  ;;  %v4024_v51 = vmul.f32 %v4008_v24, %v7083_v14 }
 0x683   : > { %5314 = vrsqrt.f32 %v3963_v46  ;;  %v3964_v18 = vadd.f32 1e-05, %v3956_v54  ;;  %v3991_v62 = vmul.f32 0.5, %v7080_v1 }
 0x684   : > { %v4025_v47 = vmul.f32 %v4009_v15, %v7086_v13  ;;  %v4039_v35 = vmul.f32 %v4023_v25, %v7080_v1  ;;  %v4026_v40 = vmul.f32 %v4010_v34, %v7089_v20  ;;  %v4040_v37 = vmul.f32 %v4024_v51, %v7083_v14 }
 0x685   : > { %v5311_v33 = vpop.eup %5310  ;;  %5316 = vrsqrt.f32 %v3964_v18 }
 0x686   : > { %v7101_v49 = vmul.f32 %v5311_v33, %v6972_v36  ;;  %v7104_v16 = vmul.f32 %v5311_v33, %v6975_v2  ;;  %v3947_v26 = vpop.xlane.xlu0 %3946  ;;  %v4041_v29 = vmul.f32 %v4025_v47, %v7086_v13  ;;  %v4055_v31 = vadd.f32 %v4039_v35, %v7080_v1 }
 0x687   : > { %v3957_v59 = vmul.f32 0.00390625, %v3947_v26  ;;  %v4042_v48 = vmul.f32 %v4026_v40, %v7089_v20  ;;  %v5313_v55 = vpop.eup %5312  ;;  %v4056_v9 = vadd.f32 %v4040_v37, %v7083_v14 }
 0x688   : > { %v3950_v3 = vpop.xlane.xlu1 %3949  ;;  %v4071_v60 = vmul.f32 0.7978846, %v4055_v31  ;;  %v4011_v2 = vmul.f32 0.044715, %v7101_v49  ;;  %v4012_v0 = vmul.f32 0.044715, %v7104_v16  ;;  %v4057_v43 = vadd.f32 %v4041_v29, %v7086_v13 }
 0x689   : > { %v3965_v57 = vadd.f32 1e-05, %v3957_v59  ;;  %v3958_v36 = vmul.f32 0.00390625, %v3950_v3  ;;  %v4072_v58 = vmul.f32 0.7978846, %v4056_v9  ;;  %v7115_v8 = vmul.f32 %v5313_v55, %v6982_v19 }
 0x68a   : > { %v4058_v38 = vadd.f32 %v4042_v48, %v7089_v20  ;;  %v4027_v63 = vmul.f32 %v4011_v2, %v7101_v49  ;;  %v4028_v23 = vmul.f32 %v4012_v0, %v7104_v16  ;;  %v4073_v7 = vmul.f32 0.7978846, %v4057_v43 }
 0x68b   : > { %5318 = vrsqrt.f32 %v3965_v57  ;;  %v3966_v22 = vadd.f32 1e-05, %v3958_v36  ;;  %v7125_v39 = vmul.f32 %v5313_v55, %v6985_v27  ;;  %v4013_v41 = vmul.f32 0.044715, %v7115_v8 }
 0x68c   : > { %5320 = vtanh.f32 %v4071_v60  ;;  %v4043_v44 = vmul.f32 %v4027_v63, %v7101_v49  ;;  %v4074_v19 = vmul.f32 0.7978846, %v4058_v38  ;;  %v4044_v53 = vmul.f32 %v4028_v23, %v7104_v16  ;;  %v7169_v9 = vpop.permute.xlu1 %4356 }
 0x68d   : > { %v5315_v45 = vpop.eup %5314  ;;  %5322 = vrsqrt.f32 %v3966_v22  ;;  %v3992_v27 = vmul.f32 0.5, %v7083_v14  ;;  %v4014_v47 = vmul.f32 0.044715, %v7125_v39  ;;  %v4029_v33 = vmul.f32 %v4013_v41, %v7115_v8 }
 0x68e   : > { %v7121_v12 = vmul.f32 %v5315_v45, %v6992_v11  ;;  %5324 = vtanh.f32 %v4072_v58  ;;  %v7128_v10 = vmul.f32 %v5315_v45, %v6995_v28  ;;  %v4059_v54 = vadd.f32 %v4043_v44, %v7101_v49  ;;  %v7154_v40 = vpop.permute.xlu0 %4351 }
 0x68f   : > { %v5317_v17 = vpop.eup %5316  ;;  %5326 = vtanh.f32 %v4073_v7  ;;  %v4060_v28 = vadd.f32 %v4044_v53, %v7104_v16  ;;  %v3995_v57 = vmul.f32 0.5, %v7101_v49  ;;  %v7173_v36 = vmul.f32 0.5, %v7104_v16 }
 0x690   : > { %v7133_v46 = vmul.f32 %v5317_v17, %v7002_v21  ;;  %v7136_v11 = vmul.f32 %v5317_v17, %v7005_v61  ;;  %v4015_v24 = vmul.f32 0.044715, %v7121_v12  ;;  %v7146_v21 = vmul.f32 0.5, %v7086_v13 }
 0x691   : > { %5328 = vtanh.f32 %v4074_v19  ;;  %v4075_v61 = vmul.f32 0.7978846, %v4059_v54  ;;  %v4076_v25 = vmul.f32 0.7978846, %v4060_v28  ;;  %v4016_v34 = vmul.f32 0.044715, %v7128_v10 }
 0x692   : > { %v4017_v15 = vmul.f32 0.044715, %v7133_v46  ;;  %v4018_v18 = vmul.f32 0.044715, %v7136_v11  ;;  %v4031_v1 = vmul.f32 %v4015_v24, %v7121_v12  ;;  %v7157_v13 = vmul.f32 0.5, %v7089_v20  ;;  %v7196_v19 = vpop.permute.xlu0 %4361 }
 0x693   : > { %5330 = vtanh.f32 %v4075_v61  ;;  %v4032_v26 = vmul.f32 %v4016_v34, %v7128_v10  ;;  %v7182_v58 = vmul.f32 %v4014_v47, %v7125_v39  ;;  %v7185_v2 = vmul.f32 %v4029_v33, %v7115_v8 }
 0x694   : > { %v4033_v14 = vmul.f32 %v4017_v15, %v7133_v46  ;;  %v4034_v51 = vmul.f32 %v4018_v18, %v7136_v11  ;;  %v4047_v37 = vmul.f32 %v4031_v1, %v7121_v12  ;;  %5332 = vtanh.f32 %v4076_v25  ;;  %v4383_v15 = vpop.permute.xlu1 %4382 }
 0x695   : > { %v5319_v35 = vpop.eup %5318 }
 0x696   : > { %v5321_v29 = vpop.eup %5320  ;;  %v7162_v59 = vmul.f32 %v5319_v35, %v7012_v32  ;;  %v7165_v31 = vmul.f32 %v5319_v35, %v7015_v56  ;;  %v4049_v48 = vmul.f32 %v4033_v14, %v7133_v46  ;;  %v4050_v55 = vmul.f32 %v4034_v51, %v7136_v11 }
 0x697   : > { %v5323_v3 = vpop.eup %5322  ;;  %v4103_v20 = vadd.f32 1.0, %v5321_v29  ;;  %v4063_v63 = vadd.f32 %v4047_v37, %v7121_v12 }
 0x698   : > { %v5325_v32 = vpop.eup %5324  ;;  %v7176_v60 = vmul.f32 %v5323_v3, %v7022_v42  ;;  %v7179_v56 = vmul.f32 %v5323_v3, %v7025_v30  ;;  %v4019_v0 = vmul.f32 0.044715, %v7162_v59  ;;  %v4020_v49 = vmul.f32 0.044715, %v7165_v31  ;;  %v4388_v3 = vpop.permute.xlu0 %4387 }
 0x699   : > { %v4065_v16 = vadd.f32 %v4049_v48, %v7133_v46  ;;  %v4066_v43 = vadd.f32 %v4050_v55, %v7136_v11  ;;  %v5327_v22 = vpop.eup %5326  ;;  %v4104_v42 = vadd.f32 1.0, %v5325_v32  ;;  %v4119_v38 = vmul.f32 %v4103_v20, %v3991_v62 }
 0x69a   : > { %v4048_v30 = vmul.f32 %v4032_v26, %v7128_v10  ;;  %v4035_v23 = vmul.f32 %v4019_v0, %v7162_v59  ;;  %v4036_v7 = vmul.f32 %v4020_v49, %v7165_v31  ;;  %v4021_v54 = vmul.f32 0.044715, %v7176_v60 }
 0x69b   : > { %v4081_v45 = vmul.f32 0.7978846, %v4065_v16  ;;  %v4082_v44 = vmul.f32 0.7978846, %v4066_v43  ;;  %v5329_v17 = vpop.eup %5328  ;;  %v4120_v53 = vmul.f32 %v4104_v42, %v3992_v27  ;;  %v4364_v41 = vmul.f32 %v7071_v5, %v4119_v38 }
 0x69c   : > { %v4022_v62 = vmul.f32 0.044715, %v7179_v56  ;;  %v4051_v28 = vmul.f32 %v4035_v23, %v7162_v59  ;;  %v4052_v24 = vmul.f32 %v4036_v7, %v7165_v31  ;;  %v4105_v18 = vadd.f32 1.0, %v5327_v22  ;;  %v4393_v7 = vpop.permute.xlu1 %4392 }
 0x69d   : > { %5334 = vtanh.f32 %v4081_v45  ;;  %v4365_v27 = vmul.f32 %v7071_v5, %v4120_v53  ;;  %v4420_v61 = vadd.f32 %v4383_v15, %v4364_v41  ;;  %v4037_v25 = vmul.f32 %v4021_v54, %v7176_v60  ;;  %v5331_v34 = vpop.eup %5330 }
 0x69e   : > { %5336 = vtanh.f32 %v4082_v44  ;;  %v4067_v1 = vadd.f32 %v4051_v28, %v7162_v59  ;;  %v4068_v14 = vadd.f32 %v4052_v24, %v7165_v31  ;;  %v4038_v51 = vmul.f32 %v4022_v62, %v7179_v56  ;;  %v5333_v5 = vpop.eup %5332 }
 0x69f   : > { %v4106_v47 = vadd.f32 1.0, %v5329_v17  ;;  %v4421_v33 = vadd.f32 %v4383_v15, %v4365_v27  ;;  %4436 = vst [vmem:[%s7204_s16] sm:$0xff] %v4420_v61  ;;  %v4053_v35 = vmul.f32 %v4037_v25, %v7176_v60  ;;  %v4107_v26 = vadd.f32 1.0, %v5331_v34 }
 0x6a0   : > { %v4121_v37 = vmul.f32 %v4105_v18, %v7146_v21  ;;  %v4083_v29 = vmul.f32 0.7978846, %v4067_v1  ;;  %v4084_v48 = vmul.f32 0.7978846, %v4068_v14  ;;  %v4054_v55 = vmul.f32 %v4038_v51, %v7179_v56  ;;  %v4403_v34 = vpop.permute.xlu1 %4402 }
 0x6a1   : > { %v4122_v20 = vmul.f32 %v4106_v47, %v7157_v13  ;;  %4437 = vst [vmem:[%s7204_s16 + $0x8] sm:$0xff] %v4421_v33  ;;  %v4069_v32 = vadd.f32 %v4053_v35, %v7176_v60  ;;  %v4108_v0 = vadd.f32 1.0, %v5333_v5  ;;  %v4123_v49 = vmul.f32 %v4107_v26, %v3995_v57 }
 0x6a2   : > { %v4366_v16 = vmul.f32 %v7069_v4, %v4121_v37  ;;  %5338 = vtanh.f32 %v4083_v29  ;;  %v4070_v43 = vadd.f32 %v4054_v55, %v7179_v56  ;;  %v4064_v22 = vadd.f32 %v4048_v30, %v7128_v10 }
 0x6a3   : > { %v4367_v21 = vmul.f32 %v7069_v4, %v4122_v20  ;;  %5340 = vtanh.f32 %v4084_v48  ;;  %v4085_v42 = vmul.f32 0.7978846, %v4069_v32  ;;  %v4124_v13 = vmul.f32 %v4108_v0, %v7173_v36  ;;  %v7230_v36 = vpop.permute.xlu0 %4397 }
 0x6a4   : > { %v4368_v38 = vmul.f32 %v7073_v50, %v4123_v49  ;;  %v4086_v23 = vmul.f32 0.7978846, %v4070_v43  ;;  %v4422_v57 = vadd.f32 %v4388_v3, %v4366_v16  ;;  %v4079_v44 = vmul.f32 0.7978846, %v4063_v63 }
 0x6a5   : > { %v4423_v45 = vadd.f32 %v4388_v3, %v4367_v21  ;;  %5342 = vtanh.f32 %v4085_v42  ;;  %v4369_v17 = vmul.f32 %v7073_v50, %v4124_v13  ;;  %v4080_v53 = vmul.f32 0.7978846, %v4064_v22  ;;  %v4413_v22 = vpop.permute.xlu1 %4412 }
 0x6a6   : > { %v4424_v4 = vadd.f32 %v4393_v7, %v4368_v38  ;;  %v4001_v41 = vmul.f32 0.5, %v7133_v46  ;;  %5344 = vtanh.f32 %v4086_v23  ;;  %4438 = vst [vmem:[%s7204_s16 + $0x10] sm:$0xff] %v4422_v57  ;;  %v4046_v54 = vmul.f32 %v7182_v58, %v7125_v39 }
 0x6a7   : > { %v5335_v30 = vpop.eup %5334  ;;  %4439 = vst [vmem:[%s7204_s16 + $0x18] sm:$0xff] %v4423_v45  ;;  %v4061_v63 = vadd.f32 %v7185_v2, %v7115_v8  ;;  %v4002_v50 = vmul.f32 0.5, %v7136_v11  ;;  %v4425_v24 = vadd.f32 %v4393_v7, %v4369_v17  ;;  %5346 = vtanh.f32 %v4079_v44  ;;  %v4408_v1 = vpop.permute.xlu0 %4407 }
 0x6a8   : > { %v5337_v62 = vpop.eup %5336  ;;  %v4113_v28 = vadd.f32 1.0, %v5335_v30  ;;  %4440 = vst [vmem:[%s7204_s16 + $0x20] sm:$0xff] %v4424_v4  ;;  %5348 = vtanh.f32 %v4080_v53  ;;  %v4062_v15 = vadd.f32 %v4046_v54, %v7125_v39  ;;  %v4003_v51 = vmul.f32 0.5, %v7162_v59 }
 0x6a9   : > { %v4114_v46 = vadd.f32 1.0, %v5337_v62  ;;  %v4077_v18 = vmul.f32 0.7978846, %v4061_v63  ;;  %4441 = vst [vmem:[%s7204_s16 + $0x28] sm:$0xff] %v4425_v24  ;;  %v4004_v35 = vmul.f32 0.5, %v7165_v31  ;;  %v4006_v59 = vmul.f32 0.5, %v7179_v56 }
 0x6aa   : > { %v4129_v27 = vmul.f32 %v4113_v28, %v4001_v41  ;;  %v4078_v25 = vmul.f32 0.7978846, %v4062_v15  ;;  %v3999_v43 = vmul.f32 0.5, %v7121_v12  ;;  %v3997_v44 = vmul.f32 0.5, %v7115_v8 }
 0x6ab   : > { %v4130_v61 = vmul.f32 %v4114_v46, %v4002_v50  ;;  %5350 = vtanh.f32 %v4077_v18  ;;  %v4418_v17 = vpop.permute.xlu0 %4417  ;;  %v3998_v53 = vmul.f32 0.5, %v7125_v39 }
 0x6ac   : > { %v4374_v58 = vmul.f32 %v7154_v40, %v4129_v27  ;;  %v5339_v2 = vpop.eup %5338  ;;  %5352 = vtanh.f32 %v4078_v25 }
 0x6ad   : > { %v4375_v11 = vmul.f32 %v7154_v40, %v4130_v61  ;;  %v5341_v14 = vpop.eup %5340  ;;  %v4115_v47 = vadd.f32 1.0, %v5339_v2  ;;  %v4005_v40 = vmul.f32 0.5, %v7176_v60  ;;  %v4000_v60 = vmul.f32 0.5, %v7128_v10 }
 0x6ae   : > { %v4430_v33 = vadd.f32 %v4408_v1, %v4374_v58  ;;  %v4116_v26 = vadd.f32 1.0, %v5341_v14 }
 0x6af   : > { %v4431_v37 = vadd.f32 %v4408_v1, %v4375_v11  ;;  %v5343_v5 = vpop.eup %5342  ;;  %v4131_v29 = vmul.f32 %v4115_v47, %v4003_v51 }
 0x6b0   : > { %4446 = vst [vmem:[%s7204_s16 + $0x50] sm:$0xff] %v4430_v33  ;;  %v5345_v48 = vpop.eup %5344  ;;  %v4132_v55 = vmul.f32 %v4116_v26, %v4004_v35  ;;  %v4117_v3 = vadd.f32 1.0, %v5343_v5 }
 0x6b1   : > { %4447 = vst [vmem:[%s7204_s16 + $0x58] sm:$0xff] %v4431_v37  ;;  %v5347_v20 = vpop.eup %5346  ;;  %v4376_v32 = vmul.f32 %v7169_v9, %v4131_v29  ;;  %v4118_v0 = vadd.f32 1.0, %v5345_v48 }
 0x6b2   : > { %v5349_v49 = vpop.eup %5348  ;;  %v4377_v31 = vmul.f32 %v7169_v9, %v4132_v55  ;;  %v4133_v16 = vmul.f32 %v4117_v3, %v4005_v40  ;;  %v4111_v21 = vadd.f32 1.0, %v5347_v20 }
 0x6b3   : > { %v4134_v42 = vmul.f32 %v4118_v0, %v4006_v59  ;;  %v4112_v13 = vadd.f32 1.0, %v5349_v49  ;;  %v4432_v38 = vadd.f32 %v4413_v22, %v4376_v32 }
 0x6b4   : > { %v4378_v7 = vmul.f32 %v7196_v19, %v4133_v16  ;;  %v4127_v56 = vmul.f32 %v4111_v21, %v3999_v43  ;;  %v4433_v57 = vadd.f32 %v4413_v22, %v4377_v31 }
 0x6b5   : > { %v5351_v23 = vpop.eup %5350  ;;  %v4379_v45 = vmul.f32 %v7196_v19, %v4134_v42  ;;  %v4128_v9 = vmul.f32 %v4112_v13, %v4000_v60  ;;  %4448 = vst [vmem:[%s7204_s16 + $0x60] sm:$0xff] %v4432_v38 }
 0x6b6   : > { %v4109_v12 = vadd.f32 1.0, %v5351_v23  ;;  %v5353_v10 = vpop.eup %5352  ;;  %v4372_v4 = vmul.f32 %v7077_v52, %v4127_v56  ;;  %4449 = vst [vmem:[%s7204_s16 + $0x68] sm:$0xff] %v4433_v57  ;;  %v4434_v30 = vadd.f32 %v4418_v17, %v4378_v7 }
 0x6b7   : > { %v4373_v19 = vmul.f32 %v7077_v52, %v4128_v9  ;;  %v4110_v41 = vadd.f32 1.0, %v5353_v10  ;;  %v4435_v8 = vadd.f32 %v4418_v17, %v4379_v45 }
 0x6b8   : > { %v4125_v54 = vmul.f32 %v4109_v12, %v3997_v44  ;;  %v4428_v63 = vadd.f32 %v4403_v34, %v4372_v4  ;;  %4450 = vst [vmem:[%s7204_s16 + $0x70] sm:$0xff] %v4434_v30 }
 0x6b9   : > { %v4429_v62 = vadd.f32 %v4403_v34, %v4373_v19  ;;  %v4126_v50 = vmul.f32 %v4110_v41, %v3998_v53  ;;  %4451 = vst [vmem:[%s7204_s16 + $0x78] sm:$0xff] %v4435_v8 }
 0x6ba   : > { %v4370_v28 = vmul.f32 %v7075_v6, %v4125_v54  ;;  %4444 = vst [vmem:[%s7204_s16 + $0x40] sm:$0xff] %v4428_v63 }
 0x6bb   : > { %4445 = vst [vmem:[%s7204_s16 + $0x48] sm:$0xff] %v4429_v62  ;;  %v4371_v39 = vmul.f32 %v7075_v6, %v4126_v50 }
 0x6bc   : > { %v4426_v24 = vadd.f32 %v7230_v36, %v4370_v28 }
 0x6bd   : > { %v4427_v46 = vadd.f32 %v7230_v36, %v4371_v39 }
 0x6be   : > { %4442 = vst [vmem:[%s7204_s16 + $0x30] sm:$0xff] %v4426_v24 }
 0x6bf   : > { %4443 = vst [vmem:[%s7204_s16 + $0x38] sm:$0xff] %v4427_v46 }
 0x6c0 PF: > { %s18_s27 = sadd.s32 1, %s5360_s27  }
 0x6c1   : > { %p15_p4 = scmp.ge.s32.totalorder %s18_s27, 4  }
 0x6c3   :  { %17 = sbr.rel (!%p15_p4) target bundleno = 1 (0x1), region = 101 }

</bundles_post_ra>
